<compile_context>
chip_gen: v5e
topology: v5e:2x2
jax: 0.10.0
libtpu: 0.0.40
codegen_flags: <defaults>
</compile_context>

<pallas_src>
import functools
from math import pi as PI

import jax
import jax.numpy as jnp
from jax import lax
from jax.experimental import pallas as pl
from jax.experimental.pallas import tpu as pltpu

_LOG2 = 0.6931471805599453
_VMEM = functools.partial(pl.BlockSpec, memory_space=pltpu.MemorySpace.VMEM)


def _ssp(x):
    # ShiftedSoftplus: softplus(x) - log(2), numerically stable; ssp(0) == 0.
    return jnp.maximum(x, 0.0) + jnp.log1p(jnp.exp(-jnp.abs(x))) - _LOG2


# ------------------------------------------------------------ fused kernel ---
def _schnet_kernel(h_ref, dist_ref, cw_ref, w_ref, b_ref, o_ref, *,
                   n_nodes, num_gaussians, n_layers, coeff, gauss_delta,
                   wrow, brow, wmax):
    """Entire SchNet forward on one VMEM-resident block.

    w_ref: packed weight slab (rows, wmax); each section is a zero-padded
           (fan_in, wmax) matrix starting at an 8-aligned row.
    b_ref: packed bias slab; row k holds one zero-padded (1, wmax) bias.
    """
    def W(name):
        start, rows = wrow[name]
        return w_ref[start:start + rows, :]

    def B(name):
        r = brow[name]
        return b_ref[r:r + 1, :]

    # node embedding: Linear(in_dim -> hidden)
    h = jnp.dot(h_ref[...], W("emb_w"),
                preferred_element_type=jnp.float32) + B("emb_b")      # (N, wmax)

    dist = dist_ref[...]        # (N, N) pairwise distances (dense radius graph)
    cw = cw_ref[...]            # (N, N) cosine cutoff * adjacency mask

    # GaussianSmearing offsets built in-kernel: offset_g = g * delta.
    off = (lax.broadcasted_iota(jnp.int32, (1, num_gaussians), 1)
           .astype(jnp.float32) * gauss_delta)                        # (1, G)

    for layer in range(n_layers):
        wg1, bg1 = W(f"wg1_{layer}"), B(f"bg1_{layer}")
        wg2, bg2 = W(f"wg2_{layer}"), B(f"bg2_{layer}")
        w1 = W(f"w1_{layer}")
        w2, b2 = W(f"w2_{layer}"), B(f"b2_{layer}")
        wl, bl = W(f"wl_{layer}"), B(f"bl_{layer}")

        # CFConv.lin1 (no bias)
        xf = jnp.dot(h, w1, preferred_element_type=jnp.float32)       # (N, wmax)

        # message passing: agg[i] = sum_j filter(i, j) * xf[j]   (aggr='add')
        # Unrolled accumulation over source nodes -> everything stays in dense
        # (N, *) layouts: no (E, 1) tensors, no (N, N, F) reshape/relayout.
        agg = jnp.zeros((n_nodes, wmax), jnp.float32)
        for j in range(n_nodes):
            d_col = dist[:, j:j + 1]                                  # (N, 1)
            g = jnp.exp(coeff * (d_col - off) ** 2)                   # (N, G)
            t = _ssp(jnp.dot(g, wg1,
                             preferred_element_type=jnp.float32) + bg1)
            wf = jnp.dot(t, wg2,
                         preferred_element_type=jnp.float32) + bg2    # (N, wmax)
            wf = wf * cw[:, j:j + 1]        # cutoff weight; zero on non-edges
            agg = agg + wf * xf[j:j + 1, :]                           # x_j * W_ij

        # CFConv.lin2 -> act -> lin, then residual (h = h + interaction(h))
        y = _ssp(jnp.dot(agg, w2, preferred_element_type=jnp.float32) + b2)
        y = jnp.dot(y, wl, preferred_element_type=jnp.float32) + bl
        h = h + y

    # output MLP: hidden -> hidden//2 -> out (zero-padded to wmax columns)
    t = _ssp(jnp.dot(h, W("mlp_w1"),
                     preferred_element_type=jnp.float32) + B("mlp_b1"))
    o_ref[...] = jnp.dot(t, W("mlp_w2"),
                         preferred_element_type=jnp.float32) + B("mlp_b2")


def schnet_fused(h0, dist, cw, w_slab, b_slab, *, cutoff, num_gaussians,
                 n_layers, out_dim, wrow, brow, wmax):
    # TODO(synk): for large graphs, tile the interaction over target-node blocks
    #             via a ("parallel",) grid axis (keeps the working set within
    #             v7x's 64 MiB VMEM and uses its second TensorCore); at N<=16 a
    #             single VMEM-resident block covers everything.
    n = h0.shape[0]
    delta = cutoff / (num_gaussians - 1)
    coeff = -0.5 / delta ** 2
    kernel = functools.partial(
        _schnet_kernel, n_nodes=n, num_gaussians=num_gaussians,
        n_layers=n_layers, coeff=coeff, gauss_delta=delta,
        wrow=wrow, brow=brow, wmax=wmax)
    out = pl.pallas_call(
        kernel,
        out_shape=jax.ShapeDtypeStruct((n, wmax), jnp.float32),
        in_specs=[_VMEM()] * 5,
        out_specs=_VMEM(),
    )(h0, dist, cw, w_slab, b_slab)
    return out[:, :out_dim]


# ------------------------------------------------------------ param packing --
def _zero_pad(a, rows, cols):
    return jnp.pad(a, ((0, rows - a.shape[0]), (0, cols - a.shape[1])))


def pack_params(params):
    """Pack all weights into one (rows, wmax) slab and all biases into a small
    second slab. Zero padding keeps the in-kernel matmuls exact (pad rows/cols
    contribute nothing; ssp(0) == 0)."""
    in_dim, hidden = params["emb_w"].shape
    num_gaussians, num_filters = params["interactions"][0]["wg1"].shape
    out_dim = params["mlp_w2"].shape[1]
    n_layers = len(params["interactions"])
    wmax = max(hidden, num_filters, out_dim)
    for k in (in_dim, num_gaussians, wmax):
        assert k % 8 == 0, "slab packing assumes 8-row-aligned fan-ins"
    # TODO(synk): non multiple-of-8 fan-ins would need extra row padding plus
    #             matching zero-padding of the producing activation widths.

    w_secs, b_secs = [], []

    def add_w(name, w, eff_rows):
        w_secs.append((name, _zero_pad(w, eff_rows, wmax)))

    def add_b(name, b):
        b_secs.append((name, _zero_pad(b, 1, wmax)))

    add_w("emb_w", params["emb_w"], in_dim)
    add_b("emb_b", params["emb_b"])
    for l, p in enumerate(params["interactions"]):
        add_w(f"wg1_{l}", p["wg1"], num_gaussians); add_b(f"bg1_{l}", p["bg1"])
        add_w(f"wg2_{l}", p["wg2"], wmax);          add_b(f"bg2_{l}", p["bg2"])
        add_w(f"w1_{l}",  p["w1"],  wmax)
        add_w(f"w2_{l}",  p["w2"],  wmax);          add_b(f"b2_{l}", p["b2"])
        add_w(f"wl_{l}",  p["wl"],  wmax);          add_b(f"bl_{l}", p["bl"])
    add_w("mlp_w1", params["mlp_w1"], wmax); add_b("mlp_b1", params["mlp_b1"])
    add_w("mlp_w2", params["mlp_w2"], wmax); add_b("mlp_b2", params["mlp_b2"])

    wrow, off = {}, 0
    for name, w in w_secs:
        wrow[name] = (off, w.shape[0])
        off += w.shape[0]
    w_slab = jnp.concatenate([w for _, w in w_secs], axis=0)

    brow = {name: i for i, (name, _) in enumerate(b_secs)}
    b_slab = jnp.concatenate([b for _, b in b_secs], axis=0)
    pad = (-b_slab.shape[0]) % 8
    if pad:
        b_slab = jnp.pad(b_slab, ((0, pad), (0, 0)))

    meta = dict(num_gaussians=num_gaussians, n_layers=n_layers,
                out_dim=out_dim, wmax=wmax)
    return w_slab, b_slab, wrow, brow, meta


# ----------------------------------------------------------------- params ----
def _linear(key, fan_in, fan_out, bias=True):
    kw, kb = jax.random.split(key)
    scale = 1.0 / jnp.sqrt(jnp.float32(fan_in))
    w = jax.random.uniform(kw, (fan_in, fan_out), jnp.float32, -scale, scale)
    if not bias:
        return w, None
    b = jax.random.uniform(kb, (1, fan_out), jnp.float32, -scale, scale)
    return w, b


def init_params(key, in_dim, hidden, num_filters, num_gaussians, n_layers, out_dim):
    keys = jax.random.split(key, 3 + 6 * n_layers)
    params = {}
    params["emb_w"], params["emb_b"] = _linear(keys[0], in_dim, hidden)
    layers = []
    k = 3
    for _ in range(n_layers):
        p = {}
        p["wg1"], p["bg1"] = _linear(keys[k], num_gaussians, num_filters); k += 1
        p["wg2"], p["bg2"] = _linear(keys[k], num_filters, num_filters);   k += 1
        p["w1"], _ = _linear(keys[k], hidden, num_filters, bias=False);    k += 1
        p["w2"], p["b2"] = _linear(keys[k], num_filters, hidden);          k += 1
        p["wl"], p["bl"] = _linear(keys[k], hidden, hidden);               k += 1
        k += 1
        layers.append(p)
    params["interactions"] = layers
    params["mlp_w1"], params["mlp_b1"] = _linear(keys[1], hidden, hidden // 2)
    params["mlp_w2"], params["mlp_b2"] = _linear(keys[2], hidden // 2, out_dim)
    return params


# ---------------------------------------------------------------- forward ----
def schnet_forward(params, h, pos, batch, *, cutoff):
    """Returns (x_pred, h_pred) = (pos, SchNet node features)."""
    n = h.shape[0]
    w_slab, b_slab, wrow, brow, meta = pack_params(params)

    # radius_graph as a dense adjacency + cosine cutoff (graph-construction glue)
    # TODO(synk): max_num_neighbors capping of radius_graph is not enforced;
    #             with <=8 nodes per graph it never binds.
    diff = pos[:, None, :] - pos[None, :, :]
    dist = jnp.sqrt(jnp.sum(diff * diff, axis=-1))                     # (N, N)
    adj = ((batch[:, None] == batch[None, :])
           & ~jnp.eye(n, dtype=bool) & (dist < cutoff))
    cw = 0.5 * (jnp.cos(dist * (PI / cutoff)) + 1.0) * adj.astype(jnp.float32)

    h_out = schnet_fused(h, dist, cw, w_slab, b_slab, cutoff=cutoff,
                         wrow=wrow, brow=brow, **meta)
    return pos, h_out


# ------------------------------------------------- pure-JAX dense reference --
def schnet_reference(params, h, pos, batch, *, cutoff):
    hp = jax.lax.Precision.HIGHEST
    n = h.shape[0]
    num_gaussians = params["interactions"][0]["wg1"].shape[0]
    diff = pos[:, None, :] - pos[None, :, :]
    dist = jnp.sqrt(jnp.sum(diff * diff, axis=-1))
    adj = ((batch[:, None] == batch[None, :])
           & ~jnp.eye(n, dtype=bool) & (dist < cutoff))
    cw = 0.5 * (jnp.cos(dist * (PI / cutoff)) + 1.0) * adj.astype(jnp.float32)

    delta = cutoff / (num_gaussians - 1)
    coeff = -0.5 / delta ** 2
    off = jnp.arange(num_gaussians, dtype=jnp.float32) * delta
    ea = jnp.exp(coeff * (dist[:, :, None] - off[None, None, :]) ** 2)  # (N,N,G)

    h = jnp.dot(h, params["emb_w"], precision=hp) + params["emb_b"]
    for p in params["interactions"]:
        t = _ssp(jnp.einsum("ijg,gf->ijf", ea, p["wg1"], precision=hp) + p["bg1"])
        wf = jnp.einsum("ijf,fk->ijk", t, p["wg2"], precision=hp) + p["bg2"]
        wf = wf * cw[:, :, None]
        xf = jnp.dot(h, p["w1"], precision=hp)
        agg = jnp.sum(wf * xf[None, :, :], axis=1)
        y = _ssp(jnp.dot(agg, p["w2"], precision=hp) + p["b2"])
        y = jnp.dot(y, p["wl"], precision=hp) + p["bl"]
        h = h + y
    t = _ssp(jnp.dot(h, params["mlp_w1"], precision=hp) + params["mlp_b1"])
    return jnp.dot(t, params["mlp_w2"], precision=hp) + params["mlp_b2"]


# ------------------------------------------------------------------- main ----
if __name__ == "__main__":
    N_NODES = 16          # 2 graphs x 8 nodes batched into one kernel call
    IN_DIM = 8
    HIDDEN = 32
    NUM_FILTERS = 32
    NUM_GAUSSIANS = 16
    N_LAYERS = 2
    CUTOFF = 5.0
    OUT_DIM = HIDDEN      # out_node_dim defaults to hidden_dim

    root = jax.random.PRNGKey(0)
    k_h, k_pos, k_param = jax.random.split(root, 3)

    h_in = jax.random.normal(k_h, (N_NODES, IN_DIM), jnp.float32)
    pos = jax.random.uniform(k_pos, (N_NODES, 3), jnp.float32, 0.0, 3.0)
    batch = jnp.repeat(jnp.arange(2, dtype=jnp.int32), N_NODES // 2)

    params = init_params(k_param, IN_DIM, HIDDEN, NUM_FILTERS,
                         NUM_GAUSSIANS, N_LAYERS, OUT_DIM)

    fwd = jax.jit(functools.partial(schnet_forward, cutoff=CUTOFF))
    x_pred, h_pred = fwd(params, h_in, pos, batch)
    jax.block_until_ready(h_pred)
    assert x_pred.shape == (N_NODES, 3)
    assert h_pred.shape == (N_NODES, OUT_DIM)

    # correctness check against the pure-JAX dense reference (loose tolerance
    # to absorb MXU matmul precision-mode differences).
    h_ref = schnet_reference(params, h_in, pos, batch, cutoff=CUTOFF)
    err = float(jnp.max(jnp.abs(h_pred - h_ref)))
    assert err < 5e-2, f"kernel/reference mismatch: {err}"

    print("KERNEL_OK")
</pallas_src>

<mosaic_0001>
module attributes {stable_mosaic.version = 11 : i64} {
  func.func @_schnet_kernel(%arg0: memref<16x8xf32, #tpu.memory_space<vmem>>, %arg1: memref<16x16xf32, #tpu.memory_space<vmem>>, %arg2: memref<16x16xf32, #tpu.memory_space<vmem>>, %arg3: memref<360x32xf32, #tpu.memory_space<vmem>>, %arg4: memref<16x32xf32, #tpu.memory_space<vmem>>, %arg5: memref<16x32xf32, #tpu.memory_space<vmem>>) attributes {dimension_semantics = [], scalar_prefetch = 0 : i64, scratch_operands = 0 : i64, tpu.core_type = #tpu.core_type<tc>} {
    %c0 = arith.constant 0 : index
    %c0_0 = arith.constant 0 : index
    %0 = vector.load %arg0[%c0, %c0_0] : memref<16x8xf32, #tpu.memory_space<vmem>>, vector<16x8xf32>
    %c0_1 = arith.constant 0 : index
    %c0_2 = arith.constant 0 : index
    %1 = vector.load %arg3[%c0_1, %c0_2] : memref<360x32xf32, #tpu.memory_space<vmem>>, vector<8x32xf32>
    %cst = arith.constant dense<0.000000e+00> : vector<16x32xf32>
    %2 = tpu.matmul %0, %1, %cst {dimension_numbers = #tpu.dot_dimension_numbers<[1], [0], [0], [1], [0, 0, 1, 1], [], []>} : vector<16x8xf32>, vector<8x32xf32>, vector<16x32xf32> -> vector<16x32xf32>
    %c0_3 = arith.constant 0 : index
    %c0_4 = arith.constant 0 : index
    %3 = vector.load %arg4[%c0_3, %c0_4] : memref<16x32xf32, #tpu.memory_space<vmem>>, vector<1x32xf32>
    %4 = vector.broadcast %3 : vector<1x32xf32> to vector<16x32xf32>
    %5 = arith.addf %2, %4 : vector<16x32xf32>
    %c0_5 = arith.constant 0 : index
    %c0_6 = arith.constant 0 : index
    %6 = vector.load %arg1[%c0_5, %c0_6] : memref<16x16xf32, #tpu.memory_space<vmem>>, vector<16x16xf32>
    %c0_7 = arith.constant 0 : index
    %c0_8 = arith.constant 0 : index
    %7 = vector.load %arg2[%c0_7, %c0_8] : memref<16x16xf32, #tpu.memory_space<vmem>>, vector<16x16xf32>
    %8 = tpu.iota {dimensions = array<i32: 1>} : vector<1x16xi32>
    %9 = arith.sitofp %8 : vector<1x16xi32> to vector<1x16xf32>
    %cst_9 = arith.constant 0.333333343 : f32
    %10 = vector.broadcast %cst_9 : f32 to vector<1x16xf32>
    %11 = arith.mulf %9, %10 : vector<1x16xf32>
    %c8 = arith.constant 8 : index
    %c0_10 = arith.constant 0 : index
    %12 = vector.load %arg3[%c8, %c0_10] : memref<360x32xf32, #tpu.memory_space<vmem>>, vector<16x32xf32>
    %c1 = arith.constant 1 : index
    %c0_11 = arith.constant 0 : index
    %13 = vector.load %arg4[%c1, %c0_11] : memref<16x32xf32, #tpu.memory_space<vmem>>, vector<1x32xf32>
    %c24 = arith.constant 24 : index
    %c0_12 = arith.constant 0 : index
    %14 = vector.load %arg3[%c24, %c0_12] : memref<360x32xf32, #tpu.memory_space<vmem>>, vector<32x32xf32>
    %c2 = arith.constant 2 : index
    %c0_13 = arith.constant 0 : index
    %15 = vector.load %arg4[%c2, %c0_13] : memref<16x32xf32, #tpu.memory_space<vmem>>, vector<1x32xf32>
    %c56 = arith.constant 56 : index
    %c0_14 = arith.constant 0 : index
    %16 = vector.load %arg3[%c56, %c0_14] : memref<360x32xf32, #tpu.memory_space<vmem>>, vector<32x32xf32>
    %c88 = arith.constant 88 : index
    %c0_15 = arith.constant 0 : index
    %17 = vector.load %arg3[%c88, %c0_15] : memref<360x32xf32, #tpu.memory_space<vmem>>, vector<32x32xf32>
    %c3 = arith.constant 3 : index
    %c0_16 = arith.constant 0 : index
    %18 = vector.load %arg4[%c3, %c0_16] : memref<16x32xf32, #tpu.memory_space<vmem>>, vector<1x32xf32>
    %c120 = arith.constant 120 : index
    %c0_17 = arith.constant 0 : index
    %19 = vector.load %arg3[%c120, %c0_17] : memref<360x32xf32, #tpu.memory_space<vmem>>, vector<32x32xf32>
    %c4 = arith.constant 4 : index
    %c0_18 = arith.constant 0 : index
    %20 = vector.load %arg4[%c4, %c0_18] : memref<16x32xf32, #tpu.memory_space<vmem>>, vector<1x32xf32>
    %cst_19 = arith.constant dense<0.000000e+00> : vector<16x32xf32>
    %21 = tpu.matmul %5, %16, %cst_19 {dimension_numbers = #tpu.dot_dimension_numbers<[1], [0], [0], [1], [0, 0, 1, 1], [], []>} : vector<16x32xf32>, vector<32x32xf32>, vector<16x32xf32> -> vector<16x32xf32>
    %cst_20 = arith.constant 0.000000e+00 : f32
    %22 = vector.broadcast %cst_20 : f32 to vector<16x32xf32>
    %23 = vector.extract_strided_slice %6 {offsets = [0, 0], sizes = [16, 1], strides = [1, 1]} : vector<16x16xf32> to vector<16x1xf32>
    %24 = vector.broadcast %23 : vector<16x1xf32> to vector<16x16xf32>
    %25 = vector.broadcast %11 : vector<1x16xf32> to vector<16x16xf32>
    %26 = arith.subf %24, %25 : vector<16x16xf32>
    %27 = arith.mulf %26, %26 : vector<16x16xf32>
    %cst_21 = arith.constant -4.500000e+00 : f32
    %28 = vector.broadcast %cst_21 : f32 to vector<16x16xf32>
    %29 = arith.mulf %28, %27 : vector<16x16xf32>
    %30 = math.exp %29 : vector<16x16xf32>
    %cst_22 = arith.constant dense<0.000000e+00> : vector<16x32xf32>
    %31 = tpu.matmul %30, %12, %cst_22 {dimension_numbers = #tpu.dot_dimension_numbers<[1], [0], [0], [1], [0, 0, 1, 1], [], []>} : vector<16x16xf32>, vector<16x32xf32>, vector<16x32xf32> -> vector<16x32xf32>
    %32 = vector.broadcast %13 : vector<1x32xf32> to vector<16x32xf32>
    %33 = arith.addf %31, %32 : vector<16x32xf32>
    %cst_23 = arith.constant 0.000000e+00 : f32
    %34 = vector.broadcast %cst_23 : f32 to vector<16x32xf32>
    %35 = arith.maximumf %33, %34 : vector<16x32xf32>
    %36 = math.absf %33 : vector<16x32xf32>
    %cst_24 = arith.constant 0.000000e+00 : f32
    %37 = vector.broadcast %cst_24 : f32 to vector<16x32xf32>
    %38 = arith.subf %37, %36 : vector<16x32xf32>
    %39 = math.exp %38 : vector<16x32xf32>
    %40 = math.log1p %39 : vector<16x32xf32>
    %41 = arith.addf %35, %40 : vector<16x32xf32>
    %cst_25 = arith.constant 0.693147182 : f32
    %42 = vector.broadcast %cst_25 : f32 to vector<16x32xf32>
    %43 = arith.subf %41, %42 : vector<16x32xf32>
    %cst_26 = arith.constant dense<0.000000e+00> : vector<16x32xf32>
    %44 = tpu.matmul %43, %14, %cst_26 {dimension_numbers = #tpu.dot_dimension_numbers<[1], [0], [0], [1], [0, 0, 1, 1], [], []>} : vector<16x32xf32>, vector<32x32xf32>, vector<16x32xf32> -> vector<16x32xf32>
    %45 = vector.broadcast %15 : vector<1x32xf32> to vector<16x32xf32>
    %46 = arith.addf %44, %45 : vector<16x32xf32>
    %47 = vector.extract_strided_slice %7 {offsets = [0, 0], sizes = [16, 1], strides = [1, 1]} : vector<16x16xf32> to vector<16x1xf32>
    %48 = vector.broadcast %47 : vector<16x1xf32> to vector<16x32xf32>
    %49 = arith.mulf %46, %48 : vector<16x32xf32>
    %50 = vector.extract_strided_slice %21 {offsets = [0, 0], sizes = [1, 32], strides = [1, 1]} : vector<16x32xf32> to vector<1x32xf32>
    %51 = vector.broadcast %50 : vector<1x32xf32> to vector<16x32xf32>
    %52 = arith.mulf %49, %51 : vector<16x32xf32>
    %53 = arith.addf %22, %52 : vector<16x32xf32>
    %54 = vector.extract_strided_slice %6 {offsets = [0, 1], sizes = [16, 1], strides = [1, 1]} : vector<16x16xf32> to vector<16x1xf32>
    %55 = vector.broadcast %54 : vector<16x1xf32> to vector<16x16xf32>
    %56 = vector.broadcast %11 : vector<1x16xf32> to vector<16x16xf32>
    %57 = arith.subf %55, %56 : vector<16x16xf32>
    %58 = arith.mulf %57, %57 : vector<16x16xf32>
    %cst_27 = arith.constant -4.500000e+00 : f32
    %59 = vector.broadcast %cst_27 : f32 to vector<16x16xf32>
    %60 = arith.mulf %59, %58 : vector<16x16xf32>
    %61 = math.exp %60 : vector<16x16xf32>
    %cst_28 = arith.constant dense<0.000000e+00> : vector<16x32xf32>
    %62 = tpu.matmul %61, %12, %cst_28 {dimension_numbers = #tpu.dot_dimension_numbers<[1], [0], [0], [1], [0, 0, 1, 1], [], []>} : vector<16x16xf32>, vector<16x32xf32>, vector<16x32xf32> -> vector<16x32xf32>
    %63 = vector.broadcast %13 : vector<1x32xf32> to vector<16x32xf32>
    %64 = arith.addf %62, %63 : vector<16x32xf32>
    %cst_29 = arith.constant 0.000000e+00 : f32
    %65 = vector.broadcast %cst_29 : f32 to vector<16x32xf32>
    %66 = arith.maximumf %64, %65 : vector<16x32xf32>
    %67 = math.absf %64 : vector<16x32xf32>
    %cst_30 = arith.constant 0.000000e+00 : f32
    %68 = vector.broadcast %cst_30 : f32 to vector<16x32xf32>
    %69 = arith.subf %68, %67 : vector<16x32xf32>
    %70 = math.exp %69 : vector<16x32xf32>
    %71 = math.log1p %70 : vector<16x32xf32>
    %72 = arith.addf %66, %71 : vector<16x32xf32>
    %cst_31 = arith.constant 0.693147182 : f32
    %73 = vector.broadcast %cst_31 : f32 to vector<16x32xf32>
    %74 = arith.subf %72, %73 : vector<16x32xf32>
    %cst_32 = arith.constant dense<0.000000e+00> : vector<16x32xf32>
    %75 = tpu.matmul %74, %14, %cst_32 {dimension_numbers = #tpu.dot_dimension_numbers<[1], [0], [0], [1], [0, 0, 1, 1], [], []>} : vector<16x32xf32>, vector<32x32xf32>, vector<16x32xf32> -> vector<16x32xf32>
    %76 = vector.broadcast %15 : vector<1x32xf32> to vector<16x32xf32>
    %77 = arith.addf %75, %76 : vector<16x32xf32>
    %78 = vector.extract_strided_slice %7 {offsets = [0, 1], sizes = [16, 1], strides = [1, 1]} : vector<16x16xf32> to vector<16x1xf32>
    %79 = vector.broadcast %78 : vector<16x1xf32> to vector<16x32xf32>
    %80 = arith.mulf %77, %79 : vector<16x32xf32>
    %81 = vector.extract_strided_slice %21 {offsets = [1, 0], sizes = [1, 32], strides = [1, 1]} : vector<16x32xf32> to vector<1x32xf32>
    %82 = vector.broadcast %81 : vector<1x32xf32> to vector<16x32xf32>
    %83 = arith.mulf %80, %82 : vector<16x32xf32>
    %84 = arith.addf %53, %83 : vector<16x32xf32>
    %85 = vector.extract_strided_slice %6 {offsets = [0, 2], sizes = [16, 1], strides = [1, 1]} : vector<16x16xf32> to vector<16x1xf32>
    %86 = vector.broadcast %85 : vector<16x1xf32> to vector<16x16xf32>
    %87 = vector.broadcast %11 : vector<1x16xf32> to vector<16x16xf32>
    %88 = arith.subf %86, %87 : vector<16x16xf32>
    %89 = arith.mulf %88, %88 : vector<16x16xf32>
    %cst_33 = arith.constant -4.500000e+00 : f32
    %90 = vector.broadcast %cst_33 : f32 to vector<16x16xf32>
    %91 = arith.mulf %90, %89 : vector<16x16xf32>
    %92 = math.exp %91 : vector<16x16xf32>
    %cst_34 = arith.constant dense<0.000000e+00> : vector<16x32xf32>
    %93 = tpu.matmul %92, %12, %cst_34 {dimension_numbers = #tpu.dot_dimension_numbers<[1], [0], [0], [1], [0, 0, 1, 1], [], []>} : vector<16x16xf32>, vector<16x32xf32>, vector<16x32xf32> -> vector<16x32xf32>
    %94 = vector.broadcast %13 : vector<1x32xf32> to vector<16x32xf32>
    %95 = arith.addf %93, %94 : vector<16x32xf32>
    %cst_35 = arith.constant 0.000000e+00 : f32
    %96 = vector.broadcast %cst_35 : f32 to vector<16x32xf32>
    %97 = arith.maximumf %95, %96 : vector<16x32xf32>
    %98 = math.absf %95 : vector<16x32xf32>
    %cst_36 = arith.constant 0.000000e+00 : f32
    %99 = vector.broadcast %cst_36 : f32 to vector<16x32xf32>
    %100 = arith.subf %99, %98 : vector<16x32xf32>
    %101 = math.exp %100 : vector<16x32xf32>
    %102 = math.log1p %101 : vector<16x32xf32>
    %103 = arith.addf %97, %102 : vector<16x32xf32>
    %cst_37 = arith.constant 0.693147182 : f32
    %104 = vector.broadcast %cst_37 : f32 to vector<16x32xf32>
    %105 = arith.subf %103, %104 : vector<16x32xf32>
    %cst_38 = arith.constant dense<0.000000e+00> : vector<16x32xf32>
    %106 = tpu.matmul %105, %14, %cst_38 {dimension_numbers = #tpu.dot_dimension_numbers<[1], [0], [0], [1], [0, 0, 1, 1], [], []>} : vector<16x32xf32>, vector<32x32xf32>, vector<16x32xf32> -> vector<16x32xf32>
    %107 = vector.broadcast %15 : vector<1x32xf32> to vector<16x32xf32>
    %108 = arith.addf %106, %107 : vector<16x32xf32>
    %109 = vector.extract_strided_slice %7 {offsets = [0, 2], sizes = [16, 1], strides = [1, 1]} : vector<16x16xf32> to vector<16x1xf32>
    %110 = vector.broadcast %109 : vector<16x1xf32> to vector<16x32xf32>
    %111 = arith.mulf %108, %110 : vector<16x32xf32>
    %112 = vector.extract_strided_slice %21 {offsets = [2, 0], sizes = [1, 32], strides = [1, 1]} : vector<16x32xf32> to vector<1x32xf32>
    %113 = vector.broadcast %112 : vector<1x32xf32> to vector<16x32xf32>
    %114 = arith.mulf %111, %113 : vector<16x32xf32>
    %115 = arith.addf %84, %114 : vector<16x32xf32>
    %116 = vector.extract_strided_slice %6 {offsets = [0, 3], sizes = [16, 1], strides = [1, 1]} : vector<16x16xf32> to vector<16x1xf32>
    %117 = vector.broadcast %116 : vector<16x1xf32> to vector<16x16xf32>
    %118 = vector.broadcast %11 : vector<1x16xf32> to vector<16x16xf32>
    %119 = arith.subf %117, %118 : vector<16x16xf32>
    %120 = arith.mulf %119, %119 : vector<16x16xf32>
    %cst_39 = arith.constant -4.500000e+00 : f32
    %121 = vector.broadcast %cst_39 : f32 to vector<16x16xf32>
    %122 = arith.mulf %121, %120 : vector<16x16xf32>
    %123 = math.exp %122 : vector<16x16xf32>
    %cst_40 = arith.constant dense<0.000000e+00> : vector<16x32xf32>
    %124 = tpu.matmul %123, %12, %cst_40 {dimension_numbers = #tpu.dot_dimension_numbers<[1], [0], [0], [1], [0, 0, 1, 1], [], []>} : vector<16x16xf32>, vector<16x32xf32>, vector<16x32xf32> -> vector<16x32xf32>
    %125 = vector.broadcast %13 : vector<1x32xf32> to vector<16x32xf32>
    %126 = arith.addf %124, %125 : vector<16x32xf32>
    %cst_41 = arith.constant 0.000000e+00 : f32
    %127 = vector.broadcast %cst_41 : f32 to vector<16x32xf32>
    %128 = arith.maximumf %126, %127 : vector<16x32xf32>
    %129 = math.absf %126 : vector<16x32xf32>
    %cst_42 = arith.constant 0.000000e+00 : f32
    %130 = vector.broadcast %cst_42 : f32 to vector<16x32xf32>
    %131 = arith.subf %130, %129 : vector<16x32xf32>
    %132 = math.exp %131 : vector<16x32xf32>
    %133 = math.log1p %132 : vector<16x32xf32>
    %134 = arith.addf %128, %133 : vector<16x32xf32>
    %cst_43 = arith.constant 0.693147182 : f32
    %135 = vector.broadcast %cst_43 : f32 to vector<16x32xf32>
    %136 = arith.subf %134, %135 : vector<16x32xf32>
    %cst_44 = arith.constant dense<0.000000e+00> : vector<16x32xf32>
    %137 = tpu.matmul %136, %14, %cst_44 {dimension_numbers = #tpu.dot_dimension_numbers<[1], [0], [0], [1], [0, 0, 1, 1], [], []>} : vector<16x32xf32>, vector<32x32xf32>, vector<16x32xf32> -> vector<16x32xf32>
    %138 = vector.broadcast %15 : vector<1x32xf32> to vector<16x32xf32>
    %139 = arith.addf %137, %138 : vector<16x32xf32>
    %140 = vector.extract_strided_slice %7 {offsets = [0, 3], sizes = [16, 1], strides = [1, 1]} : vector<16x16xf32> to vector<16x1xf32>
    %141 = vector.broadcast %140 : vector<16x1xf32> to vector<16x32xf32>
    %142 = arith.mulf %139, %141 : vector<16x32xf32>
    %143 = vector.extract_strided_slice %21 {offsets = [3, 0], sizes = [1, 32], strides = [1, 1]} : vector<16x32xf32> to vector<1x32xf32>
    %144 = vector.broadcast %143 : vector<1x32xf32> to vector<16x32xf32>
    %145 = arith.mulf %142, %144 : vector<16x32xf32>
    %146 = arith.addf %115, %145 : vector<16x32xf32>
    %147 = vector.extract_strided_slice %6 {offsets = [0, 4], sizes = [16, 1], strides = [1, 1]} : vector<16x16xf32> to vector<16x1xf32>
    %148 = vector.broadcast %147 : vector<16x1xf32> to vector<16x16xf32>
    %149 = vector.broadcast %11 : vector<1x16xf32> to vector<16x16xf32>
    %150 = arith.subf %148, %149 : vector<16x16xf32>
    %151 = arith.mulf %150, %150 : vector<16x16xf32>
    %cst_45 = arith.constant -4.500000e+00 : f32
    %152 = vector.broadcast %cst_45 : f32 to vector<16x16xf32>
    %153 = arith.mulf %152, %151 : vector<16x16xf32>
    %154 = math.exp %153 : vector<16x16xf32>
    %cst_46 = arith.constant dense<0.000000e+00> : vector<16x32xf32>
    %155 = tpu.matmul %154, %12, %cst_46 {dimension_numbers = #tpu.dot_dimension_numbers<[1], [0], [0], [1], [0, 0, 1, 1], [], []>} : vector<16x16xf32>, vector<16x32xf32>, vector<16x32xf32> -> vector<16x32xf32>
    %156 = vector.broadcast %13 : vector<1x32xf32> to vector<16x32xf32>
    %157 = arith.addf %155, %156 : vector<16x32xf32>
    %cst_47 = arith.constant 0.000000e+00 : f32
    %158 = vector.broadcast %cst_47 : f32 to vector<16x32xf32>
    %159 = arith.maximumf %157, %158 : vector<16x32xf32>
    %160 = math.absf %157 : vector<16x32xf32>
    %cst_48 = arith.constant 0.000000e+00 : f32
    %161 = vector.broadcast %cst_48 : f32 to vector<16x32xf32>
    %162 = arith.subf %161, %160 : vector<16x32xf32>
    %163 = math.exp %162 : vector<16x32xf32>
    %164 = math.log1p %163 : vector<16x32xf32>
    %165 = arith.addf %159, %164 : vector<16x32xf32>
    %cst_49 = arith.constant 0.693147182 : f32
    %166 = vector.broadcast %cst_49 : f32 to vector<16x32xf32>
    %167 = arith.subf %165, %166 : vector<16x32xf32>
    %cst_50 = arith.constant dense<0.000000e+00> : vector<16x32xf32>
    %168 = tpu.matmul %167, %14, %cst_50 {dimension_numbers = #tpu.dot_dimension_numbers<[1], [0], [0], [1], [0, 0, 1, 1], [], []>} : vector<16x32xf32>, vector<32x32xf32>, vector<16x32xf32> -> vector<16x32xf32>
    %169 = vector.broadcast %15 : vector<1x32xf32> to vector<16x32xf32>
    %170 = arith.addf %168, %169 : vector<16x32xf32>
    %171 = vector.extract_strided_slice %7 {offsets = [0, 4], sizes = [16, 1], strides = [1, 1]} : vector<16x16xf32> to vector<16x1xf32>
    %172 = vector.broadcast %171 : vector<16x1xf32> to vector<16x32xf32>
    %173 = arith.mulf %170, %172 : vector<16x32xf32>
    %174 = vector.extract_strided_slice %21 {offsets = [4, 0], sizes = [1, 32], strides = [1, 1]} : vector<16x32xf32> to vector<1x32xf32>
    %175 = vector.broadcast %174 : vector<1x32xf32> to vector<16x32xf32>
    %176 = arith.mulf %173, %175 : vector<16x32xf32>
    %177 = arith.addf %146, %176 : vector<16x32xf32>
    %178 = vector.extract_strided_slice %6 {offsets = [0, 5], sizes = [16, 1], strides = [1, 1]} : vector<16x16xf32> to vector<16x1xf32>
    %179 = vector.broadcast %178 : vector<16x1xf32> to vector<16x16xf32>
    %180 = vector.broadcast %11 : vector<1x16xf32> to vector<16x16xf32>
    %181 = arith.subf %179, %180 : vector<16x16xf32>
    %182 = arith.mulf %181, %181 : vector<16x16xf32>
    %cst_51 = arith.constant -4.500000e+00 : f32
    %183 = vector.broadcast %cst_51 : f32 to vector<16x16xf32>
    %184 = arith.mulf %183, %182 : vector<16x16xf32>
    %185 = math.exp %184 : vector<16x16xf32>
    %cst_52 = arith.constant dense<0.000000e+00> : vector<16x32xf32>
    %186 = tpu.matmul %185, %12, %cst_52 {dimension_numbers = #tpu.dot_dimension_numbers<[1], [0], [0], [1], [0, 0, 1, 1], [], []>} : vector<16x16xf32>, vector<16x32xf32>, vector<16x32xf32> -> vector<16x32xf32>
    %187 = vector.broadcast %13 : vector<1x32xf32> to vector<16x32xf32>
    %188 = arith.addf %186, %187 : vector<16x32xf32>
    %cst_53 = arith.constant 0.000000e+00 : f32
    %189 = vector.broadcast %cst_53 : f32 to vector<16x32xf32>
    %190 = arith.maximumf %188, %189 : vector<16x32xf32>
    %191 = math.absf %188 : vector<16x32xf32>
    %cst_54 = arith.constant 0.000000e+00 : f32
    %192 = vector.broadcast %cst_54 : f32 to vector<16x32xf32>
    %193 = arith.subf %192, %191 : vector<16x32xf32>
    %194 = math.exp %193 : vector<16x32xf32>
    %195 = math.log1p %194 : vector<16x32xf32>
    %196 = arith.addf %190, %195 : vector<16x32xf32>
    %cst_55 = arith.constant 0.693147182 : f32
    %197 = vector.broadcast %cst_55 : f32 to vector<16x32xf32>
    %198 = arith.subf %196, %197 : vector<16x32xf32>
    %cst_56 = arith.constant dense<0.000000e+00> : vector<16x32xf32>
    %199 = tpu.matmul %198, %14, %cst_56 {dimension_numbers = #tpu.dot_dimension_numbers<[1], [0], [0], [1], [0, 0, 1, 1], [], []>} : vector<16x32xf32>, vector<32x32xf32>, vector<16x32xf32> -> vector<16x32xf32>
    %200 = vector.broadcast %15 : vector<1x32xf32> to vector<16x32xf32>
    %201 = arith.addf %199, %200 : vector<16x32xf32>
    %202 = vector.extract_strided_slice %7 {offsets = [0, 5], sizes = [16, 1], strides = [1, 1]} : vector<16x16xf32> to vector<16x1xf32>
    %203 = vector.broadcast %202 : vector<16x1xf32> to vector<16x32xf32>
    %204 = arith.mulf %201, %203 : vector<16x32xf32>
    %205 = vector.extract_strided_slice %21 {offsets = [5, 0], sizes = [1, 32], strides = [1, 1]} : vector<16x32xf32> to vector<1x32xf32>
    %206 = vector.broadcast %205 : vector<1x32xf32> to vector<16x32xf32>
    %207 = arith.mulf %204, %206 : vector<16x32xf32>
    %208 = arith.addf %177, %207 : vector<16x32xf32>
    %209 = vector.extract_strided_slice %6 {offsets = [0, 6], sizes = [16, 1], strides = [1, 1]} : vector<16x16xf32> to vector<16x1xf32>
    %210 = vector.broadcast %209 : vector<16x1xf32> to vector<16x16xf32>
    %211 = vector.broadcast %11 : vector<1x16xf32> to vector<16x16xf32>
    %212 = arith.subf %210, %211 : vector<16x16xf32>
    %213 = arith.mulf %212, %212 : vector<16x16xf32>
    %cst_57 = arith.constant -4.500000e+00 : f32
    %214 = vector.broadcast %cst_57 : f32 to vector<16x16xf32>
    %215 = arith.mulf %214, %213 : vector<16x16xf32>
    %216 = math.exp %215 : vector<16x16xf32>
    %cst_58 = arith.constant dense<0.000000e+00> : vector<16x32xf32>
    %217 = tpu.matmul %216, %12, %cst_58 {dimension_numbers = #tpu.dot_dimension_numbers<[1], [0], [0], [1], [0, 0, 1, 1], [], []>} : vector<16x16xf32>, vector<16x32xf32>, vector<16x32xf32> -> vector<16x32xf32>
    %218 = vector.broadcast %13 : vector<1x32xf32> to vector<16x32xf32>
    %219 = arith.addf %217, %218 : vector<16x32xf32>
    %cst_59 = arith.constant 0.000000e+00 : f32
    %220 = vector.broadcast %cst_59 : f32 to vector<16x32xf32>
    %221 = arith.maximumf %219, %220 : vector<16x32xf32>
    %222 = math.absf %219 : vector<16x32xf32>
    %cst_60 = arith.constant 0.000000e+00 : f32
    %223 = vector.broadcast %cst_60 : f32 to vector<16x32xf32>
    %224 = arith.subf %223, %222 : vector<16x32xf32>
    %225 = math.exp %224 : vector<16x32xf32>
    %226 = math.log1p %225 : vector<16x32xf32>
    %227 = arith.addf %221, %226 : vector<16x32xf32>
    %cst_61 = arith.constant 0.693147182 : f32
    %228 = vector.broadcast %cst_61 : f32 to vector<16x32xf32>
    %229 = arith.subf %227, %228 : vector<16x32xf32>
    %cst_62 = arith.constant dense<0.000000e+00> : vector<16x32xf32>
    %230 = tpu.matmul %229, %14, %cst_62 {dimension_numbers = #tpu.dot_dimension_numbers<[1], [0], [0], [1], [0, 0, 1, 1], [], []>} : vector<16x32xf32>, vector<32x32xf32>, vector<16x32xf32> -> vector<16x32xf32>
    %231 = vector.broadcast %15 : vector<1x32xf32> to vector<16x32xf32>
    %232 = arith.addf %230, %231 : vector<16x32xf32>
    %233 = vector.extract_strided_slice %7 {offsets = [0, 6], sizes = [16, 1], strides = [1, 1]} : vector<16x16xf32> to vector<16x1xf32>
    %234 = vector.broadcast %233 : vector<16x1xf32> to vector<16x32xf32>
    %235 = arith.mulf %232, %234 : vector<16x32xf32>
    %236 = vector.extract_strided_slice %21 {offsets = [6, 0], sizes = [1, 32], strides = [1, 1]} : vector<16x32xf32> to vector<1x32xf32>
    %237 = vector.broadcast %236 : vector<1x32xf32> to vector<16x32xf32>
    %238 = arith.mulf %235, %237 : vector<16x32xf32>
    %239 = arith.addf %208, %238 : vector<16x32xf32>
    %240 = vector.extract_strided_slice %6 {offsets = [0, 7], sizes = [16, 1], strides = [1, 1]} : vector<16x16xf32> to vector<16x1xf32>
    %241 = vector.broadcast %240 : vector<16x1xf32> to vector<16x16xf32>
    %242 = vector.broadcast %11 : vector<1x16xf32> to vector<16x16xf32>
    %243 = arith.subf %241, %242 : vector<16x16xf32>
    %244 = arith.mulf %243, %243 : vector<16x16xf32>
    %cst_63 = arith.constant -4.500000e+00 : f32
    %245 = vector.broadcast %cst_63 : f32 to vector<16x16xf32>
    %246 = arith.mulf %245, %244 : vector<16x16xf32>
    %247 = math.exp %246 : vector<16x16xf32>
    %cst_64 = arith.constant dense<0.000000e+00> : vector<16x32xf32>
    %248 = tpu.matmul %247, %12, %cst_64 {dimension_numbers = #tpu.dot_dimension_numbers<[1], [0], [0], [1], [0, 0, 1, 1], [], []>} : vector<16x16xf32>, vector<16x32xf32>, vector<16x32xf32> -> vector<16x32xf32>
    %249 = vector.broadcast %13 : vector<1x32xf32> to vector<16x32xf32>
    %250 = arith.addf %248, %249 : vector<16x32xf32>
    %cst_65 = arith.constant 0.000000e+00 : f32
    %251 = vector.broadcast %cst_65 : f32 to vector<16x32xf32>
    %252 = arith.maximumf %250, %251 : vector<16x32xf32>
    %253 = math.absf %250 : vector<16x32xf32>
    %cst_66 = arith.constant 0.000000e+00 : f32
    %254 = vector.broadcast %cst_66 : f32 to vector<16x32xf32>
    %255 = arith.subf %254, %253 : vector<16x32xf32>
    %256 = math.exp %255 : vector<16x32xf32>
    %257 = math.log1p %256 : vector<16x32xf32>
    %258 = arith.addf %252, %257 : vector<16x32xf32>
    %cst_67 = arith.constant 0.693147182 : f32
    %259 = vector.broadcast %cst_67 : f32 to vector<16x32xf32>
    %260 = arith.subf %258, %259 : vector<16x32xf32>
    %cst_68 = arith.constant dense<0.000000e+00> : vector<16x32xf32>
    %261 = tpu.matmul %260, %14, %cst_68 {dimension_numbers = #tpu.dot_dimension_numbers<[1], [0], [0], [1], [0, 0, 1, 1], [], []>} : vector<16x32xf32>, vector<32x32xf32>, vector<16x32xf32> -> vector<16x32xf32>
    %262 = vector.broadcast %15 : vector<1x32xf32> to vector<16x32xf32>
    %263 = arith.addf %261, %262 : vector<16x32xf32>
    %264 = vector.extract_strided_slice %7 {offsets = [0, 7], sizes = [16, 1], strides = [1, 1]} : vector<16x16xf32> to vector<16x1xf32>
    %265 = vector.broadcast %264 : vector<16x1xf32> to vector<16x32xf32>
    %266 = arith.mulf %263, %265 : vector<16x32xf32>
    %267 = vector.extract_strided_slice %21 {offsets = [7, 0], sizes = [1, 32], strides = [1, 1]} : vector<16x32xf32> to vector<1x32xf32>
    %268 = vector.broadcast %267 : vector<1x32xf32> to vector<16x32xf32>
    %269 = arith.mulf %266, %268 : vector<16x32xf32>
    %270 = arith.addf %239, %269 : vector<16x32xf32>
    %271 = vector.extract_strided_slice %6 {offsets = [0, 8], sizes = [16, 1], strides = [1, 1]} : vector<16x16xf32> to vector<16x1xf32>
    %272 = vector.broadcast %271 : vector<16x1xf32> to vector<16x16xf32>
    %273 = vector.broadcast %11 : vector<1x16xf32> to vector<16x16xf32>
    %274 = arith.subf %272, %273 : vector<16x16xf32>
    %275 = arith.mulf %274, %274 : vector<16x16xf32>
    %cst_69 = arith.constant -4.500000e+00 : f32
    %276 = vector.broadcast %cst_69 : f32 to vector<16x16xf32>
    %277 = arith.mulf %276, %275 : vector<16x16xf32>
    %278 = math.exp %277 : vector<16x16xf32>
    %cst_70 = arith.constant dense<0.000000e+00> : vector<16x32xf32>
    %279 = tpu.matmul %278, %12, %cst_70 {dimension_numbers = #tpu.dot_dimension_numbers<[1], [0], [0], [1], [0, 0, 1, 1], [], []>} : vector<16x16xf32>, vector<16x32xf32>, vector<16x32xf32> -> vector<16x32xf32>
    %280 = vector.broadcast %13 : vector<1x32xf32> to vector<16x32xf32>
    %281 = arith.addf %279, %280 : vector<16x32xf32>
    %cst_71 = arith.constant 0.000000e+00 : f32
    %282 = vector.broadcast %cst_71 : f32 to vector<16x32xf32>
    %283 = arith.maximumf %281, %282 : vector<16x32xf32>
    %284 = math.absf %281 : vector<16x32xf32>
    %cst_72 = arith.constant 0.000000e+00 : f32
    %285 = vector.broadcast %cst_72 : f32 to vector<16x32xf32>
    %286 = arith.subf %285, %284 : vector<16x32xf32>
    %287 = math.exp %286 : vector<16x32xf32>
    %288 = math.log1p %287 : vector<16x32xf32>
    %289 = arith.addf %283, %288 : vector<16x32xf32>
    %cst_73 = arith.constant 0.693147182 : f32
    %290 = vector.broadcast %cst_73 : f32 to vector<16x32xf32>
    %291 = arith.subf %289, %290 : vector<16x32xf32>
    %cst_74 = arith.constant dense<0.000000e+00> : vector<16x32xf32>
    %292 = tpu.matmul %291, %14, %cst_74 {dimension_numbers = #tpu.dot_dimension_numbers<[1], [0], [0], [1], [0, 0, 1, 1], [], []>} : vector<16x32xf32>, vector<32x32xf32>, vector<16x32xf32> -> vector<16x32xf32>
    %293 = vector.broadcast %15 : vector<1x32xf32> to vector<16x32xf32>
    %294 = arith.addf %292, %293 : vector<16x32xf32>
    %295 = vector.extract_strided_slice %7 {offsets = [0, 8], sizes = [16, 1], strides = [1, 1]} : vector<16x16xf32> to vector<16x1xf32>
    %296 = vector.broadcast %295 : vector<16x1xf32> to vector<16x32xf32>
    %297 = arith.mulf %294, %296 : vector<16x32xf32>
    %298 = vector.extract_strided_slice %21 {offsets = [8, 0], sizes = [1, 32], strides = [1, 1]} : vector<16x32xf32> to vector<1x32xf32>
    %299 = vector.broadcast %298 : vector<1x32xf32> to vector<16x32xf32>
    %300 = arith.mulf %297, %299 : vector<16x32xf32>
    %301 = arith.addf %270, %300 : vector<16x32xf32>
    %302 = vector.extract_strided_slice %6 {offsets = [0, 9], sizes = [16, 1], strides = [1, 1]} : vector<16x16xf32> to vector<16x1xf32>
    %303 = vector.broadcast %302 : vector<16x1xf32> to vector<16x16xf32>
    %304 = vector.broadcast %11 : vector<1x16xf32> to vector<16x16xf32>
    %305 = arith.subf %303, %304 : vector<16x16xf32>
    %306 = arith.mulf %305, %305 : vector<16x16xf32>
    %cst_75 = arith.constant -4.500000e+00 : f32
    %307 = vector.broadcast %cst_75 : f32 to vector<16x16xf32>
    %308 = arith.mulf %307, %306 : vector<16x16xf32>
    %309 = math.exp %308 : vector<16x16xf32>
    %cst_76 = arith.constant dense<0.000000e+00> : vector<16x32xf32>
    %310 = tpu.matmul %309, %12, %cst_76 {dimension_numbers = #tpu.dot_dimension_numbers<[1], [0], [0], [1], [0, 0, 1, 1], [], []>} : vector<16x16xf32>, vector<16x32xf32>, vector<16x32xf32> -> vector<16x32xf32>
    %311 = vector.broadcast %13 : vector<1x32xf32> to vector<16x32xf32>
    %312 = arith.addf %310, %311 : vector<16x32xf32>
    %cst_77 = arith.constant 0.000000e+00 : f32
    %313 = vector.broadcast %cst_77 : f32 to vector<16x32xf32>
    %314 = arith.maximumf %312, %313 : vector<16x32xf32>
    %315 = math.absf %312 : vector<16x32xf32>
    %cst_78 = arith.constant 0.000000e+00 : f32
    %316 = vector.broadcast %cst_78 : f32 to vector<16x32xf32>
    %317 = arith.subf %316, %315 : vector<16x32xf32>
    %318 = math.exp %317 : vector<16x32xf32>
    %319 = math.log1p %318 : vector<16x32xf32>
    %320 = arith.addf %314, %319 : vector<16x32xf32>
    %cst_79 = arith.constant 0.693147182 : f32
    %321 = vector.broadcast %cst_79 : f32 to vector<16x32xf32>
    %322 = arith.subf %320, %321 : vector<16x32xf32>
    %cst_80 = arith.constant dense<0.000000e+00> : vector<16x32xf32>
    %323 = tpu.matmul %322, %14, %cst_80 {dimension_numbers = #tpu.dot_dimension_numbers<[1], [0], [0], [1], [0, 0, 1, 1], [], []>} : vector<16x32xf32>, vector<32x32xf32>, vector<16x32xf32> -> vector<16x32xf32>
    %324 = vector.broadcast %15 : vector<1x32xf32> to vector<16x32xf32>
    %325 = arith.addf %323, %324 : vector<16x32xf32>
    %326 = vector.extract_strided_slice %7 {offsets = [0, 9], sizes = [16, 1], strides = [1, 1]} : vector<16x16xf32> to vector<16x1xf32>
    %327 = vector.broadcast %326 : vector<16x1xf32> to vector<16x32xf32>
    %328 = arith.mulf %325, %327 : vector<16x32xf32>
    %329 = vector.extract_strided_slice %21 {offsets = [9, 0], sizes = [1, 32], strides = [1, 1]} : vector<16x32xf32> to vector<1x32xf32>
    %330 = vector.broadcast %329 : vector<1x32xf32> to vector<16x32xf32>
    %331 = arith.mulf %328, %330 : vector<16x32xf32>
    %332 = arith.addf %301, %331 : vector<16x32xf32>
    %333 = vector.extract_strided_slice %6 {offsets = [0, 10], sizes = [16, 1], strides = [1, 1]} : vector<16x16xf32> to vector<16x1xf32>
    %334 = vector.broadcast %333 : vector<16x1xf32> to vector<16x16xf32>
    %335 = vector.broadcast %11 : vector<1x16xf32> to vector<16x16xf32>
    %336 = arith.subf %334, %335 : vector<16x16xf32>
    %337 = arith.mulf %336, %336 : vector<16x16xf32>
    %cst_81 = arith.constant -4.500000e+00 : f32
    %338 = vector.broadcast %cst_81 : f32 to vector<16x16xf32>
    %339 = arith.mulf %338, %337 : vector<16x16xf32>
    %340 = math.exp %339 : vector<16x16xf32>
    %cst_82 = arith.constant dense<0.000000e+00> : vector<16x32xf32>
    %341 = tpu.matmul %340, %12, %cst_82 {dimension_numbers = #tpu.dot_dimension_numbers<[1], [0], [0], [1], [0, 0, 1, 1], [], []>} : vector<16x16xf32>, vector<16x32xf32>, vector<16x32xf32> -> vector<16x32xf32>
    %342 = vector.broadcast %13 : vector<1x32xf32> to vector<16x32xf32>
    %343 = arith.addf %341, %342 : vector<16x32xf32>
    %cst_83 = arith.constant 0.000000e+00 : f32
    %344 = vector.broadcast %cst_83 : f32 to vector<16x32xf32>
    %345 = arith.maximumf %343, %344 : vector<16x32xf32>
    %346 = math.absf %343 : vector<16x32xf32>
    %cst_84 = arith.constant 0.000000e+00 : f32
    %347 = vector.broadcast %cst_84 : f32 to vector<16x32xf32>
    %348 = arith.subf %347, %346 : vector<16x32xf32>
    %349 = math.exp %348 : vector<16x32xf32>
    %350 = math.log1p %349 : vector<16x32xf32>
    %351 = arith.addf %345, %350 : vector<16x32xf32>
    %cst_85 = arith.constant 0.693147182 : f32
    %352 = vector.broadcast %cst_85 : f32 to vector<16x32xf32>
    %353 = arith.subf %351, %352 : vector<16x32xf32>
    %cst_86 = arith.constant dense<0.000000e+00> : vector<16x32xf32>
    %354 = tpu.matmul %353, %14, %cst_86 {dimension_numbers = #tpu.dot_dimension_numbers<[1], [0], [0], [1], [0, 0, 1, 1], [], []>} : vector<16x32xf32>, vector<32x32xf32>, vector<16x32xf32> -> vector<16x32xf32>
    %355 = vector.broadcast %15 : vector<1x32xf32> to vector<16x32xf32>
    %356 = arith.addf %354, %355 : vector<16x32xf32>
    %357 = vector.extract_strided_slice %7 {offsets = [0, 10], sizes = [16, 1], strides = [1, 1]} : vector<16x16xf32> to vector<16x1xf32>
    %358 = vector.broadcast %357 : vector<16x1xf32> to vector<16x32xf32>
    %359 = arith.mulf %356, %358 : vector<16x32xf32>
    %360 = vector.extract_strided_slice %21 {offsets = [10, 0], sizes = [1, 32], strides = [1, 1]} : vector<16x32xf32> to vector<1x32xf32>
    %361 = vector.broadcast %360 : vector<1x32xf32> to vector<16x32xf32>
    %362 = arith.mulf %359, %361 : vector<16x32xf32>
    %363 = arith.addf %332, %362 : vector<16x32xf32>
    %364 = vector.extract_strided_slice %6 {offsets = [0, 11], sizes = [16, 1], strides = [1, 1]} : vector<16x16xf32> to vector<16x1xf32>
    %365 = vector.broadcast %364 : vector<16x1xf32> to vector<16x16xf32>
    %366 = vector.broadcast %11 : vector<1x16xf32> to vector<16x16xf32>
    %367 = arith.subf %365, %366 : vector<16x16xf32>
    %368 = arith.mulf %367, %367 : vector<16x16xf32>
    %cst_87 = arith.constant -4.500000e+00 : f32
    %369 = vector.broadcast %cst_87 : f32 to vector<16x16xf32>
    %370 = arith.mulf %369, %368 : vector<16x16xf32>
    %371 = math.exp %370 : vector<16x16xf32>
    %cst_88 = arith.constant dense<0.000000e+00> : vector<16x32xf32>
    %372 = tpu.matmul %371, %12, %cst_88 {dimension_numbers = #tpu.dot_dimension_numbers<[1], [0], [0], [1], [0, 0, 1, 1], [], []>} : vector<16x16xf32>, vector<16x32xf32>, vector<16x32xf32> -> vector<16x32xf32>
    %373 = vector.broadcast %13 : vector<1x32xf32> to vector<16x32xf32>
    %374 = arith.addf %372, %373 : vector<16x32xf32>
    %cst_89 = arith.constant 0.000000e+00 : f32
    %375 = vector.broadcast %cst_89 : f32 to vector<16x32xf32>
    %376 = arith.maximumf %374, %375 : vector<16x32xf32>
    %377 = math.absf %374 : vector<16x32xf32>
    %cst_90 = arith.constant 0.000000e+00 : f32
    %378 = vector.broadcast %cst_90 : f32 to vector<16x32xf32>
    %379 = arith.subf %378, %377 : vector<16x32xf32>
    %380 = math.exp %379 : vector<16x32xf32>
    %381 = math.log1p %380 : vector<16x32xf32>
    %382 = arith.addf %376, %381 : vector<16x32xf32>
    %cst_91 = arith.constant 0.693147182 : f32
    %383 = vector.broadcast %cst_91 : f32 to vector<16x32xf32>
    %384 = arith.subf %382, %383 : vector<16x32xf32>
    %cst_92 = arith.constant dense<0.000000e+00> : vector<16x32xf32>
    %385 = tpu.matmul %384, %14, %cst_92 {dimension_numbers = #tpu.dot_dimension_numbers<[1], [0], [0], [1], [0, 0, 1, 1], [], []>} : vector<16x32xf32>, vector<32x32xf32>, vector<16x32xf32> -> vector<16x32xf32>
    %386 = vector.broadcast %15 : vector<1x32xf32> to vector<16x32xf32>
    %387 = arith.addf %385, %386 : vector<16x32xf32>
    %388 = vector.extract_strided_slice %7 {offsets = [0, 11], sizes = [16, 1], strides = [1, 1]} : vector<16x16xf32> to vector<16x1xf32>
    %389 = vector.broadcast %388 : vector<16x1xf32> to vector<16x32xf32>
    %390 = arith.mulf %387, %389 : vector<16x32xf32>
    %391 = vector.extract_strided_slice %21 {offsets = [11, 0], sizes = [1, 32], strides = [1, 1]} : vector<16x32xf32> to vector<1x32xf32>
    %392 = vector.broadcast %391 : vector<1x32xf32> to vector<16x32xf32>
    %393 = arith.mulf %390, %392 : vector<16x32xf32>
    %394 = arith.addf %363, %393 : vector<16x32xf32>
    %395 = vector.extract_strided_slice %6 {offsets = [0, 12], sizes = [16, 1], strides = [1, 1]} : vector<16x16xf32> to vector<16x1xf32>
    %396 = vector.broadcast %395 : vector<16x1xf32> to vector<16x16xf32>
    %397 = vector.broadcast %11 : vector<1x16xf32> to vector<16x16xf32>
    %398 = arith.subf %396, %397 : vector<16x16xf32>
    %399 = arith.mulf %398, %398 : vector<16x16xf32>
    %cst_93 = arith.constant -4.500000e+00 : f32
    %400 = vector.broadcast %cst_93 : f32 to vector<16x16xf32>
    %401 = arith.mulf %400, %399 : vector<16x16xf32>
    %402 = math.exp %401 : vector<16x16xf32>
    %cst_94 = arith.constant dense<0.000000e+00> : vector<16x32xf32>
    %403 = tpu.matmul %402, %12, %cst_94 {dimension_numbers = #tpu.dot_dimension_numbers<[1], [0], [0], [1], [0, 0, 1, 1], [], []>} : vector<16x16xf32>, vector<16x32xf32>, vector<16x32xf32> -> vector<16x32xf32>
    %404 = vector.broadcast %13 : vector<1x32xf32> to vector<16x32xf32>
    %405 = arith.addf %403, %404 : vector<16x32xf32>
    %cst_95 = arith.constant 0.000000e+00 : f32
    %406 = vector.broadcast %cst_95 : f32 to vector<16x32xf32>
    %407 = arith.maximumf %405, %406 : vector<16x32xf32>
    %408 = math.absf %405 : vector<16x32xf32>
    %cst_96 = arith.constant 0.000000e+00 : f32
    %409 = vector.broadcast %cst_96 : f32 to vector<16x32xf32>
    %410 = arith.subf %409, %408 : vector<16x32xf32>
    %411 = math.exp %410 : vector<16x32xf32>
    %412 = math.log1p %411 : vector<16x32xf32>
    %413 = arith.addf %407, %412 : vector<16x32xf32>
    %cst_97 = arith.constant 0.693147182 : f32
    %414 = vector.broadcast %cst_97 : f32 to vector<16x32xf32>
    %415 = arith.subf %413, %414 : vector<16x32xf32>
    %cst_98 = arith.constant dense<0.000000e+00> : vector<16x32xf32>
    %416 = tpu.matmul %415, %14, %cst_98 {dimension_numbers = #tpu.dot_dimension_numbers<[1], [0], [0], [1], [0, 0, 1, 1], [], []>} : vector<16x32xf32>, vector<32x32xf32>, vector<16x32xf32> -> vector<16x32xf32>
    %417 = vector.broadcast %15 : vector<1x32xf32> to vector<16x32xf32>
    %418 = arith.addf %416, %417 : vector<16x32xf32>
    %419 = vector.extract_strided_slice %7 {offsets = [0, 12], sizes = [16, 1], strides = [1, 1]} : vector<16x16xf32> to vector<16x1xf32>
    %420 = vector.broadcast %419 : vector<16x1xf32> to vector<16x32xf32>
    %421 = arith.mulf %418, %420 : vector<16x32xf32>
    %422 = vector.extract_strided_slice %21 {offsets = [12, 0], sizes = [1, 32], strides = [1, 1]} : vector<16x32xf32> to vector<1x32xf32>
    %423 = vector.broadcast %422 : vector<1x32xf32> to vector<16x32xf32>
    %424 = arith.mulf %421, %423 : vector<16x32xf32>
    %425 = arith.addf %394, %424 : vector<16x32xf32>
    %426 = vector.extract_strided_slice %6 {offsets = [0, 13], sizes = [16, 1], strides = [1, 1]} : vector<16x16xf32> to vector<16x1xf32>
    %427 = vector.broadcast %426 : vector<16x1xf32> to vector<16x16xf32>
    %428 = vector.broadcast %11 : vector<1x16xf32> to vector<16x16xf32>
    %429 = arith.subf %427, %428 : vector<16x16xf32>
    %430 = arith.mulf %429, %429 : vector<16x16xf32>
    %cst_99 = arith.constant -4.500000e+00 : f32
    %431 = vector.broadcast %cst_99 : f32 to vector<16x16xf32>
    %432 = arith.mulf %431, %430 : vector<16x16xf32>
    %433 = math.exp %432 : vector<16x16xf32>
    %cst_100 = arith.constant dense<0.000000e+00> : vector<16x32xf32>
    %434 = tpu.matmul %433, %12, %cst_100 {dimension_numbers = #tpu.dot_dimension_numbers<[1], [0], [0], [1], [0, 0, 1, 1], [], []>} : vector<16x16xf32>, vector<16x32xf32>, vector<16x32xf32> -> vector<16x32xf32>
    %435 = vector.broadcast %13 : vector<1x32xf32> to vector<16x32xf32>
    %436 = arith.addf %434, %435 : vector<16x32xf32>
    %cst_101 = arith.constant 0.000000e+00 : f32
    %437 = vector.broadcast %cst_101 : f32 to vector<16x32xf32>
    %438 = arith.maximumf %436, %437 : vector<16x32xf32>
    %439 = math.absf %436 : vector<16x32xf32>
    %cst_102 = arith.constant 0.000000e+00 : f32
    %440 = vector.broadcast %cst_102 : f32 to vector<16x32xf32>
    %441 = arith.subf %440, %439 : vector<16x32xf32>
    %442 = math.exp %441 : vector<16x32xf32>
    %443 = math.log1p %442 : vector<16x32xf32>
    %444 = arith.addf %438, %443 : vector<16x32xf32>
    %cst_103 = arith.constant 0.693147182 : f32
    %445 = vector.broadcast %cst_103 : f32 to vector<16x32xf32>
    %446 = arith.subf %444, %445 : vector<16x32xf32>
    %cst_104 = arith.constant dense<0.000000e+00> : vector<16x32xf32>
    %447 = tpu.matmul %446, %14, %cst_104 {dimension_numbers = #tpu.dot_dimension_numbers<[1], [0], [0], [1], [0, 0, 1, 1], [], []>} : vector<16x32xf32>, vector<32x32xf32>, vector<16x32xf32> -> vector<16x32xf32>
    %448 = vector.broadcast %15 : vector<1x32xf32> to vector<16x32xf32>
    %449 = arith.addf %447, %448 : vector<16x32xf32>
    %450 = vector.extract_strided_slice %7 {offsets = [0, 13], sizes = [16, 1], strides = [1, 1]} : vector<16x16xf32> to vector<16x1xf32>
    %451 = vector.broadcast %450 : vector<16x1xf32> to vector<16x32xf32>
    %452 = arith.mulf %449, %451 : vector<16x32xf32>
    %453 = vector.extract_strided_slice %21 {offsets = [13, 0], sizes = [1, 32], strides = [1, 1]} : vector<16x32xf32> to vector<1x32xf32>
    %454 = vector.broadcast %453 : vector<1x32xf32> to vector<16x32xf32>
    %455 = arith.mulf %452, %454 : vector<16x32xf32>
    %456 = arith.addf %425, %455 : vector<16x32xf32>
    %457 = vector.extract_strided_slice %6 {offsets = [0, 14], sizes = [16, 1], strides = [1, 1]} : vector<16x16xf32> to vector<16x1xf32>
    %458 = vector.broadcast %457 : vector<16x1xf32> to vector<16x16xf32>
    %459 = vector.broadcast %11 : vector<1x16xf32> to vector<16x16xf32>
    %460 = arith.subf %458, %459 : vector<16x16xf32>
    %461 = arith.mulf %460, %460 : vector<16x16xf32>
    %cst_105 = arith.constant -4.500000e+00 : f32
    %462 = vector.broadcast %cst_105 : f32 to vector<16x16xf32>
    %463 = arith.mulf %462, %461 : vector<16x16xf32>
    %464 = math.exp %463 : vector<16x16xf32>
    %cst_106 = arith.constant dense<0.000000e+00> : vector<16x32xf32>
    %465 = tpu.matmul %464, %12, %cst_106 {dimension_numbers = #tpu.dot_dimension_numbers<[1], [0], [0], [1], [0, 0, 1, 1], [], []>} : vector<16x16xf32>, vector<16x32xf32>, vector<16x32xf32> -> vector<16x32xf32>
    %466 = vector.broadcast %13 : vector<1x32xf32> to vector<16x32xf32>
    %467 = arith.addf %465, %466 : vector<16x32xf32>
    %cst_107 = arith.constant 0.000000e+00 : f32
    %468 = vector.broadcast %cst_107 : f32 to vector<16x32xf32>
    %469 = arith.maximumf %467, %468 : vector<16x32xf32>
    %470 = math.absf %467 : vector<16x32xf32>
    %cst_108 = arith.constant 0.000000e+00 : f32
    %471 = vector.broadcast %cst_108 : f32 to vector<16x32xf32>
    %472 = arith.subf %471, %470 : vector<16x32xf32>
    %473 = math.exp %472 : vector<16x32xf32>
    %474 = math.log1p %473 : vector<16x32xf32>
    %475 = arith.addf %469, %474 : vector<16x32xf32>
    %cst_109 = arith.constant 0.693147182 : f32
    %476 = vector.broadcast %cst_109 : f32 to vector<16x32xf32>
    %477 = arith.subf %475, %476 : vector<16x32xf32>
    %cst_110 = arith.constant dense<0.000000e+00> : vector<16x32xf32>
    %478 = tpu.matmul %477, %14, %cst_110 {dimension_numbers = #tpu.dot_dimension_numbers<[1], [0], [0], [1], [0, 0, 1, 1], [], []>} : vector<16x32xf32>, vector<32x32xf32>, vector<16x32xf32> -> vector<16x32xf32>
    %479 = vector.broadcast %15 : vector<1x32xf32> to vector<16x32xf32>
    %480 = arith.addf %478, %479 : vector<16x32xf32>
    %481 = vector.extract_strided_slice %7 {offsets = [0, 14], sizes = [16, 1], strides = [1, 1]} : vector<16x16xf32> to vector<16x1xf32>
    %482 = vector.broadcast %481 : vector<16x1xf32> to vector<16x32xf32>
    %483 = arith.mulf %480, %482 : vector<16x32xf32>
    %484 = vector.extract_strided_slice %21 {offsets = [14, 0], sizes = [1, 32], strides = [1, 1]} : vector<16x32xf32> to vector<1x32xf32>
    %485 = vector.broadcast %484 : vector<1x32xf32> to vector<16x32xf32>
    %486 = arith.mulf %483, %485 : vector<16x32xf32>
    %487 = arith.addf %456, %486 : vector<16x32xf32>
    %488 = vector.extract_strided_slice %6 {offsets = [0, 15], sizes = [16, 1], strides = [1, 1]} : vector<16x16xf32> to vector<16x1xf32>
    %489 = vector.broadcast %488 : vector<16x1xf32> to vector<16x16xf32>
    %490 = vector.broadcast %11 : vector<1x16xf32> to vector<16x16xf32>
    %491 = arith.subf %489, %490 : vector<16x16xf32>
    %492 = arith.mulf %491, %491 : vector<16x16xf32>
    %cst_111 = arith.constant -4.500000e+00 : f32
    %493 = vector.broadcast %cst_111 : f32 to vector<16x16xf32>
    %494 = arith.mulf %493, %492 : vector<16x16xf32>
    %495 = math.exp %494 : vector<16x16xf32>
    %cst_112 = arith.constant dense<0.000000e+00> : vector<16x32xf32>
    %496 = tpu.matmul %495, %12, %cst_112 {dimension_numbers = #tpu.dot_dimension_numbers<[1], [0], [0], [1], [0, 0, 1, 1], [], []>} : vector<16x16xf32>, vector<16x32xf32>, vector<16x32xf32> -> vector<16x32xf32>
    %497 = vector.broadcast %13 : vector<1x32xf32> to vector<16x32xf32>
    %498 = arith.addf %496, %497 : vector<16x32xf32>
    %cst_113 = arith.constant 0.000000e+00 : f32
    %499 = vector.broadcast %cst_113 : f32 to vector<16x32xf32>
    %500 = arith.maximumf %498, %499 : vector<16x32xf32>
    %501 = math.absf %498 : vector<16x32xf32>
    %cst_114 = arith.constant 0.000000e+00 : f32
    %502 = vector.broadcast %cst_114 : f32 to vector<16x32xf32>
    %503 = arith.subf %502, %501 : vector<16x32xf32>
    %504 = math.exp %503 : vector<16x32xf32>
    %505 = math.log1p %504 : vector<16x32xf32>
    %506 = arith.addf %500, %505 : vector<16x32xf32>
    %cst_115 = arith.constant 0.693147182 : f32
    %507 = vector.broadcast %cst_115 : f32 to vector<16x32xf32>
    %508 = arith.subf %506, %507 : vector<16x32xf32>
    %cst_116 = arith.constant dense<0.000000e+00> : vector<16x32xf32>
    %509 = tpu.matmul %508, %14, %cst_116 {dimension_numbers = #tpu.dot_dimension_numbers<[1], [0], [0], [1], [0, 0, 1, 1], [], []>} : vector<16x32xf32>, vector<32x32xf32>, vector<16x32xf32> -> vector<16x32xf32>
    %510 = vector.broadcast %15 : vector<1x32xf32> to vector<16x32xf32>
    %511 = arith.addf %509, %510 : vector<16x32xf32>
    %512 = vector.extract_strided_slice %7 {offsets = [0, 15], sizes = [16, 1], strides = [1, 1]} : vector<16x16xf32> to vector<16x1xf32>
    %513 = vector.broadcast %512 : vector<16x1xf32> to vector<16x32xf32>
    %514 = arith.mulf %511, %513 : vector<16x32xf32>
    %515 = vector.extract_strided_slice %21 {offsets = [15, 0], sizes = [1, 32], strides = [1, 1]} : vector<16x32xf32> to vector<1x32xf32>
    %516 = vector.broadcast %515 : vector<1x32xf32> to vector<16x32xf32>
    %517 = arith.mulf %514, %516 : vector<16x32xf32>
    %518 = arith.addf %487, %517 : vector<16x32xf32>
    %cst_117 = arith.constant dense<0.000000e+00> : vector<16x32xf32>
    %519 = tpu.matmul %518, %17, %cst_117 {dimension_numbers = #tpu.dot_dimension_numbers<[1], [0], [0], [1], [0, 0, 1, 1], [], []>} : vector<16x32xf32>, vector<32x32xf32>, vector<16x32xf32> -> vector<16x32xf32>
    %520 = vector.broadcast %18 : vector<1x32xf32> to vector<16x32xf32>
    %521 = arith.addf %519, %520 : vector<16x32xf32>
    %cst_118 = arith.constant 0.000000e+00 : f32
    %522 = vector.broadcast %cst_118 : f32 to vector<16x32xf32>
    %523 = arith.maximumf %521, %522 : vector<16x32xf32>
    %524 = math.absf %521 : vector<16x32xf32>
    %cst_119 = arith.constant 0.000000e+00 : f32
    %525 = vector.broadcast %cst_119 : f32 to vector<16x32xf32>
    %526 = arith.subf %525, %524 : vector<16x32xf32>
    %527 = math.exp %526 : vector<16x32xf32>
    %528 = math.log1p %527 : vector<16x32xf32>
    %529 = arith.addf %523, %528 : vector<16x32xf32>
    %cst_120 = arith.constant 0.693147182 : f32
    %530 = vector.broadcast %cst_120 : f32 to vector<16x32xf32>
    %531 = arith.subf %529, %530 : vector<16x32xf32>
    %cst_121 = arith.constant dense<0.000000e+00> : vector<16x32xf32>
    %532 = tpu.matmul %531, %19, %cst_121 {dimension_numbers = #tpu.dot_dimension_numbers<[1], [0], [0], [1], [0, 0, 1, 1], [], []>} : vector<16x32xf32>, vector<32x32xf32>, vector<16x32xf32> -> vector<16x32xf32>
    %533 = vector.broadcast %20 : vector<1x32xf32> to vector<16x32xf32>
    %534 = arith.addf %532, %533 : vector<16x32xf32>
    %535 = arith.addf %5, %534 : vector<16x32xf32>
    %c152 = arith.constant 152 : index
    %c0_122 = arith.constant 0 : index
    %536 = vector.load %arg3[%c152, %c0_122] : memref<360x32xf32, #tpu.memory_space<vmem>>, vector<16x32xf32>
    %c5 = arith.constant 5 : index
    %c0_123 = arith.constant 0 : index
    %537 = vector.load %arg4[%c5, %c0_123] : memref<16x32xf32, #tpu.memory_space<vmem>>, vector<1x32xf32>
    %c168 = arith.constant 168 : index
    %c0_124 = arith.constant 0 : index
    %538 = vector.load %arg3[%c168, %c0_124] : memref<360x32xf32, #tpu.memory_space<vmem>>, vector<32x32xf32>
    %c6 = arith.constant 6 : index
    %c0_125 = arith.constant 0 : index
    %539 = vector.load %arg4[%c6, %c0_125] : memref<16x32xf32, #tpu.memory_space<vmem>>, vector<1x32xf32>
    %c200 = arith.constant 200 : index
    %c0_126 = arith.constant 0 : index
    %540 = vector.load %arg3[%c200, %c0_126] : memref<360x32xf32, #tpu.memory_space<vmem>>, vector<32x32xf32>
    %c232 = arith.constant 232 : index
    %c0_127 = arith.constant 0 : index
    %541 = vector.load %arg3[%c232, %c0_127] : memref<360x32xf32, #tpu.memory_space<vmem>>, vector<32x32xf32>
    %c7 = arith.constant 7 : index
    %c0_128 = arith.constant 0 : index
    %542 = vector.load %arg4[%c7, %c0_128] : memref<16x32xf32, #tpu.memory_space<vmem>>, vector<1x32xf32>
    %c264 = arith.constant 264 : index
    %c0_129 = arith.constant 0 : index
    %543 = vector.load %arg3[%c264, %c0_129] : memref<360x32xf32, #tpu.memory_space<vmem>>, vector<32x32xf32>
    %c8_130 = arith.constant 8 : index
    %c0_131 = arith.constant 0 : index
    %544 = vector.load %arg4[%c8_130, %c0_131] : memref<16x32xf32, #tpu.memory_space<vmem>>, vector<1x32xf32>
    %cst_132 = arith.constant dense<0.000000e+00> : vector<16x32xf32>
    %545 = tpu.matmul %535, %540, %cst_132 {dimension_numbers = #tpu.dot_dimension_numbers<[1], [0], [0], [1], [0, 0, 1, 1], [], []>} : vector<16x32xf32>, vector<32x32xf32>, vector<16x32xf32> -> vector<16x32xf32>
    %cst_133 = arith.constant 0.000000e+00 : f32
    %546 = vector.broadcast %cst_133 : f32 to vector<16x32xf32>
    %547 = vector.extract_strided_slice %6 {offsets = [0, 0], sizes = [16, 1], strides = [1, 1]} : vector<16x16xf32> to vector<16x1xf32>
    %548 = vector.broadcast %547 : vector<16x1xf32> to vector<16x16xf32>
    %549 = vector.broadcast %11 : vector<1x16xf32> to vector<16x16xf32>
    %550 = arith.subf %548, %549 : vector<16x16xf32>
    %551 = arith.mulf %550, %550 : vector<16x16xf32>
    %cst_134 = arith.constant -4.500000e+00 : f32
    %552 = vector.broadcast %cst_134 : f32 to vector<16x16xf32>
    %553 = arith.mulf %552, %551 : vector<16x16xf32>
    %554 = math.exp %553 : vector<16x16xf32>
    %cst_135 = arith.constant dense<0.000000e+00> : vector<16x32xf32>
    %555 = tpu.matmul %554, %536, %cst_135 {dimension_numbers = #tpu.dot_dimension_numbers<[1], [0], [0], [1], [0, 0, 1, 1], [], []>} : vector<16x16xf32>, vector<16x32xf32>, vector<16x32xf32> -> vector<16x32xf32>
    %556 = vector.broadcast %537 : vector<1x32xf32> to vector<16x32xf32>
    %557 = arith.addf %555, %556 : vector<16x32xf32>
    %cst_136 = arith.constant 0.000000e+00 : f32
    %558 = vector.broadcast %cst_136 : f32 to vector<16x32xf32>
    %559 = arith.maximumf %557, %558 : vector<16x32xf32>
    %560 = math.absf %557 : vector<16x32xf32>
    %cst_137 = arith.constant 0.000000e+00 : f32
    %561 = vector.broadcast %cst_137 : f32 to vector<16x32xf32>
    %562 = arith.subf %561, %560 : vector<16x32xf32>
    %563 = math.exp %562 : vector<16x32xf32>
    %564 = math.log1p %563 : vector<16x32xf32>
    %565 = arith.addf %559, %564 : vector<16x32xf32>
    %cst_138 = arith.constant 0.693147182 : f32
    %566 = vector.broadcast %cst_138 : f32 to vector<16x32xf32>
    %567 = arith.subf %565, %566 : vector<16x32xf32>
    %cst_139 = arith.constant dense<0.000000e+00> : vector<16x32xf32>
    %568 = tpu.matmul %567, %538, %cst_139 {dimension_numbers = #tpu.dot_dimension_numbers<[1], [0], [0], [1], [0, 0, 1, 1], [], []>} : vector<16x32xf32>, vector<32x32xf32>, vector<16x32xf32> -> vector<16x32xf32>
    %569 = vector.broadcast %539 : vector<1x32xf32> to vector<16x32xf32>
    %570 = arith.addf %568, %569 : vector<16x32xf32>
    %571 = vector.extract_strided_slice %7 {offsets = [0, 0], sizes = [16, 1], strides = [1, 1]} : vector<16x16xf32> to vector<16x1xf32>
    %572 = vector.broadcast %571 : vector<16x1xf32> to vector<16x32xf32>
    %573 = arith.mulf %570, %572 : vector<16x32xf32>
    %574 = vector.extract_strided_slice %545 {offsets = [0, 0], sizes = [1, 32], strides = [1, 1]} : vector<16x32xf32> to vector<1x32xf32>
    %575 = vector.broadcast %574 : vector<1x32xf32> to vector<16x32xf32>
    %576 = arith.mulf %573, %575 : vector<16x32xf32>
    %577 = arith.addf %546, %576 : vector<16x32xf32>
    %578 = vector.extract_strided_slice %6 {offsets = [0, 1], sizes = [16, 1], strides = [1, 1]} : vector<16x16xf32> to vector<16x1xf32>
    %579 = vector.broadcast %578 : vector<16x1xf32> to vector<16x16xf32>
    %580 = vector.broadcast %11 : vector<1x16xf32> to vector<16x16xf32>
    %581 = arith.subf %579, %580 : vector<16x16xf32>
    %582 = arith.mulf %581, %581 : vector<16x16xf32>
    %cst_140 = arith.constant -4.500000e+00 : f32
    %583 = vector.broadcast %cst_140 : f32 to vector<16x16xf32>
    %584 = arith.mulf %583, %582 : vector<16x16xf32>
    %585 = math.exp %584 : vector<16x16xf32>
    %cst_141 = arith.constant dense<0.000000e+00> : vector<16x32xf32>
    %586 = tpu.matmul %585, %536, %cst_141 {dimension_numbers = #tpu.dot_dimension_numbers<[1], [0], [0], [1], [0, 0, 1, 1], [], []>} : vector<16x16xf32>, vector<16x32xf32>, vector<16x32xf32> -> vector<16x32xf32>
    %587 = vector.broadcast %537 : vector<1x32xf32> to vector<16x32xf32>
    %588 = arith.addf %586, %587 : vector<16x32xf32>
    %cst_142 = arith.constant 0.000000e+00 : f32
    %589 = vector.broadcast %cst_142 : f32 to vector<16x32xf32>
    %590 = arith.maximumf %588, %589 : vector<16x32xf32>
    %591 = math.absf %588 : vector<16x32xf32>
    %cst_143 = arith.constant 0.000000e+00 : f32
    %592 = vector.broadcast %cst_143 : f32 to vector<16x32xf32>
    %593 = arith.subf %592, %591 : vector<16x32xf32>
    %594 = math.exp %593 : vector<16x32xf32>
    %595 = math.log1p %594 : vector<16x32xf32>
    %596 = arith.addf %590, %595 : vector<16x32xf32>
    %cst_144 = arith.constant 0.693147182 : f32
    %597 = vector.broadcast %cst_144 : f32 to vector<16x32xf32>
    %598 = arith.subf %596, %597 : vector<16x32xf32>
    %cst_145 = arith.constant dense<0.000000e+00> : vector<16x32xf32>
    %599 = tpu.matmul %598, %538, %cst_145 {dimension_numbers = #tpu.dot_dimension_numbers<[1], [0], [0], [1], [0, 0, 1, 1], [], []>} : vector<16x32xf32>, vector<32x32xf32>, vector<16x32xf32> -> vector<16x32xf32>
    %600 = vector.broadcast %539 : vector<1x32xf32> to vector<16x32xf32>
    %601 = arith.addf %599, %600 : vector<16x32xf32>
    %602 = vector.extract_strided_slice %7 {offsets = [0, 1], sizes = [16, 1], strides = [1, 1]} : vector<16x16xf32> to vector<16x1xf32>
    %603 = vector.broadcast %602 : vector<16x1xf32> to vector<16x32xf32>
    %604 = arith.mulf %601, %603 : vector<16x32xf32>
    %605 = vector.extract_strided_slice %545 {offsets = [1, 0], sizes = [1, 32], strides = [1, 1]} : vector<16x32xf32> to vector<1x32xf32>
    %606 = vector.broadcast %605 : vector<1x32xf32> to vector<16x32xf32>
    %607 = arith.mulf %604, %606 : vector<16x32xf32>
    %608 = arith.addf %577, %607 : vector<16x32xf32>
    %609 = vector.extract_strided_slice %6 {offsets = [0, 2], sizes = [16, 1], strides = [1, 1]} : vector<16x16xf32> to vector<16x1xf32>
    %610 = vector.broadcast %609 : vector<16x1xf32> to vector<16x16xf32>
    %611 = vector.broadcast %11 : vector<1x16xf32> to vector<16x16xf32>
    %612 = arith.subf %610, %611 : vector<16x16xf32>
    %613 = arith.mulf %612, %612 : vector<16x16xf32>
    %cst_146 = arith.constant -4.500000e+00 : f32
    %614 = vector.broadcast %cst_146 : f32 to vector<16x16xf32>
    %615 = arith.mulf %614, %613 : vector<16x16xf32>
    %616 = math.exp %615 : vector<16x16xf32>
    %cst_147 = arith.constant dense<0.000000e+00> : vector<16x32xf32>
    %617 = tpu.matmul %616, %536, %cst_147 {dimension_numbers = #tpu.dot_dimension_numbers<[1], [0], [0], [1], [0, 0, 1, 1], [], []>} : vector<16x16xf32>, vector<16x32xf32>, vector<16x32xf32> -> vector<16x32xf32>
    %618 = vector.broadcast %537 : vector<1x32xf32> to vector<16x32xf32>
    %619 = arith.addf %617, %618 : vector<16x32xf32>
    %cst_148 = arith.constant 0.000000e+00 : f32
    %620 = vector.broadcast %cst_148 : f32 to vector<16x32xf32>
    %621 = arith.maximumf %619, %620 : vector<16x32xf32>
    %622 = math.absf %619 : vector<16x32xf32>
    %cst_149 = arith.constant 0.000000e+00 : f32
    %623 = vector.broadcast %cst_149 : f32 to vector<16x32xf32>
    %624 = arith.subf %623, %622 : vector<16x32xf32>
    %625 = math.exp %624 : vector<16x32xf32>
    %626 = math.log1p %625 : vector<16x32xf32>
    %627 = arith.addf %621, %626 : vector<16x32xf32>
    %cst_150 = arith.constant 0.693147182 : f32
    %628 = vector.broadcast %cst_150 : f32 to vector<16x32xf32>
    %629 = arith.subf %627, %628 : vector<16x32xf32>
    %cst_151 = arith.constant dense<0.000000e+00> : vector<16x32xf32>
    %630 = tpu.matmul %629, %538, %cst_151 {dimension_numbers = #tpu.dot_dimension_numbers<[1], [0], [0], [1], [0, 0, 1, 1], [], []>} : vector<16x32xf32>, vector<32x32xf32>, vector<16x32xf32> -> vector<16x32xf32>
    %631 = vector.broadcast %539 : vector<1x32xf32> to vector<16x32xf32>
    %632 = arith.addf %630, %631 : vector<16x32xf32>
    %633 = vector.extract_strided_slice %7 {offsets = [0, 2], sizes = [16, 1], strides = [1, 1]} : vector<16x16xf32> to vector<16x1xf32>
    %634 = vector.broadcast %633 : vector<16x1xf32> to vector<16x32xf32>
    %635 = arith.mulf %632, %634 : vector<16x32xf32>
    %636 = vector.extract_strided_slice %545 {offsets = [2, 0], sizes = [1, 32], strides = [1, 1]} : vector<16x32xf32> to vector<1x32xf32>
    %637 = vector.broadcast %636 : vector<1x32xf32> to vector<16x32xf32>
    %638 = arith.mulf %635, %637 : vector<16x32xf32>
    %639 = arith.addf %608, %638 : vector<16x32xf32>
    %640 = vector.extract_strided_slice %6 {offsets = [0, 3], sizes = [16, 1], strides = [1, 1]} : vector<16x16xf32> to vector<16x1xf32>
    %641 = vector.broadcast %640 : vector<16x1xf32> to vector<16x16xf32>
    %642 = vector.broadcast %11 : vector<1x16xf32> to vector<16x16xf32>
    %643 = arith.subf %641, %642 : vector<16x16xf32>
    %644 = arith.mulf %643, %643 : vector<16x16xf32>
    %cst_152 = arith.constant -4.500000e+00 : f32
    %645 = vector.broadcast %cst_152 : f32 to vector<16x16xf32>
    %646 = arith.mulf %645, %644 : vector<16x16xf32>
    %647 = math.exp %646 : vector<16x16xf32>
    %cst_153 = arith.constant dense<0.000000e+00> : vector<16x32xf32>
    %648 = tpu.matmul %647, %536, %cst_153 {dimension_numbers = #tpu.dot_dimension_numbers<[1], [0], [0], [1], [0, 0, 1, 1], [], []>} : vector<16x16xf32>, vector<16x32xf32>, vector<16x32xf32> -> vector<16x32xf32>
    %649 = vector.broadcast %537 : vector<1x32xf32> to vector<16x32xf32>
    %650 = arith.addf %648, %649 : vector<16x32xf32>
    %cst_154 = arith.constant 0.000000e+00 : f32
    %651 = vector.broadcast %cst_154 : f32 to vector<16x32xf32>
    %652 = arith.maximumf %650, %651 : vector<16x32xf32>
    %653 = math.absf %650 : vector<16x32xf32>
    %cst_155 = arith.constant 0.000000e+00 : f32
    %654 = vector.broadcast %cst_155 : f32 to vector<16x32xf32>
    %655 = arith.subf %654, %653 : vector<16x32xf32>
    %656 = math.exp %655 : vector<16x32xf32>
    %657 = math.log1p %656 : vector<16x32xf32>
    %658 = arith.addf %652, %657 : vector<16x32xf32>
    %cst_156 = arith.constant 0.693147182 : f32
    %659 = vector.broadcast %cst_156 : f32 to vector<16x32xf32>
    %660 = arith.subf %658, %659 : vector<16x32xf32>
    %cst_157 = arith.constant dense<0.000000e+00> : vector<16x32xf32>
    %661 = tpu.matmul %660, %538, %cst_157 {dimension_numbers = #tpu.dot_dimension_numbers<[1], [0], [0], [1], [0, 0, 1, 1], [], []>} : vector<16x32xf32>, vector<32x32xf32>, vector<16x32xf32> -> vector<16x32xf32>
    %662 = vector.broadcast %539 : vector<1x32xf32> to vector<16x32xf32>
    %663 = arith.addf %661, %662 : vector<16x32xf32>
    %664 = vector.extract_strided_slice %7 {offsets = [0, 3], sizes = [16, 1], strides = [1, 1]} : vector<16x16xf32> to vector<16x1xf32>
    %665 = vector.broadcast %664 : vector<16x1xf32> to vector<16x32xf32>
    %666 = arith.mulf %663, %665 : vector<16x32xf32>
    %667 = vector.extract_strided_slice %545 {offsets = [3, 0], sizes = [1, 32], strides = [1, 1]} : vector<16x32xf32> to vector<1x32xf32>
    %668 = vector.broadcast %667 : vector<1x32xf32> to vector<16x32xf32>
    %669 = arith.mulf %666, %668 : vector<16x32xf32>
    %670 = arith.addf %639, %669 : vector<16x32xf32>
    %671 = vector.extract_strided_slice %6 {offsets = [0, 4], sizes = [16, 1], strides = [1, 1]} : vector<16x16xf32> to vector<16x1xf32>
    %672 = vector.broadcast %671 : vector<16x1xf32> to vector<16x16xf32>
    %673 = vector.broadcast %11 : vector<1x16xf32> to vector<16x16xf32>
    %674 = arith.subf %672, %673 : vector<16x16xf32>
    %675 = arith.mulf %674, %674 : vector<16x16xf32>
    %cst_158 = arith.constant -4.500000e+00 : f32
    %676 = vector.broadcast %cst_158 : f32 to vector<16x16xf32>
    %677 = arith.mulf %676, %675 : vector<16x16xf32>
    %678 = math.exp %677 : vector<16x16xf32>
    %cst_159 = arith.constant dense<0.000000e+00> : vector<16x32xf32>
    %679 = tpu.matmul %678, %536, %cst_159 {dimension_numbers = #tpu.dot_dimension_numbers<[1], [0], [0], [1], [0, 0, 1, 1], [], []>} : vector<16x16xf32>, vector<16x32xf32>, vector<16x32xf32> -> vector<16x32xf32>
    %680 = vector.broadcast %537 : vector<1x32xf32> to vector<16x32xf32>
    %681 = arith.addf %679, %680 : vector<16x32xf32>
    %cst_160 = arith.constant 0.000000e+00 : f32
    %682 = vector.broadcast %cst_160 : f32 to vector<16x32xf32>
    %683 = arith.maximumf %681, %682 : vector<16x32xf32>
    %684 = math.absf %681 : vector<16x32xf32>
    %cst_161 = arith.constant 0.000000e+00 : f32
    %685 = vector.broadcast %cst_161 : f32 to vector<16x32xf32>
    %686 = arith.subf %685, %684 : vector<16x32xf32>
    %687 = math.exp %686 : vector<16x32xf32>
    %688 = math.log1p %687 : vector<16x32xf32>
    %689 = arith.addf %683, %688 : vector<16x32xf32>
    %cst_162 = arith.constant 0.693147182 : f32
    %690 = vector.broadcast %cst_162 : f32 to vector<16x32xf32>
    %691 = arith.subf %689, %690 : vector<16x32xf32>
    %cst_163 = arith.constant dense<0.000000e+00> : vector<16x32xf32>
    %692 = tpu.matmul %691, %538, %cst_163 {dimension_numbers = #tpu.dot_dimension_numbers<[1], [0], [0], [1], [0, 0, 1, 1], [], []>} : vector<16x32xf32>, vector<32x32xf32>, vector<16x32xf32> -> vector<16x32xf32>
    %693 = vector.broadcast %539 : vector<1x32xf32> to vector<16x32xf32>
    %694 = arith.addf %692, %693 : vector<16x32xf32>
    %695 = vector.extract_strided_slice %7 {offsets = [0, 4], sizes = [16, 1], strides = [1, 1]} : vector<16x16xf32> to vector<16x1xf32>
    %696 = vector.broadcast %695 : vector<16x1xf32> to vector<16x32xf32>
    %697 = arith.mulf %694, %696 : vector<16x32xf32>
    %698 = vector.extract_strided_slice %545 {offsets = [4, 0], sizes = [1, 32], strides = [1, 1]} : vector<16x32xf32> to vector<1x32xf32>
    %699 = vector.broadcast %698 : vector<1x32xf32> to vector<16x32xf32>
    %700 = arith.mulf %697, %699 : vector<16x32xf32>
    %701 = arith.addf %670, %700 : vector<16x32xf32>
    %702 = vector.extract_strided_slice %6 {offsets = [0, 5], sizes = [16, 1], strides = [1, 1]} : vector<16x16xf32> to vector<16x1xf32>
    %703 = vector.broadcast %702 : vector<16x1xf32> to vector<16x16xf32>
    %704 = vector.broadcast %11 : vector<1x16xf32> to vector<16x16xf32>
    %705 = arith.subf %703, %704 : vector<16x16xf32>
    %706 = arith.mulf %705, %705 : vector<16x16xf32>
    %cst_164 = arith.constant -4.500000e+00 : f32
    %707 = vector.broadcast %cst_164 : f32 to vector<16x16xf32>
    %708 = arith.mulf %707, %706 : vector<16x16xf32>
    %709 = math.exp %708 : vector<16x16xf32>
    %cst_165 = arith.constant dense<0.000000e+00> : vector<16x32xf32>
    %710 = tpu.matmul %709, %536, %cst_165 {dimension_numbers = #tpu.dot_dimension_numbers<[1], [0], [0], [1], [0, 0, 1, 1], [], []>} : vector<16x16xf32>, vector<16x32xf32>, vector<16x32xf32> -> vector<16x32xf32>
    %711 = vector.broadcast %537 : vector<1x32xf32> to vector<16x32xf32>
    %712 = arith.addf %710, %711 : vector<16x32xf32>
    %cst_166 = arith.constant 0.000000e+00 : f32
    %713 = vector.broadcast %cst_166 : f32 to vector<16x32xf32>
    %714 = arith.maximumf %712, %713 : vector<16x32xf32>
    %715 = math.absf %712 : vector<16x32xf32>
    %cst_167 = arith.constant 0.000000e+00 : f32
    %716 = vector.broadcast %cst_167 : f32 to vector<16x32xf32>
    %717 = arith.subf %716, %715 : vector<16x32xf32>
    %718 = math.exp %717 : vector<16x32xf32>
    %719 = math.log1p %718 : vector<16x32xf32>
    %720 = arith.addf %714, %719 : vector<16x32xf32>
    %cst_168 = arith.constant 0.693147182 : f32
    %721 = vector.broadcast %cst_168 : f32 to vector<16x32xf32>
    %722 = arith.subf %720, %721 : vector<16x32xf32>
    %cst_169 = arith.constant dense<0.000000e+00> : vector<16x32xf32>
    %723 = tpu.matmul %722, %538, %cst_169 {dimension_numbers = #tpu.dot_dimension_numbers<[1], [0], [0], [1], [0, 0, 1, 1], [], []>} : vector<16x32xf32>, vector<32x32xf32>, vector<16x32xf32> -> vector<16x32xf32>
    %724 = vector.broadcast %539 : vector<1x32xf32> to vector<16x32xf32>
    %725 = arith.addf %723, %724 : vector<16x32xf32>
    %726 = vector.extract_strided_slice %7 {offsets = [0, 5], sizes = [16, 1], strides = [1, 1]} : vector<16x16xf32> to vector<16x1xf32>
    %727 = vector.broadcast %726 : vector<16x1xf32> to vector<16x32xf32>
    %728 = arith.mulf %725, %727 : vector<16x32xf32>
    %729 = vector.extract_strided_slice %545 {offsets = [5, 0], sizes = [1, 32], strides = [1, 1]} : vector<16x32xf32> to vector<1x32xf32>
    %730 = vector.broadcast %729 : vector<1x32xf32> to vector<16x32xf32>
    %731 = arith.mulf %728, %730 : vector<16x32xf32>
    %732 = arith.addf %701, %731 : vector<16x32xf32>
    %733 = vector.extract_strided_slice %6 {offsets = [0, 6], sizes = [16, 1], strides = [1, 1]} : vector<16x16xf32> to vector<16x1xf32>
    %734 = vector.broadcast %733 : vector<16x1xf32> to vector<16x16xf32>
    %735 = vector.broadcast %11 : vector<1x16xf32> to vector<16x16xf32>
    %736 = arith.subf %734, %735 : vector<16x16xf32>
    %737 = arith.mulf %736, %736 : vector<16x16xf32>
    %cst_170 = arith.constant -4.500000e+00 : f32
    %738 = vector.broadcast %cst_170 : f32 to vector<16x16xf32>
    %739 = arith.mulf %738, %737 : vector<16x16xf32>
    %740 = math.exp %739 : vector<16x16xf32>
    %cst_171 = arith.constant dense<0.000000e+00> : vector<16x32xf32>
    %741 = tpu.matmul %740, %536, %cst_171 {dimension_numbers = #tpu.dot_dimension_numbers<[1], [0], [0], [1], [0, 0, 1, 1], [], []>} : vector<16x16xf32>, vector<16x32xf32>, vector<16x32xf32> -> vector<16x32xf32>
    %742 = vector.broadcast %537 : vector<1x32xf32> to vector<16x32xf32>
    %743 = arith.addf %741, %742 : vector<16x32xf32>
    %cst_172 = arith.constant 0.000000e+00 : f32
    %744 = vector.broadcast %cst_172 : f32 to vector<16x32xf32>
    %745 = arith.maximumf %743, %744 : vector<16x32xf32>
    %746 = math.absf %743 : vector<16x32xf32>
    %cst_173 = arith.constant 0.000000e+00 : f32
    %747 = vector.broadcast %cst_173 : f32 to vector<16x32xf32>
    %748 = arith.subf %747, %746 : vector<16x32xf32>
    %749 = math.exp %748 : vector<16x32xf32>
    %750 = math.log1p %749 : vector<16x32xf32>
    %751 = arith.addf %745, %750 : vector<16x32xf32>
    %cst_174 = arith.constant 0.693147182 : f32
    %752 = vector.broadcast %cst_174 : f32 to vector<16x32xf32>
    %753 = arith.subf %751, %752 : vector<16x32xf32>
    %cst_175 = arith.constant dense<0.000000e+00> : vector<16x32xf32>
    %754 = tpu.matmul %753, %538, %cst_175 {dimension_numbers = #tpu.dot_dimension_numbers<[1], [0], [0], [1], [0, 0, 1, 1], [], []>} : vector<16x32xf32>, vector<32x32xf32>, vector<16x32xf32> -> vector<16x32xf32>
    %755 = vector.broadcast %539 : vector<1x32xf32> to vector<16x32xf32>
    %756 = arith.addf %754, %755 : vector<16x32xf32>
    %757 = vector.extract_strided_slice %7 {offsets = [0, 6], sizes = [16, 1], strides = [1, 1]} : vector<16x16xf32> to vector<16x1xf32>
    %758 = vector.broadcast %757 : vector<16x1xf32> to vector<16x32xf32>
    %759 = arith.mulf %756, %758 : vector<16x32xf32>
    %760 = vector.extract_strided_slice %545 {offsets = [6, 0], sizes = [1, 32], strides = [1, 1]} : vector<16x32xf32> to vector<1x32xf32>
    %761 = vector.broadcast %760 : vector<1x32xf32> to vector<16x32xf32>
    %762 = arith.mulf %759, %761 : vector<16x32xf32>
    %763 = arith.addf %732, %762 : vector<16x32xf32>
    %764 = vector.extract_strided_slice %6 {offsets = [0, 7], sizes = [16, 1], strides = [1, 1]} : vector<16x16xf32> to vector<16x1xf32>
    %765 = vector.broadcast %764 : vector<16x1xf32> to vector<16x16xf32>
    %766 = vector.broadcast %11 : vector<1x16xf32> to vector<16x16xf32>
    %767 = arith.subf %765, %766 : vector<16x16xf32>
    %768 = arith.mulf %767, %767 : vector<16x16xf32>
    %cst_176 = arith.constant -4.500000e+00 : f32
    %769 = vector.broadcast %cst_176 : f32 to vector<16x16xf32>
    %770 = arith.mulf %769, %768 : vector<16x16xf32>
    %771 = math.exp %770 : vector<16x16xf32>
    %cst_177 = arith.constant dense<0.000000e+00> : vector<16x32xf32>
    %772 = tpu.matmul %771, %536, %cst_177 {dimension_numbers = #tpu.dot_dimension_numbers<[1], [0], [0], [1], [0, 0, 1, 1], [], []>} : vector<16x16xf32>, vector<16x32xf32>, vector<16x32xf32> -> vector<16x32xf32>
    %773 = vector.broadcast %537 : vector<1x32xf32> to vector<16x32xf32>
    %774 = arith.addf %772, %773 : vector<16x32xf32>
    %cst_178 = arith.constant 0.000000e+00 : f32
    %775 = vector.broadcast %cst_178 : f32 to vector<16x32xf32>
    %776 = arith.maximumf %774, %775 : vector<16x32xf32>
    %777 = math.absf %774 : vector<16x32xf32>
    %cst_179 = arith.constant 0.000000e+00 : f32
    %778 = vector.broadcast %cst_179 : f32 to vector<16x32xf32>
    %779 = arith.subf %778, %777 : vector<16x32xf32>
    %780 = math.exp %779 : vector<16x32xf32>
    %781 = math.log1p %780 : vector<16x32xf32>
    %782 = arith.addf %776, %781 : vector<16x32xf32>
    %cst_180 = arith.constant 0.693147182 : f32
    %783 = vector.broadcast %cst_180 : f32 to vector<16x32xf32>
    %784 = arith.subf %782, %783 : vector<16x32xf32>
    %cst_181 = arith.constant dense<0.000000e+00> : vector<16x32xf32>
    %785 = tpu.matmul %784, %538, %cst_181 {dimension_numbers = #tpu.dot_dimension_numbers<[1], [0], [0], [1], [0, 0, 1, 1], [], []>} : vector<16x32xf32>, vector<32x32xf32>, vector<16x32xf32> -> vector<16x32xf32>
    %786 = vector.broadcast %539 : vector<1x32xf32> to vector<16x32xf32>
    %787 = arith.addf %785, %786 : vector<16x32xf32>
    %788 = vector.extract_strided_slice %7 {offsets = [0, 7], sizes = [16, 1], strides = [1, 1]} : vector<16x16xf32> to vector<16x1xf32>
    %789 = vector.broadcast %788 : vector<16x1xf32> to vector<16x32xf32>
    %790 = arith.mulf %787, %789 : vector<16x32xf32>
    %791 = vector.extract_strided_slice %545 {offsets = [7, 0], sizes = [1, 32], strides = [1, 1]} : vector<16x32xf32> to vector<1x32xf32>
    %792 = vector.broadcast %791 : vector<1x32xf32> to vector<16x32xf32>
    %793 = arith.mulf %790, %792 : vector<16x32xf32>
    %794 = arith.addf %763, %793 : vector<16x32xf32>
    %795 = vector.extract_strided_slice %6 {offsets = [0, 8], sizes = [16, 1], strides = [1, 1]} : vector<16x16xf32> to vector<16x1xf32>
    %796 = vector.broadcast %795 : vector<16x1xf32> to vector<16x16xf32>
    %797 = vector.broadcast %11 : vector<1x16xf32> to vector<16x16xf32>
    %798 = arith.subf %796, %797 : vector<16x16xf32>
    %799 = arith.mulf %798, %798 : vector<16x16xf32>
    %cst_182 = arith.constant -4.500000e+00 : f32
    %800 = vector.broadcast %cst_182 : f32 to vector<16x16xf32>
    %801 = arith.mulf %800, %799 : vector<16x16xf32>
    %802 = math.exp %801 : vector<16x16xf32>
    %cst_183 = arith.constant dense<0.000000e+00> : vector<16x32xf32>
    %803 = tpu.matmul %802, %536, %cst_183 {dimension_numbers = #tpu.dot_dimension_numbers<[1], [0], [0], [1], [0, 0, 1, 1], [], []>} : vector<16x16xf32>, vector<16x32xf32>, vector<16x32xf32> -> vector<16x32xf32>
    %804 = vector.broadcast %537 : vector<1x32xf32> to vector<16x32xf32>
    %805 = arith.addf %803, %804 : vector<16x32xf32>
    %cst_184 = arith.constant 0.000000e+00 : f32
    %806 = vector.broadcast %cst_184 : f32 to vector<16x32xf32>
    %807 = arith.maximumf %805, %806 : vector<16x32xf32>
    %808 = math.absf %805 : vector<16x32xf32>
    %cst_185 = arith.constant 0.000000e+00 : f32
    %809 = vector.broadcast %cst_185 : f32 to vector<16x32xf32>
    %810 = arith.subf %809, %808 : vector<16x32xf32>
    %811 = math.exp %810 : vector<16x32xf32>
    %812 = math.log1p %811 : vector<16x32xf32>
    %813 = arith.addf %807, %812 : vector<16x32xf32>
    %cst_186 = arith.constant 0.693147182 : f32
    %814 = vector.broadcast %cst_186 : f32 to vector<16x32xf32>
    %815 = arith.subf %813, %814 : vector<16x32xf32>
    %cst_187 = arith.constant dense<0.000000e+00> : vector<16x32xf32>
    %816 = tpu.matmul %815, %538, %cst_187 {dimension_numbers = #tpu.dot_dimension_numbers<[1], [0], [0], [1], [0, 0, 1, 1], [], []>} : vector<16x32xf32>, vector<32x32xf32>, vector<16x32xf32> -> vector<16x32xf32>
    %817 = vector.broadcast %539 : vector<1x32xf32> to vector<16x32xf32>
    %818 = arith.addf %816, %817 : vector<16x32xf32>
    %819 = vector.extract_strided_slice %7 {offsets = [0, 8], sizes = [16, 1], strides = [1, 1]} : vector<16x16xf32> to vector<16x1xf32>
    %820 = vector.broadcast %819 : vector<16x1xf32> to vector<16x32xf32>
    %821 = arith.mulf %818, %820 : vector<16x32xf32>
    %822 = vector.extract_strided_slice %545 {offsets = [8, 0], sizes = [1, 32], strides = [1, 1]} : vector<16x32xf32> to vector<1x32xf32>
    %823 = vector.broadcast %822 : vector<1x32xf32> to vector<16x32xf32>
    %824 = arith.mulf %821, %823 : vector<16x32xf32>
    %825 = arith.addf %794, %824 : vector<16x32xf32>
    %826 = vector.extract_strided_slice %6 {offsets = [0, 9], sizes = [16, 1], strides = [1, 1]} : vector<16x16xf32> to vector<16x1xf32>
    %827 = vector.broadcast %826 : vector<16x1xf32> to vector<16x16xf32>
    %828 = vector.broadcast %11 : vector<1x16xf32> to vector<16x16xf32>
    %829 = arith.subf %827, %828 : vector<16x16xf32>
    %830 = arith.mulf %829, %829 : vector<16x16xf32>
    %cst_188 = arith.constant -4.500000e+00 : f32
    %831 = vector.broadcast %cst_188 : f32 to vector<16x16xf32>
    %832 = arith.mulf %831, %830 : vector<16x16xf32>
    %833 = math.exp %832 : vector<16x16xf32>
    %cst_189 = arith.constant dense<0.000000e+00> : vector<16x32xf32>
    %834 = tpu.matmul %833, %536, %cst_189 {dimension_numbers = #tpu.dot_dimension_numbers<[1], [0], [0], [1], [0, 0, 1, 1], [], []>} : vector<16x16xf32>, vector<16x32xf32>, vector<16x32xf32> -> vector<16x32xf32>
    %835 = vector.broadcast %537 : vector<1x32xf32> to vector<16x32xf32>
    %836 = arith.addf %834, %835 : vector<16x32xf32>
    %cst_190 = arith.constant 0.000000e+00 : f32
    %837 = vector.broadcast %cst_190 : f32 to vector<16x32xf32>
    %838 = arith.maximumf %836, %837 : vector<16x32xf32>
    %839 = math.absf %836 : vector<16x32xf32>
    %cst_191 = arith.constant 0.000000e+00 : f32
    %840 = vector.broadcast %cst_191 : f32 to vector<16x32xf32>
    %841 = arith.subf %840, %839 : vector<16x32xf32>
    %842 = math.exp %841 : vector<16x32xf32>
    %843 = math.log1p %842 : vector<16x32xf32>
    %844 = arith.addf %838, %843 : vector<16x32xf32>
    %cst_192 = arith.constant 0.693147182 : f32
    %845 = vector.broadcast %cst_192 : f32 to vector<16x32xf32>
    %846 = arith.subf %844, %845 : vector<16x32xf32>
    %cst_193 = arith.constant dense<0.000000e+00> : vector<16x32xf32>
    %847 = tpu.matmul %846, %538, %cst_193 {dimension_numbers = #tpu.dot_dimension_numbers<[1], [0], [0], [1], [0, 0, 1, 1], [], []>} : vector<16x32xf32>, vector<32x32xf32>, vector<16x32xf32> -> vector<16x32xf32>
    %848 = vector.broadcast %539 : vector<1x32xf32> to vector<16x32xf32>
    %849 = arith.addf %847, %848 : vector<16x32xf32>
    %850 = vector.extract_strided_slice %7 {offsets = [0, 9], sizes = [16, 1], strides = [1, 1]} : vector<16x16xf32> to vector<16x1xf32>
    %851 = vector.broadcast %850 : vector<16x1xf32> to vector<16x32xf32>
    %852 = arith.mulf %849, %851 : vector<16x32xf32>
    %853 = vector.extract_strided_slice %545 {offsets = [9, 0], sizes = [1, 32], strides = [1, 1]} : vector<16x32xf32> to vector<1x32xf32>
    %854 = vector.broadcast %853 : vector<1x32xf32> to vector<16x32xf32>
    %855 = arith.mulf %852, %854 : vector<16x32xf32>
    %856 = arith.addf %825, %855 : vector<16x32xf32>
    %857 = vector.extract_strided_slice %6 {offsets = [0, 10], sizes = [16, 1], strides = [1, 1]} : vector<16x16xf32> to vector<16x1xf32>
    %858 = vector.broadcast %857 : vector<16x1xf32> to vector<16x16xf32>
    %859 = vector.broadcast %11 : vector<1x16xf32> to vector<16x16xf32>
    %860 = arith.subf %858, %859 : vector<16x16xf32>
    %861 = arith.mulf %860, %860 : vector<16x16xf32>
    %cst_194 = arith.constant -4.500000e+00 : f32
    %862 = vector.broadcast %cst_194 : f32 to vector<16x16xf32>
    %863 = arith.mulf %862, %861 : vector<16x16xf32>
    %864 = math.exp %863 : vector<16x16xf32>
    %cst_195 = arith.constant dense<0.000000e+00> : vector<16x32xf32>
    %865 = tpu.matmul %864, %536, %cst_195 {dimension_numbers = #tpu.dot_dimension_numbers<[1], [0], [0], [1], [0, 0, 1, 1], [], []>} : vector<16x16xf32>, vector<16x32xf32>, vector<16x32xf32> -> vector<16x32xf32>
    %866 = vector.broadcast %537 : vector<1x32xf32> to vector<16x32xf32>
    %867 = arith.addf %865, %866 : vector<16x32xf32>
    %cst_196 = arith.constant 0.000000e+00 : f32
    %868 = vector.broadcast %cst_196 : f32 to vector<16x32xf32>
    %869 = arith.maximumf %867, %868 : vector<16x32xf32>
    %870 = math.absf %867 : vector<16x32xf32>
    %cst_197 = arith.constant 0.000000e+00 : f32
    %871 = vector.broadcast %cst_197 : f32 to vector<16x32xf32>
    %872 = arith.subf %871, %870 : vector<16x32xf32>
    %873 = math.exp %872 : vector<16x32xf32>
    %874 = math.log1p %873 : vector<16x32xf32>
    %875 = arith.addf %869, %874 : vector<16x32xf32>
    %cst_198 = arith.constant 0.693147182 : f32
    %876 = vector.broadcast %cst_198 : f32 to vector<16x32xf32>
    %877 = arith.subf %875, %876 : vector<16x32xf32>
    %cst_199 = arith.constant dense<0.000000e+00> : vector<16x32xf32>
    %878 = tpu.matmul %877, %538, %cst_199 {dimension_numbers = #tpu.dot_dimension_numbers<[1], [0], [0], [1], [0, 0, 1, 1], [], []>} : vector<16x32xf32>, vector<32x32xf32>, vector<16x32xf32> -> vector<16x32xf32>
    %879 = vector.broadcast %539 : vector<1x32xf32> to vector<16x32xf32>
    %880 = arith.addf %878, %879 : vector<16x32xf32>
    %881 = vector.extract_strided_slice %7 {offsets = [0, 10], sizes = [16, 1], strides = [1, 1]} : vector<16x16xf32> to vector<16x1xf32>
    %882 = vector.broadcast %881 : vector<16x1xf32> to vector<16x32xf32>
    %883 = arith.mulf %880, %882 : vector<16x32xf32>
    %884 = vector.extract_strided_slice %545 {offsets = [10, 0], sizes = [1, 32], strides = [1, 1]} : vector<16x32xf32> to vector<1x32xf32>
    %885 = vector.broadcast %884 : vector<1x32xf32> to vector<16x32xf32>
    %886 = arith.mulf %883, %885 : vector<16x32xf32>
    %887 = arith.addf %856, %886 : vector<16x32xf32>
    %888 = vector.extract_strided_slice %6 {offsets = [0, 11], sizes = [16, 1], strides = [1, 1]} : vector<16x16xf32> to vector<16x1xf32>
    %889 = vector.broadcast %888 : vector<16x1xf32> to vector<16x16xf32>
    %890 = vector.broadcast %11 : vector<1x16xf32> to vector<16x16xf32>
    %891 = arith.subf %889, %890 : vector<16x16xf32>
    %892 = arith.mulf %891, %891 : vector<16x16xf32>
    %cst_200 = arith.constant -4.500000e+00 : f32
    %893 = vector.broadcast %cst_200 : f32 to vector<16x16xf32>
    %894 = arith.mulf %893, %892 : vector<16x16xf32>
    %895 = math.exp %894 : vector<16x16xf32>
    %cst_201 = arith.constant dense<0.000000e+00> : vector<16x32xf32>
    %896 = tpu.matmul %895, %536, %cst_201 {dimension_numbers = #tpu.dot_dimension_numbers<[1], [0], [0], [1], [0, 0, 1, 1], [], []>} : vector<16x16xf32>, vector<16x32xf32>, vector<16x32xf32> -> vector<16x32xf32>
    %897 = vector.broadcast %537 : vector<1x32xf32> to vector<16x32xf32>
    %898 = arith.addf %896, %897 : vector<16x32xf32>
    %cst_202 = arith.constant 0.000000e+00 : f32
    %899 = vector.broadcast %cst_202 : f32 to vector<16x32xf32>
    %900 = arith.maximumf %898, %899 : vector<16x32xf32>
    %901 = math.absf %898 : vector<16x32xf32>
    %cst_203 = arith.constant 0.000000e+00 : f32
    %902 = vector.broadcast %cst_203 : f32 to vector<16x32xf32>
    %903 = arith.subf %902, %901 : vector<16x32xf32>
    %904 = math.exp %903 : vector<16x32xf32>
    %905 = math.log1p %904 : vector<16x32xf32>
    %906 = arith.addf %900, %905 : vector<16x32xf32>
    %cst_204 = arith.constant 0.693147182 : f32
    %907 = vector.broadcast %cst_204 : f32 to vector<16x32xf32>
    %908 = arith.subf %906, %907 : vector<16x32xf32>
    %cst_205 = arith.constant dense<0.000000e+00> : vector<16x32xf32>
    %909 = tpu.matmul %908, %538, %cst_205 {dimension_numbers = #tpu.dot_dimension_numbers<[1], [0], [0], [1], [0, 0, 1, 1], [], []>} : vector<16x32xf32>, vector<32x32xf32>, vector<16x32xf32> -> vector<16x32xf32>
    %910 = vector.broadcast %539 : vector<1x32xf32> to vector<16x32xf32>
    %911 = arith.addf %909, %910 : vector<16x32xf32>
    %912 = vector.extract_strided_slice %7 {offsets = [0, 11], sizes = [16, 1], strides = [1, 1]} : vector<16x16xf32> to vector<16x1xf32>
    %913 = vector.broadcast %912 : vector<16x1xf32> to vector<16x32xf32>
    %914 = arith.mulf %911, %913 : vector<16x32xf32>
    %915 = vector.extract_strided_slice %545 {offsets = [11, 0], sizes = [1, 32], strides = [1, 1]} : vector<16x32xf32> to vector<1x32xf32>
    %916 = vector.broadcast %915 : vector<1x32xf32> to vector<16x32xf32>
    %917 = arith.mulf %914, %916 : vector<16x32xf32>
    %918 = arith.addf %887, %917 : vector<16x32xf32>
    %919 = vector.extract_strided_slice %6 {offsets = [0, 12], sizes = [16, 1], strides = [1, 1]} : vector<16x16xf32> to vector<16x1xf32>
    %920 = vector.broadcast %919 : vector<16x1xf32> to vector<16x16xf32>
    %921 = vector.broadcast %11 : vector<1x16xf32> to vector<16x16xf32>
    %922 = arith.subf %920, %921 : vector<16x16xf32>
    %923 = arith.mulf %922, %922 : vector<16x16xf32>
    %cst_206 = arith.constant -4.500000e+00 : f32
    %924 = vector.broadcast %cst_206 : f32 to vector<16x16xf32>
    %925 = arith.mulf %924, %923 : vector<16x16xf32>
    %926 = math.exp %925 : vector<16x16xf32>
    %cst_207 = arith.constant dense<0.000000e+00> : vector<16x32xf32>
    %927 = tpu.matmul %926, %536, %cst_207 {dimension_numbers = #tpu.dot_dimension_numbers<[1], [0], [0], [1], [0, 0, 1, 1], [], []>} : vector<16x16xf32>, vector<16x32xf32>, vector<16x32xf32> -> vector<16x32xf32>
    %928 = vector.broadcast %537 : vector<1x32xf32> to vector<16x32xf32>
    %929 = arith.addf %927, %928 : vector<16x32xf32>
    %cst_208 = arith.constant 0.000000e+00 : f32
    %930 = vector.broadcast %cst_208 : f32 to vector<16x32xf32>
    %931 = arith.maximumf %929, %930 : vector<16x32xf32>
    %932 = math.absf %929 : vector<16x32xf32>
    %cst_209 = arith.constant 0.000000e+00 : f32
    %933 = vector.broadcast %cst_209 : f32 to vector<16x32xf32>
    %934 = arith.subf %933, %932 : vector<16x32xf32>
    %935 = math.exp %934 : vector<16x32xf32>
    %936 = math.log1p %935 : vector<16x32xf32>
    %937 = arith.addf %931, %936 : vector<16x32xf32>
    %cst_210 = arith.constant 0.693147182 : f32
    %938 = vector.broadcast %cst_210 : f32 to vector<16x32xf32>
    %939 = arith.subf %937, %938 : vector<16x32xf32>
    %cst_211 = arith.constant dense<0.000000e+00> : vector<16x32xf32>
    %940 = tpu.matmul %939, %538, %cst_211 {dimension_numbers = #tpu.dot_dimension_numbers<[1], [0], [0], [1], [0, 0, 1, 1], [], []>} : vector<16x32xf32>, vector<32x32xf32>, vector<16x32xf32> -> vector<16x32xf32>
    %941 = vector.broadcast %539 : vector<1x32xf32> to vector<16x32xf32>
    %942 = arith.addf %940, %941 : vector<16x32xf32>
    %943 = vector.extract_strided_slice %7 {offsets = [0, 12], sizes = [16, 1], strides = [1, 1]} : vector<16x16xf32> to vector<16x1xf32>
    %944 = vector.broadcast %943 : vector<16x1xf32> to vector<16x32xf32>
    %945 = arith.mulf %942, %944 : vector<16x32xf32>
    %946 = vector.extract_strided_slice %545 {offsets = [12, 0], sizes = [1, 32], strides = [1, 1]} : vector<16x32xf32> to vector<1x32xf32>
    %947 = vector.broadcast %946 : vector<1x32xf32> to vector<16x32xf32>
    %948 = arith.mulf %945, %947 : vector<16x32xf32>
    %949 = arith.addf %918, %948 : vector<16x32xf32>
    %950 = vector.extract_strided_slice %6 {offsets = [0, 13], sizes = [16, 1], strides = [1, 1]} : vector<16x16xf32> to vector<16x1xf32>
    %951 = vector.broadcast %950 : vector<16x1xf32> to vector<16x16xf32>
    %952 = vector.broadcast %11 : vector<1x16xf32> to vector<16x16xf32>
    %953 = arith.subf %951, %952 : vector<16x16xf32>
    %954 = arith.mulf %953, %953 : vector<16x16xf32>
    %cst_212 = arith.constant -4.500000e+00 : f32
    %955 = vector.broadcast %cst_212 : f32 to vector<16x16xf32>
    %956 = arith.mulf %955, %954 : vector<16x16xf32>
    %957 = math.exp %956 : vector<16x16xf32>
    %cst_213 = arith.constant dense<0.000000e+00> : vector<16x32xf32>
    %958 = tpu.matmul %957, %536, %cst_213 {dimension_numbers = #tpu.dot_dimension_numbers<[1], [0], [0], [1], [0, 0, 1, 1], [], []>} : vector<16x16xf32>, vector<16x32xf32>, vector<16x32xf32> -> vector<16x32xf32>
    %959 = vector.broadcast %537 : vector<1x32xf32> to vector<16x32xf32>
    %960 = arith.addf %958, %959 : vector<16x32xf32>
    %cst_214 = arith.constant 0.000000e+00 : f32
    %961 = vector.broadcast %cst_214 : f32 to vector<16x32xf32>
    %962 = arith.maximumf %960, %961 : vector<16x32xf32>
    %963 = math.absf %960 : vector<16x32xf32>
    %cst_215 = arith.constant 0.000000e+00 : f32
    %964 = vector.broadcast %cst_215 : f32 to vector<16x32xf32>
    %965 = arith.subf %964, %963 : vector<16x32xf32>
    %966 = math.exp %965 : vector<16x32xf32>
    %967 = math.log1p %966 : vector<16x32xf32>
    %968 = arith.addf %962, %967 : vector<16x32xf32>
    %cst_216 = arith.constant 0.693147182 : f32
    %969 = vector.broadcast %cst_216 : f32 to vector<16x32xf32>
    %970 = arith.subf %968, %969 : vector<16x32xf32>
    %cst_217 = arith.constant dense<0.000000e+00> : vector<16x32xf32>
    %971 = tpu.matmul %970, %538, %cst_217 {dimension_numbers = #tpu.dot_dimension_numbers<[1], [0], [0], [1], [0, 0, 1, 1], [], []>} : vector<16x32xf32>, vector<32x32xf32>, vector<16x32xf32> -> vector<16x32xf32>
    %972 = vector.broadcast %539 : vector<1x32xf32> to vector<16x32xf32>
    %973 = arith.addf %971, %972 : vector<16x32xf32>
    %974 = vector.extract_strided_slice %7 {offsets = [0, 13], sizes = [16, 1], strides = [1, 1]} : vector<16x16xf32> to vector<16x1xf32>
    %975 = vector.broadcast %974 : vector<16x1xf32> to vector<16x32xf32>
    %976 = arith.mulf %973, %975 : vector<16x32xf32>
    %977 = vector.extract_strided_slice %545 {offsets = [13, 0], sizes = [1, 32], strides = [1, 1]} : vector<16x32xf32> to vector<1x32xf32>
    %978 = vector.broadcast %977 : vector<1x32xf32> to vector<16x32xf32>
    %979 = arith.mulf %976, %978 : vector<16x32xf32>
    %980 = arith.addf %949, %979 : vector<16x32xf32>
    %981 = vector.extract_strided_slice %6 {offsets = [0, 14], sizes = [16, 1], strides = [1, 1]} : vector<16x16xf32> to vector<16x1xf32>
    %982 = vector.broadcast %981 : vector<16x1xf32> to vector<16x16xf32>
    %983 = vector.broadcast %11 : vector<1x16xf32> to vector<16x16xf32>
    %984 = arith.subf %982, %983 : vector<16x16xf32>
    %985 = arith.mulf %984, %984 : vector<16x16xf32>
    %cst_218 = arith.constant -4.500000e+00 : f32
    %986 = vector.broadcast %cst_218 : f32 to vector<16x16xf32>
    %987 = arith.mulf %986, %985 : vector<16x16xf32>
    %988 = math.exp %987 : vector<16x16xf32>
    %cst_219 = arith.constant dense<0.000000e+00> : vector<16x32xf32>
    %989 = tpu.matmul %988, %536, %cst_219 {dimension_numbers = #tpu.dot_dimension_numbers<[1], [0], [0], [1], [0, 0, 1, 1], [], []>} : vector<16x16xf32>, vector<16x32xf32>, vector<16x32xf32> -> vector<16x32xf32>
    %990 = vector.broadcast %537 : vector<1x32xf32> to vector<16x32xf32>
    %991 = arith.addf %989, %990 : vector<16x32xf32>
    %cst_220 = arith.constant 0.000000e+00 : f32
    %992 = vector.broadcast %cst_220 : f32 to vector<16x32xf32>
    %993 = arith.maximumf %991, %992 : vector<16x32xf32>
    %994 = math.absf %991 : vector<16x32xf32>
    %cst_221 = arith.constant 0.000000e+00 : f32
    %995 = vector.broadcast %cst_221 : f32 to vector<16x32xf32>
    %996 = arith.subf %995, %994 : vector<16x32xf32>
    %997 = math.exp %996 : vector<16x32xf32>
    %998 = math.log1p %997 : vector<16x32xf32>
    %999 = arith.addf %993, %998 : vector<16x32xf32>
    %cst_222 = arith.constant 0.693147182 : f32
    %1000 = vector.broadcast %cst_222 : f32 to vector<16x32xf32>
    %1001 = arith.subf %999, %1000 : vector<16x32xf32>
    %cst_223 = arith.constant dense<0.000000e+00> : vector<16x32xf32>
    %1002 = tpu.matmul %1001, %538, %cst_223 {dimension_numbers = #tpu.dot_dimension_numbers<[1], [0], [0], [1], [0, 0, 1, 1], [], []>} : vector<16x32xf32>, vector<32x32xf32>, vector<16x32xf32> -> vector<16x32xf32>
    %1003 = vector.broadcast %539 : vector<1x32xf32> to vector<16x32xf32>
    %1004 = arith.addf %1002, %1003 : vector<16x32xf32>
    %1005 = vector.extract_strided_slice %7 {offsets = [0, 14], sizes = [16, 1], strides = [1, 1]} : vector<16x16xf32> to vector<16x1xf32>
    %1006 = vector.broadcast %1005 : vector<16x1xf32> to vector<16x32xf32>
    %1007 = arith.mulf %1004, %1006 : vector<16x32xf32>
    %1008 = vector.extract_strided_slice %545 {offsets = [14, 0], sizes = [1, 32], strides = [1, 1]} : vector<16x32xf32> to vector<1x32xf32>
    %1009 = vector.broadcast %1008 : vector<1x32xf32> to vector<16x32xf32>
    %1010 = arith.mulf %1007, %1009 : vector<16x32xf32>
    %1011 = arith.addf %980, %1010 : vector<16x32xf32>
    %1012 = vector.extract_strided_slice %6 {offsets = [0, 15], sizes = [16, 1], strides = [1, 1]} : vector<16x16xf32> to vector<16x1xf32>
    %1013 = vector.broadcast %1012 : vector<16x1xf32> to vector<16x16xf32>
    %1014 = vector.broadcast %11 : vector<1x16xf32> to vector<16x16xf32>
    %1015 = arith.subf %1013, %1014 : vector<16x16xf32>
    %1016 = arith.mulf %1015, %1015 : vector<16x16xf32>
    %cst_224 = arith.constant -4.500000e+00 : f32
    %1017 = vector.broadcast %cst_224 : f32 to vector<16x16xf32>
    %1018 = arith.mulf %1017, %1016 : vector<16x16xf32>
    %1019 = math.exp %1018 : vector<16x16xf32>
    %cst_225 = arith.constant dense<0.000000e+00> : vector<16x32xf32>
    %1020 = tpu.matmul %1019, %536, %cst_225 {dimension_numbers = #tpu.dot_dimension_numbers<[1], [0], [0], [1], [0, 0, 1, 1], [], []>} : vector<16x16xf32>, vector<16x32xf32>, vector<16x32xf32> -> vector<16x32xf32>
    %1021 = vector.broadcast %537 : vector<1x32xf32> to vector<16x32xf32>
    %1022 = arith.addf %1020, %1021 : vector<16x32xf32>
    %cst_226 = arith.constant 0.000000e+00 : f32
    %1023 = vector.broadcast %cst_226 : f32 to vector<16x32xf32>
    %1024 = arith.maximumf %1022, %1023 : vector<16x32xf32>
    %1025 = math.absf %1022 : vector<16x32xf32>
    %cst_227 = arith.constant 0.000000e+00 : f32
    %1026 = vector.broadcast %cst_227 : f32 to vector<16x32xf32>
    %1027 = arith.subf %1026, %1025 : vector<16x32xf32>
    %1028 = math.exp %1027 : vector<16x32xf32>
    %1029 = math.log1p %1028 : vector<16x32xf32>
    %1030 = arith.addf %1024, %1029 : vector<16x32xf32>
    %cst_228 = arith.constant 0.693147182 : f32
    %1031 = vector.broadcast %cst_228 : f32 to vector<16x32xf32>
    %1032 = arith.subf %1030, %1031 : vector<16x32xf32>
    %cst_229 = arith.constant dense<0.000000e+00> : vector<16x32xf32>
    %1033 = tpu.matmul %1032, %538, %cst_229 {dimension_numbers = #tpu.dot_dimension_numbers<[1], [0], [0], [1], [0, 0, 1, 1], [], []>} : vector<16x32xf32>, vector<32x32xf32>, vector<16x32xf32> -> vector<16x32xf32>
    %1034 = vector.broadcast %539 : vector<1x32xf32> to vector<16x32xf32>
    %1035 = arith.addf %1033, %1034 : vector<16x32xf32>
    %1036 = vector.extract_strided_slice %7 {offsets = [0, 15], sizes = [16, 1], strides = [1, 1]} : vector<16x16xf32> to vector<16x1xf32>
    %1037 = vector.broadcast %1036 : vector<16x1xf32> to vector<16x32xf32>
    %1038 = arith.mulf %1035, %1037 : vector<16x32xf32>
    %1039 = vector.extract_strided_slice %545 {offsets = [15, 0], sizes = [1, 32], strides = [1, 1]} : vector<16x32xf32> to vector<1x32xf32>
    %1040 = vector.broadcast %1039 : vector<1x32xf32> to vector<16x32xf32>
    %1041 = arith.mulf %1038, %1040 : vector<16x32xf32>
    %1042 = arith.addf %1011, %1041 : vector<16x32xf32>
    %cst_230 = arith.constant dense<0.000000e+00> : vector<16x32xf32>
    %1043 = tpu.matmul %1042, %541, %cst_230 {dimension_numbers = #tpu.dot_dimension_numbers<[1], [0], [0], [1], [0, 0, 1, 1], [], []>} : vector<16x32xf32>, vector<32x32xf32>, vector<16x32xf32> -> vector<16x32xf32>
    %1044 = vector.broadcast %542 : vector<1x32xf32> to vector<16x32xf32>
    %1045 = arith.addf %1043, %1044 : vector<16x32xf32>
    %cst_231 = arith.constant 0.000000e+00 : f32
    %1046 = vector.broadcast %cst_231 : f32 to vector<16x32xf32>
    %1047 = arith.maximumf %1045, %1046 : vector<16x32xf32>
    %1048 = math.absf %1045 : vector<16x32xf32>
    %cst_232 = arith.constant 0.000000e+00 : f32
    %1049 = vector.broadcast %cst_232 : f32 to vector<16x32xf32>
    %1050 = arith.subf %1049, %1048 : vector<16x32xf32>
    %1051 = math.exp %1050 : vector<16x32xf32>
    %1052 = math.log1p %1051 : vector<16x32xf32>
    %1053 = arith.addf %1047, %1052 : vector<16x32xf32>
    %cst_233 = arith.constant 0.693147182 : f32
    %1054 = vector.broadcast %cst_233 : f32 to vector<16x32xf32>
    %1055 = arith.subf %1053, %1054 : vector<16x32xf32>
    %cst_234 = arith.constant dense<0.000000e+00> : vector<16x32xf32>
    %1056 = tpu.matmul %1055, %543, %cst_234 {dimension_numbers = #tpu.dot_dimension_numbers<[1], [0], [0], [1], [0, 0, 1, 1], [], []>} : vector<16x32xf32>, vector<32x32xf32>, vector<16x32xf32> -> vector<16x32xf32>
    %1057 = vector.broadcast %544 : vector<1x32xf32> to vector<16x32xf32>
    %1058 = arith.addf %1056, %1057 : vector<16x32xf32>
    %1059 = arith.addf %535, %1058 : vector<16x32xf32>
    %c296 = arith.constant 296 : index
    %c0_235 = arith.constant 0 : index
    %1060 = vector.load %arg3[%c296, %c0_235] : memref<360x32xf32, #tpu.memory_space<vmem>>, vector<32x32xf32>
    %cst_236 = arith.constant dense<0.000000e+00> : vector<16x32xf32>
    %1061 = tpu.matmul %1059, %1060, %cst_236 {dimension_numbers = #tpu.dot_dimension_numbers<[1], [0], [0], [1], [0, 0, 1, 1], [], []>} : vector<16x32xf32>, vector<32x32xf32>, vector<16x32xf32> -> vector<16x32xf32>
    %c9 = arith.constant 9 : index
    %c0_237 = arith.constant 0 : index
    %1062 = vector.load %arg4[%c9, %c0_237] : memref<16x32xf32, #tpu.memory_space<vmem>>, vector<1x32xf32>
    %1063 = vector.broadcast %1062 : vector<1x32xf32> to vector<16x32xf32>
    %1064 = arith.addf %1061, %1063 : vector<16x32xf32>
    %cst_238 = arith.constant 0.000000e+00 : f32
    %1065 = vector.broadcast %cst_238 : f32 to vector<16x32xf32>
    %1066 = arith.maximumf %1064, %1065 : vector<16x32xf32>
    %1067 = math.absf %1064 : vector<16x32xf32>
    %cst_239 = arith.constant 0.000000e+00 : f32
    %1068 = vector.broadcast %cst_239 : f32 to vector<16x32xf32>
    %1069 = arith.subf %1068, %1067 : vector<16x32xf32>
    %1070 = math.exp %1069 : vector<16x32xf32>
    %1071 = math.log1p %1070 : vector<16x32xf32>
    %1072 = arith.addf %1066, %1071 : vector<16x32xf32>
    %cst_240 = arith.constant 0.693147182 : f32
    %1073 = vector.broadcast %cst_240 : f32 to vector<16x32xf32>
    %1074 = arith.subf %1072, %1073 : vector<16x32xf32>
    %c328 = arith.constant 328 : index
    %c0_241 = arith.constant 0 : index
    %1075 = vector.load %arg3[%c328, %c0_241] : memref<360x32xf32, #tpu.memory_space<vmem>>, vector<32x32xf32>
    %cst_242 = arith.constant dense<0.000000e+00> : vector<16x32xf32>
    %1076 = tpu.matmul %1074, %1075, %cst_242 {dimension_numbers = #tpu.dot_dimension_numbers<[1], [0], [0], [1], [0, 0, 1, 1], [], []>} : vector<16x32xf32>, vector<32x32xf32>, vector<16x32xf32> -> vector<16x32xf32>
    %c10 = arith.constant 10 : index
    %c0_243 = arith.constant 0 : index
    %1077 = vector.load %arg4[%c10, %c0_243] : memref<16x32xf32, #tpu.memory_space<vmem>>, vector<1x32xf32>
    %1078 = vector.broadcast %1077 : vector<1x32xf32> to vector<16x32xf32>
    %1079 = arith.addf %1076, %1078 : vector<16x32xf32>
    %c0_244 = arith.constant 0 : index
    %c0_245 = arith.constant 0 : index
    %1080 = vector.load %arg5[%c0_244, %c0_245] : memref<16x32xf32, #tpu.memory_space<vmem>>, vector<16x32xf32>
    tpu.vector_store %arg5[%c0_244, %c0_245], %1079 {strides = array<i32>} : memref<16x32xf32, #tpu.memory_space<vmem>>, vector<16x32xf32>,
    return
  }
}

</mosaic_0001>

<bundles_post_ra>
// kernel: schnet_forward.1
= control target key start
LH: loop header
LB: loop body
LE: loop exit
PB: predicated region body
PF: predicated region fallthrough
CT: control target
= control target key end

     0   :  { %vm26_vm0 = vcmask 64512   ;;  %v6544_v3 = vmov 1   ;;  %v6545_v4 = vmov 0   ;;  %v6550_v6 = vmov 2   ;;  %s6517_s0 = inlined_call_operand.vmem [shape: f32[16,8], index: 0, kind: input, shape index: {}]   ;;  %s6518_s1 = inlined_call_operand.vmem [shape: f32[16,16], index: 1, kind: input, shape index: {}]   ;;  %s6519_s2 = inlined_call_operand.vmem [shape: f32[16,16], index: 2, kind: input, shape index: {}]   ;;  %s6520_s3 = inlined_call_operand.vmem [shape: f32[360,32], index: 3, kind: input, shape index: {}]   ;;  %s6521_s4 = inlined_call_operand.vmem [shape: f32[16,32], index: 4, kind: input, shape index: {}]   ;;  %s6522_s5 = inlined_call_operand.hbm [shape: f32[16,32], index: 5, kind: output, shape index: {}]  }
   0x1   :  { %v23_v0 = vld [vmem:[%s6520_s3] sm:$0xff]  ;;  %4147 = vset.pattern.permute.xlu1 %v6544_v3  ;;  %4146 = vset.pattern.permute.xlu0 %v6545_v4  ;;  %v22_v5 = vld [vmem:[%s6517_s0 + $0x8] sm:$0xff] }
   0x2   :  { %v4654_v1 = vld [vmem:[%s6518_s1] sm:$0xff]  ;;  %48 = vmatpush.msra.mxu0 %v23_v0  ;;  %4126 = vmatpush.msra.mxu2 %v23_v0 }
   0x3   :  { %v21_v2 = vld [vmem:[%s6517_s0] sm:$0xff]  ;;  %247 = vperm.xlu1 %4147, %v4654_v1   ;;  %118 = vperm.xlu0 %4146, %v4654_v1  }
   0x4   :  { %3910 = vmatmul.msk.f32.vlgmr.msra.gmra.mxu0 %vm26_vm0, %v21_v2  ;;  %4148 = vset.pattern.permute.xlu2 %v6550_v6 }
   0x5   :  { %3911 = vmatmul.msk.f32.vlgmr.msra.gmra.mxu2 %vm26_vm0, %v22_v5  ;;  %370 = vperm.xlu2 %4148, %v4654_v1  }
   0x6   :  { %10 = vsyncpa [#allocation3], 0  ;;  %v4671_v7 = vld [vmem:[%s6518_s1 + $0x8] sm:$0xff]  ;;  %v6552_v8 = vmov 3   ;;  %v6535_v9 = vmov 4   ;;  %v6542_v10 = vmov 5   ;;  %v60_v26 = vlaneseq }
   0x7   :  { %v6546_v11 = vmov 6   ;;  %v6533_v12 = vmov 8   ;;  %v6538_v13 = vmov 7   ;;  %v6540_v14 = vmov 11   ;;  %v75_v20 = vld [vmem:[%s6520_s3 + $0x50] sm:$0xff]  ;;  %v74_v21 = vld [vmem:[%s6520_s3 + $0x48] sm:$0xff] }
   0x8   :  { %v6529_v15 = vmov 9   ;;  %v6525_v16 = vmov 12   ;;  %v6527_v17 = vmov 15   ;;  %v6536_v18 = vmov 10   ;;  %105 = vmatpush.msra.mxu1 %v75_v20  ;;  %v73_v22 = vld [vmem:[%s6520_s3 + $0x40] sm:$0xff]  ;;  %v4733_v23 = vld [vmem:[%s6520_s3 + $0x10] sm:$0xff] }
   0x9   :  { %v6531_v19 = vmov 13   ;;  %v72_v24 = vld [vmem:[%s6520_s3 + $0x38] sm:$0xff]  ;;  %158 = vmatpush.msrb.mxu2 %v4733_v23  ;;  %v4743_v25 = vld [vmem:[%s6520_s3 + $0x8] sm:$0xff]  ;;  %284 = vmatpush.msrb.mxu0 %v4733_v23  ;;  %v6523_v27 = vmov 14   ;;  %v61_v28 = vand.u32 127, %v60_v26  ;;  %vm86_vm1 = vcmask 261120  }
   0xa   :  { %106 = vmatpush.msra.mxu1 %v74_v21  ;;  %v4204_v48 = vld [vmem:[%s6521_s4] ss:$0 sm:$0xff]  ;;  %vm137_vm2 = vcmask 130048   ;;  %s4615_s28 = smov [#allocation2]   ;;  %s3898_s7 = sshll.u32 %s6522_s5, 4  ;;  %s3899_s7 = int_to_ptr.hbm [resolvable:$true] %s3898_s7 }
   0xb   :  { %251 = vperm.xlu1 %4147, %v4671_v7   ;;  %123 = vperm.xlu0 %4146, %v4671_v7   ;;  %v62_v29 = vcvt.s32.f32 %v61_v28  ;;  %s3896_s29 = sshll.u32 %s4615_s28, 4  ;;  %s4616_s8 = smov 128   ;;  %s3897_s29 = int_to_ptr.vmem [resolvable:$true] %s3896_s29 }
   0xc   :  { %107 = vmatpush.msra.mxu1 %v73_v22  ;;  %159 = vmatpush.msrb.mxu2 %v4743_v25  ;;  %s4617_s9 = smov 8  }
   0xd   :  { %4149 = vset.pattern.permute.xlu2 %v6552_v8  ;;  %285 = vmatpush.msrb.mxu0 %v4743_v25  ;;  %v4756_v31 = vmul.f32 0.33333334, %v62_v29 }
   0xe   :  { %493 = vperm.xlu2 %4149, %v4654_v1   ;;  %108 = vmatpush.msra.mxu1 %v72_v24 }
   0xf   :  { %530 = vmatpush.msra.mxu0 %v4733_v23 }
  0x10   :  { %407 = vmatpush.msrb.mxu1 %v4733_v23 }
  0x11   :  { %531 = vmatpush.msra.mxu0 %v4743_v25 }
  0x12   :  { %408 = vmatpush.msrb.mxu1 %v4743_v25 }
  0x13   :  { %4151 = vset.pattern.permute.xlu1 %v6552_v8  ;;  %4150 = vset.pattern.permute.xlu0 %v6550_v6 }
  0x14   :  { %497 = vperm.xlu1 %4151, %v4671_v7   ;;  %374 = vperm.xlu0 %4150, %v4671_v7  }
  0x16   :  { %4152 = vset.pattern.permute.xlu2 %v6535_v9 }
  0x17   :  { %616 = vperm.xlu2 %4152, %v4654_v1  }
  0x1c   :  { %4153 = vset.pattern.permute.xlu1 %v6542_v10  ;;  %4154 = vset.pattern.permute.xlu0 %v6542_v10 }
  0x1d   :  { %739 = vperm.xlu1 %4153, %v4654_v1   ;;  %743 = vperm.xlu0 %4154, %v4671_v7  }
  0x1f   :  { %620 = vperm.xlu2 %4152, %v4671_v7  }
  0x25   :  { %4155 = vset.pattern.permute.xlu1 %v6546_v11  ;;  %4157 = vset.pattern.permute.xlu0 %v6533_v12 }
  0x26   :  { %862 = vperm.xlu1 %4155, %v4654_v1   ;;  %1108 = vperm.xlu0 %4157, %v4654_v1  }
  0x27   :  { %4156 = vset.pattern.permute.xlu2 %v6538_v13 }
  0x28   :  { %985 = vperm.xlu2 %4156, %v4654_v1  }
  0x2e   :  { %866 = vperm.xlu1 %4155, %v4671_v7   ;;  %4161 = vset.pattern.permute.xlu0 %v6540_v14 }
  0x2f   :  { %1477 = vperm.xlu0 %4161, %v4654_v1  }
  0x30   :  { %989 = vperm.xlu2 %4156, %v4671_v7  }
  0x36   :  { %4158 = vset.pattern.permute.xlu1 %v6529_v15 }
  0x37   :  { %1231 = vperm.xlu1 %4158, %v4654_v1   ;;  %4166 = vset.pattern.permute.xlu0 %v6525_v16 }
  0x38   :  { %4159 = vset.pattern.permute.xlu2 %v6533_v12  ;;  %1604 = vperm.xlu0 %4166, %v4671_v7  }
  0x39   :  { %1112 = vperm.xlu2 %4159, %v4671_v7  }
  0x3f   :  { %1235 = vperm.xlu1 %4158, %v4671_v7  }
  0x40   :  { %4170 = vset.pattern.permute.xlu0 %v6527_v17 }
  0x41   :  { %4160 = vset.pattern.permute.xlu2 %v6536_v18  ;;  %1973 = vperm.xlu0 %4170, %v4671_v7  }
  0x42   :  { %1354 = vperm.xlu2 %4160, %v4654_v1  }
  0x47   :  { %4162 = vset.pattern.permute.xlu1 %v6536_v18 }
  0x48   :  { %1358 = vperm.xlu1 %4162, %v4671_v7  }
  0x49   :  { %4175 = vset.pattern.permute.xlu0 %v6535_v9 }
  0x4a   :  { %4163 = vset.pattern.permute.xlu2 %v6540_v14 }
  0x4b   :  { %1481 = vperm.xlu2 %4163, %v4671_v7  }
  0x50   :  { %4164 = vset.pattern.permute.xlu1 %v6525_v16 }
  0x51   :  { %1600 = vperm.xlu1 %4164, %v4654_v1  }
  0x53   :  { %4165 = vset.pattern.permute.xlu2 %v6531_v19 }
  0x54   :  { %1723 = vperm.xlu2 %4165, %v4654_v1  }
  0x59   :  { %4167 = vset.pattern.permute.xlu1 %v6531_v19 }
  0x5a   :  { %1727 = vperm.xlu1 %4167, %v4671_v7  }
  0x5c   :  { %4168 = vset.pattern.permute.xlu2 %v6523_v27 }
  0x5d   :  { %1846 = vperm.xlu2 %4168, %v4654_v1  }
  0x5f   :  { %v371_v30 = vpop.permute.xlu2 %370 }
  0x60   :  { %v377_v41 = vsub.f32 %v371_v30, %v4756_v31 }
  0x62   :  { %4169 = vset.pattern.permute.xlu1 %v6527_v17  ;;  %v379_v49 = vmul.f32 %v377_v41, %v377_v41  ;;  %v5014_v17 = vld [vmem:[%s6519_s2] sm:$0xff] }
  0x63   :  { %1969 = vperm.xlu1 %4169, %v4654_v1   ;;  %724 = vperm.xlu0 %4175, %v5014_v17  }
  0x64   :  { %v381_v57 = vmul.f32 -4.5, %v379_v49 }
  0x65   :  { %1850 = vperm.xlu2 %4168, %v4671_v7  }
  0x66   :  { %v383_v2 = vmul.f32 1.442695, %v381_v57 }
  0x68   :  { %v494_v38 = vpop.permute.xlu2 %493 }
  0x69   :  { %v500_v43 = vsub.f32 %v494_v38, %v4756_v31 }
  0x6b   :  { %4171 = vset.pattern.permute.xlu1 %v6545_v4  ;;  %v502_v52 = vmul.f32 %v500_v43, %v500_v43 }
  0x6c   :  { %231 = vperm.xlu1 %4171, %v5014_v17  }
  0x6d   :  { %4172 = vset.pattern.permute.xlu2 %v6544_v3  ;;  %v504_v61 = vmul.f32 -4.5, %v502_v52 }
  0x6e   :  { %355 = vperm.xlu2 %4172, %v5014_v17  }
  0x6f   :  { %v506_v20 = vmul.f32 1.442695, %v504_v61 }
  0x71   :  { %v617_v0 = vpop.permute.xlu2 %616 }
  0x72   :  { %v623_v29 = vsub.f32 %v617_v0, %v4756_v31 }
  0x74   :  { %4173 = vset.pattern.permute.xlu1 %v6550_v6 }
  0x75   :  { %v248_v32 = vpop.permute.xlu1 %247  ;;  %v119_v34 = vpop.permute.xlu0 %118  ;;  %478 = vperm.xlu1 %4173, %v5014_v17  }
  0x76   :  { %v254_v33 = vsub.f32 %v248_v32, %v4756_v31  ;;  %v126_v35 = vsub.f32 %v119_v34, %v4756_v31  ;;  %4174 = vset.pattern.permute.xlu2 %v6552_v8 }
  0x77   :  { %601 = vperm.xlu2 %4174, %v5014_v17  }
  0x78   :  { %v256_v36 = vmul.f32 %v254_v33, %v254_v33  ;;  %v128_v37 = vmul.f32 %v126_v35, %v126_v35 }
  0x79   :  { %v621_v38 = vpop.permute.xlu2 %620 }
  0x7a   :  { %v258_v39 = vmul.f32 -4.5, %v256_v36  ;;  %v130_v40 = vmul.f32 -4.5, %v128_v37  ;;  %v625_v36 = vmul.f32 %v623_v29, %v623_v29 }
  0x7c   :  { %v260_v42 = vmul.f32 1.442695, %v258_v39  ;;  %v132_v44 = vmul.f32 1.442695, %v130_v40 }
  0x7d   :  { %v252_v45 = vpop.permute.xlu1 %251  ;;  %v124_v47 = vpop.permute.xlu0 %123 }
  0x7e   :  { %4215 = vpow2.f32 %v260_v42  ;;  %v255_v46 = vsub.f32 %v252_v45, %v4756_v31  ;;  %v127_v50 = vsub.f32 %v124_v47, %v4756_v31  ;;  %v627_v45 = vmul.f32 -4.5, %v625_v36 }
  0x7f   :  { %4217 = vpow2.f32 %v132_v44 }
  0x80   :  { %v257_v51 = vmul.f32 %v255_v46, %v255_v46  ;;  %v129_v53 = vmul.f32 %v127_v50, %v127_v50  ;;  %v624_v46 = vsub.f32 %v621_v38, %v4756_v31  ;;  %v629_v49 = vmul.f32 1.442695, %v627_v45 }
  0x81   :  { %v50_v54 = vpop.f32.mrf.mxu0 }
  0x82   :  { %v259_v55 = vmul.f32 -4.5, %v257_v51  ;;  %v4768_v56 = vadd.f32 %v4204_v48, %v50_v54  ;;  %v131_v58 = vmul.f32 -4.5, %v129_v53  ;;  %v626_v50 = vmul.f32 %v624_v46, %v624_v46  ;;  %v986_v51 = vpop.permute.xlu2 %985 }
  0x84   :  { %6576 = vst [vmem:[#allocation5_spill] sm:$0xff] %v4768_v56  ;;  %v4770_v59 = vpop.eup %4215  ;;  %v262_v60 = vmul.f32 1.442695, %v259_v55  ;;  %3912 = vmatmul.msk.f32.vlgmr.msra.gmra.mxu1 %vm86_vm1, %v4768_v56  ;;  %v134_v63 = vmul.f32 1.442695, %v131_v58  ;;  %v628_v58 = vmul.f32 -4.5, %v626_v50 }
  0x85   :  { %6577 = vst [vmem:[#allocation6_spill] sm:$0xff] %v4770_v59  ;;  %v4774_v62 = vpop.eup %4217  ;;  %3920 = vmatmul.msk.f32.vlgmr.msrb.gmra.mxu0 %vm137_vm2, %v4770_v59  ;;  %653 = vmatpush.msra.mxu1 %v4733_v23 }
  0x86   :  { %4219 = vpow2.f32 %v262_v60  ;;  %3914 = vmatmul.msk.f32.vlgmr.msrb.gmra.mxu2 %vm137_vm2, %v4774_v62  ;;  %v498_v1 = vpop.permute.xlu1 %497  ;;  %776 = vmatpush.msrb.mxu0 %v4733_v23  ;;  %v375_v5 = vpop.permute.xlu0 %374  ;;  %v631_v0 = vmul.f32 1.442695, %v628_v58 }
  0x87   :  { %4221 = vpow2.f32 %v134_v63  ;;  %v501_v7 = vsub.f32 %v498_v1, %v4756_v31  ;;  %654 = vmatpush.msra.mxu1 %v4743_v25  ;;  %v378_v21 = vsub.f32 %v375_v5, %v4756_v31  ;;  %v992_v63 = vsub.f32 %v986_v51, %v4756_v31 }
  0x88   :  { %777 = vmatpush.msrb.mxu0 %v4743_v25  ;;  %v53_v22 = vpop.f32.mrf.mxu2  ;;  %4223 = vpow2.f32 %v383_v2 }
  0x89   :  { %v503_v24 = vmul.f32 %v501_v7, %v501_v7  ;;  %v4786_v26 = vadd.f32 %v4204_v48, %v53_v22  ;;  %v380_v28 = vmul.f32 %v378_v21, %v378_v21  ;;  %4225 = vpow2.f32 %v506_v20 }
  0x8a   :  { %v994_v5 = vmul.f32 %v992_v63, %v992_v63  ;;  %v990_v21 = vpop.permute.xlu2 %989 }
  0x8b   :  { %6578 = vst [vmem:[#allocation7_spill] sm:$0xff] %v4786_v26  ;;  %v382_v32 = vmul.f32 -4.5, %v380_v28  ;;  %v505_v33 = vmul.f32 -4.5, %v503_v24 }
  0x8c   :  { %v4789_v30 = vpop.eup %4219  ;;  %3913 = vmatmul.msk.f32.gmra.mxu1 %vm86_vm1, %v4786_v26  ;;  %v996_v29 = vmul.f32 -4.5, %v994_v5 }
  0x8d   :  { %6579 = vst [vmem:[#allocation8_spill] sm:$0xff] %v4789_v30  ;;  %v4793_v34 = vpop.eup %4221  ;;  %3921 = vmatmul.msk.f32.gmra.mxu0 %vm137_vm2, %v4789_v30  ;;  %v385_v35 = vmul.f32 1.442695, %v382_v32  ;;  %v508_v39 = vmul.f32 1.442695, %v505_v33  ;;  %v993_v32 = vsub.f32 %v990_v21, %v4756_v31 }
  0x8e   :  { %3915 = vmatmul.msk.f32.gmra.mxu2 %vm137_vm2, %v4793_v34  ;;  %v4800_v41 = vpop.eup %4223  ;;  %v998_v36 = vmul.f32 1.442695, %v996_v29 }
  0x8f   :  { %v740_v37 = vpop.permute.xlu1 %739  ;;  %v744_v42 = vpop.permute.xlu0 %743  ;;  %4227 = vpow2.f32 %v385_v35 }
  0x90   :  { %v746_v40 = vsub.f32 %v740_v37, %v4756_v31  ;;  %v4802_v43 = vpop.eup %4225  ;;  %4229 = vpow2.f32 %v508_v39  ;;  %v747_v48 = vsub.f32 %v744_v42, %v4756_v31  ;;  %v995_v37 = vmul.f32 %v993_v32, %v993_v32 }
  0x91   :  { %6580 = vst [vmem:[#allocation9_spill] sm:$0xff] %v4802_v43  ;;  %4231 = vpow2.f32 %v629_v49 }
  0x92   :  { %v748_v44 = vmul.f32 %v746_v40, %v746_v40  ;;  %v749_v53 = vmul.f32 %v747_v48, %v747_v48  ;;  %v997_v46 = vmul.f32 -4.5, %v995_v37 }
  0x93   :  { %v1113_v48 = vpop.permute.xlu2 %1112 }
  0x94   :  { %3926 = vmatmul.msk.f32.vlgmr.msrb.gmra.mxu1 %vm137_vm2, %v4800_v41  ;;  %v750_v47 = vmul.f32 -4.5, %v748_v44  ;;  %v751_v61 = vmul.f32 -4.5, %v749_v53  ;;  %v1000_v51 = vmul.f32 1.442695, %v997_v46 }
  0x95   :  { %3932 = vmatmul.msk.f32.vlgmr.msra.gmra.mxu0 %vm137_vm2, %v4802_v43  ;;  %899 = vmatpush.msrb.mxu1 %v4733_v23  ;;  %v4814_v55 = vpop.eup %4227 }
  0x96   :  { %1022 = vmatpush.msra.mxu0 %v4733_v23  ;;  %v752_v52 = vmul.f32 1.442695, %v750_v47  ;;  %v4816_v57 = vpop.eup %4229  ;;  %v754_v2 = vmul.f32 1.442695, %v751_v61  ;;  %v1116_v61 = vsub.f32 %v1113_v48, %v4756_v31 }
  0x97   :  { %900 = vmatpush.msrb.mxu1 %v4743_v25  ;;  %6581 = vst [vmem:[#allocation10_spill] sm:$0xff] %v4816_v57  ;;  %v4824_v20 = vpop.eup %4231 }
  0x98   :  { %v863_v54 = vpop.permute.xlu1 %862  ;;  %1023 = vmatpush.msra.mxu0 %v4743_v25  ;;  %4233 = vpow2.f32 %v752_v52  ;;  %v1109_v38 = vpop.permute.xlu0 %1108 }
  0x99   :  { %v869_v60 = vsub.f32 %v863_v54, %v4756_v31  ;;  %4235 = vpow2.f32 %v631_v0  ;;  %v1115_v45 = vsub.f32 %v1109_v38, %v4756_v31 }
  0x9a   :  { %4237 = vpow2.f32 %v754_v2  ;;  %v1118_v2 = vmul.f32 %v1116_v61, %v1116_v61 }
  0x9b   :  { %v871_v1 = vmul.f32 %v869_v60, %v869_v60  ;;  %v1117_v50 = vmul.f32 %v1115_v45, %v1115_v45 }
  0x9c   :  { %3927 = vmatmul.msk.f32.gmra.mxu1 %vm137_vm2, %v4814_v55  ;;  %v1355_v5 = vpop.permute.xlu2 %1354  ;;  %v1120_v32 = vmul.f32 -4.5, %v1118_v2 }
  0x9d   :  { %3933 = vmatmul.msk.f32.gmra.mxu0 %vm137_vm2, %v4816_v57  ;;  %v873_v24 = vmul.f32 -4.5, %v871_v1  ;;  %v1119_v60 = vmul.f32 -4.5, %v1117_v50 }
  0x9e   :  { %v4826_v22 = vpop.eup %4233  ;;  %v1123_v38 = vmul.f32 1.442695, %v1120_v32 }
  0x9f   :  { %6582 = vst [vmem:[#allocation11_spill] sm:$0xff] %v4826_v22  ;;  %v875_v33 = vmul.f32 1.442695, %v873_v24  ;;  %v4838_v39 = vpop.eup %4235  ;;  %v1121_v1 = vmul.f32 1.442695, %v1119_v60 }
  0xa0   :  { %v867_v7 = vpop.permute.xlu1 %866  ;;  %v4840_v42 = vpop.eup %4237 }
  0xa1   :  { %v870_v28 = vsub.f32 %v867_v7, %v4756_v31  ;;  %6583 = vst [vmem:[#allocation12_spill] sm:$0xff] %v4840_v42  ;;  %4239 = vpow2.f32 %v875_v33  ;;  %v1361_v33 = vsub.f32 %v1355_v5, %v4756_v31 }
  0xa2   :  { %4241 = vpow2.f32 %v998_v36 }
  0xa3   :  { %v872_v35 = vmul.f32 %v870_v28, %v870_v28  ;;  %v1478_v28 = vpop.permute.xlu0 %1477 }
  0xa4   :  { %3938 = vmatmul.msk.f32.vlgmr.msra.gmra.mxu1 %vm137_vm2, %v4824_v20  ;;  %v1484_v36 = vsub.f32 %v1478_v28, %v4756_v31 }
  0xa5   :  { %3944 = vmatmul.msk.f32.vlgmr.msrb.gmra.mxu0 %vm137_vm2, %v4826_v22  ;;  %1145 = vmatpush.msra.mxu1 %v4733_v23  ;;  %v874_v44 = vmul.f32 -4.5, %v872_v35 }
  0xa6   :  { %1268 = vmatpush.msrb.mxu0 %v4733_v23  ;;  %v1486_v46 = vmul.f32 %v1484_v36, %v1484_v36 }
  0xa7   :  { %1146 = vmatpush.msra.mxu1 %v4743_v25  ;;  %v877_v49 = vmul.f32 1.442695, %v874_v44  ;;  %v4848_v53 = vpop.eup %4239  ;;  %v1482_v44 = vpop.permute.xlu2 %1481 }
  0xa8   :  { %1269 = vmatpush.msrb.mxu0 %v4743_v25  ;;  %v4850_v58 = vpop.eup %4241 }
  0xa9   :  { %v1232_v40 = vpop.permute.xlu1 %1231  ;;  %6584 = vst [vmem:[#allocation13_spill] sm:$0xff] %v4850_v58  ;;  %4243 = vpow2.f32 %v877_v49 }
  0xaa   :  { %v1238_v47 = vsub.f32 %v1232_v40, %v4756_v31  ;;  %4245 = vpow2.f32 %v1000_v51  ;;  %v1363_v40 = vmul.f32 %v1361_v33, %v1361_v33  ;;  %v1488_v51 = vmul.f32 -4.5, %v1486_v46 }
  0xab   :  { %4247 = vpow2.f32 %v1121_v1 }
  0xac   :  { %3939 = vmatmul.msk.f32.gmra.mxu1 %vm137_vm2, %v4838_v39  ;;  %v1240_v52 = vmul.f32 %v1238_v47, %v1238_v47  ;;  %v1365_v49 = vmul.f32 -4.5, %v1363_v40  ;;  %v1605_v40 = vpop.permute.xlu0 %1604 }
  0xad   :  { %3945 = vmatmul.msk.f32.gmra.mxu0 %vm137_vm2, %v4840_v42 }
  0xae   :  { %v1242_v63 = vmul.f32 -4.5, %v1240_v52  ;;  %v1485_v52 = vsub.f32 %v1482_v44, %v4756_v31 }
  0xaf   :  { %v4862_v24 = vpop.eup %4243  ;;  %v1724_v2 = vpop.permute.xlu2 %1723 }
  0xb0   :  { %v1244_v7 = vmul.f32 1.442695, %v1242_v63  ;;  %v4864_v29 = vpop.eup %4245  ;;  %v1490_v63 = vmul.f32 1.442695, %v1488_v51  ;;  %v1730_v32 = vsub.f32 %v1724_v2, %v4756_v31 }
  0xb1   :  { %v1236_v54 = vpop.permute.xlu1 %1235  ;;  %6585 = vst [vmem:[#allocation14_spill] sm:$0xff] %v4864_v29  ;;  %v4872_v47 = vpop.eup %4247 }
  0xb2   :  { %v1239_v0 = vsub.f32 %v1236_v54, %v4756_v31  ;;  %4249 = vpow2.f32 %v1244_v7  ;;  %v1367_v54 = vmul.f32 1.442695, %v1365_v49  ;;  %v1608_v49 = vsub.f32 %v1605_v40, %v4756_v31 }
  0xb3   :  { %4251 = vpow2.f32 %v1123_v38  ;;  %v1732_v38 = vmul.f32 %v1730_v32, %v1730_v32 }
  0xb4   :  { %3950 = vmatmul.msk.f32.vlgmr.msrb.gmra.mxu1 %vm137_vm2, %v4848_v53  ;;  %v1241_v21 = vmul.f32 %v1239_v0, %v1239_v0  ;;  %v1487_v0 = vmul.f32 %v1485_v52, %v1485_v52  ;;  %v1974_v40 = vpop.permute.xlu0 %1973 }
  0xb5   :  { %3956 = vmatmul.msk.f32.vlgmr.msra.gmra.mxu0 %vm137_vm2, %v4850_v58  ;;  %1391 = vmatpush.msrb.mxu1 %v4733_v23 }
  0xb6   :  { %1514 = vmatpush.msra.mxu0 %v4733_v23  ;;  %v1243_v35 = vmul.f32 -4.5, %v1241_v21  ;;  %v1489_v28 = vmul.f32 -4.5, %v1487_v0 }
  0xb7   :  { %1392 = vmatpush.msrb.mxu1 %v4743_v25  ;;  %v1847_v52 = vpop.permute.xlu2 %1846 }
  0xb8   :  { %1515 = vmatpush.msra.mxu0 %v4743_v25  ;;  %v1246_v45 = vmul.f32 1.442695, %v1243_v35  ;;  %v4874_v48 = vpop.eup %4249 }
  0xb9   :  { %6586 = vst [vmem:[#allocation15_spill] sm:$0xff] %v4874_v48  ;;  %v4886_v1 = vpop.eup %4251 }
  0xba   :  { %v1359_v37 = vpop.permute.xlu1 %1358  ;;  %4253 = vpow2.f32 %v1246_v45 }
  0xbb   :  { %v1362_v50 = vsub.f32 %v1359_v37, %v4756_v31  ;;  %4255 = vpow2.f32 %v1367_v54  ;;  %v1492_v37 = vmul.f32 1.442695, %v1489_v28  ;;  %v1853_v28 = vsub.f32 %v1847_v52, %v4756_v31 }
  0xbc   :  { %3951 = vmatmul.msk.f32.gmra.mxu1 %vm137_vm2, %v4862_v24  ;;  %4257 = vpow2.f32 %v1490_v63  ;;  %v1977_v52 = vsub.f32 %v1974_v40, %v4756_v31  ;;  %v4964_v40 = vld [vmem:[%s6521_s4 + $0x1] ss:$0 sm:$0xff] }
  0xbd   :  { %3957 = vmatmul.msk.f32.gmra.mxu0 %vm137_vm2, %v4864_v29  ;;  %v1364_v60 = vmul.f32 %v1362_v50, %v1362_v50  ;;  %v1734_v50 = vmul.f32 -4.5, %v1732_v38 }
  0xbf   :  { %v1366_v7 = vmul.f32 -4.5, %v1364_v60  ;;  %v1610_v60 = vmul.f32 %v1608_v49, %v1608_v49 }
  0xc0   :  { %v4888_v5 = vpop.eup %4253 }
  0xc1   :  { %6587 = vst [vmem:[#allocation16_spill] sm:$0xff] %v4888_v5  ;;  %v1369_v33 = vmul.f32 1.442695, %v1366_v7  ;;  %v4896_v44 = vpop.eup %4255 }
  0xc2   :  { %v4898_v45 = vpop.eup %4257 }
  0xc3   :  { %v1601_v61 = vpop.permute.xlu1 %1600  ;;  %6588 = vst [vmem:[#allocation17_spill] sm:$0xff] %v4898_v45  ;;  %4259 = vpow2.f32 %v1369_v33  ;;  %v1855_v33 = vmul.f32 %v1853_v28, %v1853_v28 }
  0xc4   :  { %3962 = vmatmul.msk.f32.vlgmr.msra.gmra.mxu1 %vm137_vm2, %v4872_v47  ;;  %v1607_v21 = vsub.f32 %v1601_v61, %v4756_v31  ;;  %4261 = vpow2.f32 %v1492_v37  ;;  %v1736_v61 = vmul.f32 1.442695, %v1734_v50  ;;  %v1851_v37 = vpop.permute.xlu2 %1850 }
  0xc5   :  { %3968 = vmatmul.msk.f32.vlgmr.msrb.gmra.mxu0 %vm137_vm2, %v4874_v48  ;;  %1637 = vmatpush.msra.mxu1 %v4733_v23  ;;  %v1857_v49 = vmul.f32 -4.5, %v1855_v33  ;;  %v1854_v50 = vsub.f32 %v1851_v37, %v4756_v31  ;;  %v4957_v37 = vld [vmem:[%s6520_s3 + $0x30] sm:$0xff] }
  0xc6   :  { %1760 = vmatpush.msrb.mxu0 %v4733_v23  ;;  %v1609_v35 = vmul.f32 %v1607_v21, %v1607_v21  ;;  %v1612_v21 = vmul.f32 -4.5, %v1610_v60  ;;  %343 = vmatpush.msra.mxu2 %v4957_v37 }
  0xc7   :  { %1638 = vmatpush.msra.mxu1 %v4743_v25  ;;  %v1856_v60 = vmul.f32 %v1854_v50, %v1854_v50  ;;  %218 = vmatpush.msra.mxu3 %v4957_v37 }
  0xc8   :  { %1761 = vmatpush.msrb.mxu0 %v4743_v25  ;;  %v1611_v46 = vmul.f32 -4.5, %v1609_v35 }
  0xc9   :  { %v4910_v0 = vpop.eup %4259  ;;  %v1858_v28 = vmul.f32 -4.5, %v1856_v60  ;;  %v4988_v60 = vld [vmem:[%s6520_s3 + $0x18] sm:$0xff] }
  0xca   :  { %v1613_v54 = vmul.f32 1.442695, %v1611_v46  ;;  %6589 = vst [vmem:[#allocation18_spill] sm:$0xff] %v4910_v0  ;;  %v4912_v7 = vpop.eup %4261 }
  0xcb   :  { %6590 = vst [vmem:[#allocation19_spill] sm:$0xff] %v4912_v7 }
  0xcc   :  { %3963 = vmatmul.msk.f32.gmra.mxu1 %vm137_vm2, %v4886_v1  ;;  %v1728_v36 = vpop.permute.xlu1 %1727  ;;  %4263 = vpow2.f32 %v1613_v54  ;;  %v1859_v54 = vmul.f32 1.442695, %v1857_v49  ;;  %v4969_v49 = vld [vmem:[%s6520_s3 + $0x28] sm:$0xff] }
  0xcd   :  { %3969 = vmatmul.msk.f32.gmra.mxu0 %vm137_vm2, %v4888_v5  ;;  %v1731_v51 = vsub.f32 %v1728_v36, %v4756_v31  ;;  %4265 = vpow2.f32 %v1736_v61  ;;  %344 = vmatpush.msra.mxu2 %v4969_v49 }
  0xce   :  { %219 = vmatpush.msra.mxu3 %v4969_v49 }
  0xcf   :  { %v1733_v63 = vmul.f32 %v1731_v51, %v1731_v51 }
  0xd2   :  { %v4920_v38 = vpop.eup %4263 }
  0xd3   :  { %6591 = vst [vmem:[#allocation20_spill] sm:$0xff] %v4920_v38  ;;  %v4922_v46 = vpop.eup %4265 }
  0xd4   :  { %3974 = vmatmul.msk.f32.vlgmr.msrb.gmra.mxu1 %vm137_vm2, %v4896_v44  ;;  %6592 = vst [vmem:[#allocation21_spill] sm:$0xff] %v4922_v46 }
  0xd5   :  { %3980 = vmatmul.msk.f32.vlgmr.msra.gmra.mxu0 %vm137_vm2, %v4898_v45  ;;  %1883 = vmatpush.msrb.mxu1 %v4733_v23  ;;  %v1970_v2 = vpop.permute.xlu1 %1969 }
  0xd6   :  { %2006 = vmatpush.msra.mxu0 %v4733_v23  ;;  %v1735_v23 = vmul.f32 -4.5, %v1733_v63  ;;  %v1976_v32 = vsub.f32 %v1970_v2, %v4756_v31  ;;  %v1979_v63 = vmul.f32 %v1977_v52, %v1977_v52  ;;  %v1861_v31 = vmul.f32 1.442695, %v1858_v28 }
  0xd7   :  { %1884 = vmatpush.msrb.mxu1 %v4743_v25 }
  0xd8   :  { %2007 = vmatpush.msra.mxu0 %v4743_v25  ;;  %v1615_v25 = vmul.f32 1.442695, %v1612_v21  ;;  %v1738_v35 = vmul.f32 1.442695, %v1735_v23  ;;  %v1978_v36 = vmul.f32 %v1976_v32, %v1976_v32  ;;  %v1981_v23 = vmul.f32 -4.5, %v1979_v63 }
  0xda   :  { %4267 = vpow2.f32 %v1615_v25  ;;  %v1980_v51 = vmul.f32 -4.5, %v1978_v36  ;;  %v1984_v32 = vmul.f32 1.442695, %v1981_v23 }
  0xdb   :  { %4269 = vpow2.f32 %v1738_v35 }
  0xdc   :  { %3975 = vmatmul.msk.f32.gmra.mxu1 %vm137_vm2, %v4910_v0  ;;  %v1982_v61 = vmul.f32 1.442695, %v1980_v51  ;;  %4271 = vpow2.f32 %v1859_v54  ;;  %v4978_v51 = vld [vmem:[%s6520_s3 + $0x20] sm:$0xff] }
  0xdd   :  { %3981 = vmatmul.msk.f32.gmra.mxu0 %vm137_vm2, %v4912_v7  ;;  %345 = vmatpush.msra.mxu2 %v4978_v51 }
  0xde   :  { %4273 = vpow2.f32 %v1982_v61  ;;  %220 = vmatpush.msra.mxu3 %v4978_v51 }
  0xdf   :  { %4275 = vpow2.f32 %v1861_v31  ;;  %346 = vmatpush.msra.mxu2 %v4988_v60 }
  0xe0   :  { %v4930_v2 = vpop.eup %4267  ;;  %4277 = vpow2.f32 %v1984_v32  ;;  %221 = vmatpush.msra.mxu3 %v4988_v60 }
  0xe1   :  { %6593 = vst [vmem:[#allocation22_spill] sm:$0xff] %v4930_v2  ;;  %v4932_v21 = vpop.eup %4269  ;;  %589 = vmatpush.msrb.mxu2 %v4957_v37 }
  0xe2   :  { %6594 = vst [vmem:[#allocation23_spill] sm:$0xff] %v4932_v21  ;;  %v4938_v25 = vpop.eup %4271  ;;  %466 = vmatpush.msrb.mxu3 %v4957_v37 }
  0xe3   :  { %6595 = vst [vmem:[#allocation24_spill] sm:$0xff] %v4938_v25  ;;  %590 = vmatpush.msrb.mxu2 %v4969_v49 }
  0xe4   :  { %3986 = vmatmul.msk.f32.vlgmr.msra.gmra.mxu1 %vm137_vm2, %v4920_v38  ;;  %v4940_v33 = vpop.eup %4273  ;;  %467 = vmatpush.msrb.mxu3 %v4969_v49 }
  0xe5   :  { %3992 = vmatmul.msk.f32.vlgmr.msrb.gmra.mxu0 %vm137_vm2, %v4922_v46  ;;  %6596 = vst [vmem:[#allocation25_spill] sm:$0xff] %v4940_v33  ;;  %v4946_v35 = vpop.eup %4275  ;;  %591 = vmatpush.msrb.mxu2 %v4978_v51  ;;  %v6601_v46 = vmov 0  }
  0xe6   :  { %6597 = vst [vmem:[#allocation26_spill] sm:$0xff] %v4946_v35  ;;  %v4948_v36 = vpop.eup %4277  ;;  %468 = vmatpush.msrb.mxu3 %v4978_v51  ;;  %4176 = vset.pattern.permute.xlu1 %v6601_v46 }
  0xe7   :  { %6598 = vst [vmem:[#allocation27_spill] sm:$0xff] %v4948_v36  ;;  %592 = vmatpush.msrb.mxu2 %v4988_v60 }
  0xe8   :  { %469 = vmatpush.msrb.mxu3 %v4988_v60 }
  0xec   :  { %3987 = vmatmul.msk.f32.gmra.mxu1 %vm137_vm2, %v4930_v2 }
  0xed   :  { %3993 = vmatmul.msk.f32.gmra.mxu0 %vm137_vm2, %v4932_v21 }
  0xf4   :  { %3998 = vmatmul.msk.f32.vlgmr.msrb.gmra.mxu1 %vm137_vm2, %v4938_v25 }
  0xf5   :  { %4004 = vmatmul.msk.f32.vlgmr.msra.gmra.mxu0 %vm137_vm2, %v4940_v33 }
  0xfc   :  { %3999 = vmatmul.msk.f32.gmra.mxu1 %vm137_vm2, %v4946_v35 }
  0xfd   :  { %4005 = vmatmul.msk.f32.gmra.mxu0 %vm137_vm2, %v4948_v36  ;;  %v6600_v36 = vmov 6  }
  0xfe   :  { %4180 = vset.pattern.permute.xlu0 %v6600_v36 }
  0xff   :  { %970 = vperm.xlu0 %4180, %v5014_v17  }
 0x101   :  { %v4973_v50 = vpop.f32.mrf.mxu1 }
 0x102   :  { %v287_v52 = vpop.f32.mrf.mxu0 }
 0x103   :  { %v4983_v54 = vadd.f32 %v4964_v40, %v287_v52 }
 0x105   :  { %v295_v61 = vand.u32 2147483647, %v4983_v54 }
 0x107   :  { %v297_v63 = vsub.f32 0.0, %v295_v61 }
 0x109   :  { %v299_v28 = vmul.f32 1.442695, %v297_v63  ;;  %v4997_v23 = vpop.f32.mrf.mxu1  ;;  %v161_v31 = vpop.f32.mrf.mxu2 }
 0x10a   :  { %6599 = vst [vmem:[#allocation28_spill] sm:$0xff] %v4997_v23  ;;  %v5002_v32 = vadd.f32 %v4964_v40, %v161_v31  ;;  %v290_v52 = vpop.f32.mrf.mxu0 }
 0x10b   :  { %4279 = vpow2.f32 %v299_v28  ;;  %v5005_v27 = vadd.f32 %v4964_v40, %v290_v52 }
 0x10c   :  { %v169_v61 = vand.u32 2147483647, %v5002_v32 }
 0x10d   :  { %v296_v63 = vand.u32 2147483647, %v5005_v27 }
 0x10e   :  { %v171_v16 = vsub.f32 0.0, %v169_v61 }
 0x10f   :  { %v298_v31 = vsub.f32 0.0, %v296_v63 }
 0x110   :  { %v173_v28 = vmul.f32 1.442695, %v171_v16 }
 0x111   :  { %v4280_v52 = vpop.eup %4279  ;;  %v301_v15 = vmul.f32 1.442695, %v298_v31  ;;  %v164_v19 = vpop.f32.mrf.mxu2 }
 0x112   :  { %v410_v12 = vpop.f32.mrf.mxu1  ;;  %v303_v9 = vadd.f32 1.0, %v4280_v52  ;;  %v306_v18 = vmul.f32 -0.5, %v4280_v52  ;;  %4281 = vpow2.f32 %v173_v28  ;;  %v533_v61 = vpop.f32.mrf.mxu0  ;;  %v5020_v13 = vadd.f32 %v4964_v40, %v164_v19 }
 0x113   :  { %4283 = vpow2.f32 %v301_v15  ;;  %v5023_v63 = vadd.f32 %v4964_v40, %v410_v12  ;;  %v5026_v14 = vadd.f32 %v4964_v40, %v533_v61  ;;  %v309_v3 = vand.u32 2147483647, %v4280_v52 }
 0x114   :  { %4285 = vlog2.f32 %v303_v9  ;;  %v307_v16 = vadd.f32 1.0, %v306_v18  ;;  %v170_v31 = vand.u32 2147483647, %v5020_v13 }
 0x115   :  { %v418_v10 = vand.u32 2147483647, %v5023_v63  ;;  %v541_v28 = vand.u32 2147483647, %v5026_v14  ;;  %vm310_vm3 = vcmp.lt.f32.partialorder %v309_v3, 0.0004427343 }
 0x116   :  { %v172_v4 = vsub.f32 0.0, %v170_v31  ;;  %v308_v18 = vmul.f32 %v4280_v52, %v307_v16 }
 0x117   :  { %v420_v15 = vsub.f32 0.0, %v418_v10  ;;  %v543_v19 = vsub.f32 0.0, %v541_v28 }
 0x118   :  { %v4282_v12 = vpop.eup %4281  ;;  %v175_v61 = vmul.f32 1.442695, %v172_v4  ;;  %v293_v4 = vmax.f32 %v4983_v54, 0.0 }
 0x119   :  { %v5035_v9 = vpop.eup %4283  ;;  %v422_v11 = vmul.f32 1.442695, %v420_v15  ;;  %v545_v10 = vmul.f32 1.442695, %v543_v19  ;;  %v177_v56 = vadd.f32 1.0, %v4282_v12  ;;  %v180_v3 = vmul.f32 -0.5, %v4282_v12 }
 0x11a   :  { %v413_v26 = vpop.f32.mrf.mxu1  ;;  %v4286_v31 = vpop.eup %4285  ;;  %4287 = vpow2.f32 %v175_v61  ;;  %v312_v33 = vadd.f32 1.0, %v5035_v9  ;;  %v315_v21 = vmul.f32 -0.5, %v5035_v9 }
 0x11b   :  { %v536_v6 = vpop.f32.mrf.mxu0  ;;  %v305_v28 = vmul.f32 0.6931472, %v4286_v31  ;;  %4289 = vpow2.f32 %v422_v11  ;;  %v5045_v52 = vadd.f32 %v4964_v40, %v413_v26  ;;  %v183_v31 = vand.u32 2147483647, %v4282_v12 }
 0x11c   :  { %v5040_v8 = vadd.f32 %v4964_v40, %v536_v6  ;;  %4291 = vpow2.f32 %v545_v10  ;;  %v6602_v11 = vmov 1   ;;  %v316_v5 = vadd.f32 1.0, %v315_v21 }
 0x11d   :  { %v311_v16 = vsel %vm310_vm3, %v308_v18, %v305_v28  ;;  %4293 = vlog2.f32 %v177_v56  ;;  %v419_v6 = vand.u32 2147483647, %v5045_v52  ;;  %4177 = vset.pattern.permute.xlu2 %v6602_v11  ;;  %v181_v18 = vadd.f32 1.0, %v180_v3 }
 0x11e   :  { %v321_v15 = vadd.f32 %v311_v16, %v293_v4  ;;  %v542_v19 = vand.u32 2147483647, %v5040_v8  ;;  %4295 = vlog2.f32 %v312_v33  ;;  %v318_v4 = vand.u32 2147483647, %v5035_v9 }
 0x11f   :  { %v6603_v16 = vmov 5   ;;  %v294_v11 = vmax.f32 %v5005_v27, 0.0  ;;  %vm5065_vm4 = vcmp.lt.f32.partialorder %v183_v31, 0.0004427343  ;;  %v421_v45 = vsub.f32 0.0, %v419_v6 }
 0x120   :  { %v3922_v61 = vadd.f32 -0.6931472, %v321_v15  ;;  %v5052_v26 = vpop.eup %4287  ;;  %v544_v28 = vsub.f32 0.0, %v542_v19  ;;  %4185 = vset.pattern.permute.xlu0 %v6603_v16  ;;  %v167_v15 = vmax.f32 %v5002_v32, 0.0  ;;  %v182_v32 = vmul.f32 %v4282_v12, %v181_v18 }
 0x121   :  { %v5054_v10 = vpop.eup %4289  ;;  %v186_v27 = vadd.f32 1.0, %v5052_v26  ;;  %vm5076_vm5 = vcmp.lt.f32.partialorder %v318_v4, 0.0004427343  ;;  %v317_v57 = vmul.f32 %v5035_v9, %v316_v5 }
 0x122   :  { %v656_v54 = vpop.f32.mrf.mxu1  ;;  %3924 = vmatmul.msk.f32.vlgmr.msra.gmra.mxu2 %vm86_vm1, %v3922_v61  ;;  %v4292_v46 = vpop.eup %4291  ;;  %v426_v3 = vadd.f32 1.0, %v5054_v10  ;;  %v547_v31 = vmul.f32 1.442695, %v544_v28  ;;  %v189_v28 = vmul.f32 -0.5, %v5052_v26 }
 0x123   :  { %v5057_v56 = vadd.f32 %v4964_v40, %v656_v54  ;;  %v779_v33 = vpop.f32.mrf.mxu0  ;;  %835 = vmatpush.msra.mxu2 %v4957_v37  ;;  %v4294_v19 = vpop.eup %4293  ;;  %v549_v61 = vadd.f32 1.0, %v4292_v46  ;;  %v552_v54 = vmul.f32 -0.5, %v4292_v46  ;;  %v555_v12 = vand.u32 2147483647, %v4292_v46 }
 0x124   :  { %v4296_v48 = vpop.eup %4295  ;;  %4297 = vlog2.f32 %v426_v3  ;;  %v5074_v58 = vadd.f32 %v4964_v40, %v779_v33  ;;  %v179_v22 = vmul.f32 0.6931472, %v4294_v19  ;;  %v429_v33 = vmul.f32 -0.5, %v5054_v10 }
 0x125   :  { %v664_v29 = vand.u32 2147483647, %v5057_v56  ;;  %836 = vmatpush.msra.mxu2 %v4969_v49  ;;  %4299 = vlog2.f32 %v549_v61  ;;  %v553_v6 = vadd.f32 1.0, %v552_v54  ;;  %v314_v3 = vmul.f32 0.6931472, %v4296_v48 }
 0x126   :  { %v787_v18 = vand.u32 2147483647, %v5074_v58  ;;  %v185_v4 = vsel %vm5065_vm4, %v182_v32, %v179_v22  ;;  %4301 = vlog2.f32 %v186_v27  ;;  %v424_v54 = vmul.f32 1.442695, %v421_v45 }
 0x127   :  { %v666_v21 = vsub.f32 0.0, %v664_v29  ;;  %837 = vmatpush.msra.mxu2 %v4978_v51  ;;  %v5090_v29 = vld [vmem:[%s6519_s2 + $0x8] sm:$0xff]  ;;  %4303 = vpow2.f32 %v547_v31  ;;  %v195_v5 = vadd.f32 %v185_v4, %v167_v15  ;;  %v320_v9 = vsel %vm5076_vm5, %v317_v57, %v314_v3 }
 0x128   :  { %v789_v48 = vsub.f32 0.0, %v787_v18  ;;  %236 = vperm.xlu1 %4176, %v5090_v29   ;;  %359 = vperm.xlu2 %4177, %v5090_v29   ;;  %v554_v7 = vmul.f32 %v4292_v46, %v553_v6  ;;  %v322_v32 = vadd.f32 %v320_v9, %v294_v11  ;;  %vm5098_vm6 = vcmp.lt.f32.partialorder %v555_v12, 0.0004427343 }
 0x129   :  { %v668_v61 = vmul.f32 1.442695, %v666_v21  ;;  %838 = vmatpush.msra.mxu2 %v4988_v60  ;;  %851 = vperm.xlu0 %4185, %v5090_v29   ;;  %v3916_v42 = vadd.f32 -0.6931472, %v195_v5  ;;  %v190_v3 = vadd.f32 1.0, %v189_v28  ;;  %v430_v18 = vadd.f32 1.0, %v429_v33 }
 0x12a   :  { %v659_v43 = vpop.f32.mrf.mxu1  ;;  %v4298_v22 = vpop.eup %4297  ;;  %v791_v15 = vmul.f32 1.442695, %v789_v48  ;;  %v539_v46 = vmax.f32 %v5026_v14, 0.0  ;;  %v3923_v45 = vadd.f32 -0.6931472, %v322_v32  ;;  %v662_v30 = vmax.f32 %v5057_v56, 0.0 }
 0x12b   :  { %v782_v19 = vpop.f32.mrf.mxu0  ;;  %4305 = vpow2.f32 %v668_v61  ;;  %v4300_v27 = vpop.eup %4299  ;;  %3918 = vmatmul.msk.f32.vlgmr.msra.gmra.mxu3 %vm86_vm1, %v3916_v42  ;;  %v432_v6 = vand.u32 2147483647, %v5054_v10  ;;  %v5111_v61 = vadd.f32 %v4964_v40, %v659_v43  ;;  %v192_v4 = vand.u32 2147483647, %v5052_v26 }
 0x12c   :  { %v551_v57 = vmul.f32 0.6931472, %v4300_v27  ;;  %v5103_v21 = vadd.f32 %v4964_v40, %v782_v19  ;;  %4307 = vpow2.f32 %v791_v15  ;;  %v4302_v11 = vpop.eup %4301  ;;  %712 = vmatpush.msra.mxu3 %v4957_v37  ;;  %v428_v14 = vmul.f32 0.6931472, %v4298_v22  ;;  %3925 = vmatmul.msk.f32.gmra.mxu2 %vm86_vm1, %v3923_v45 }
 0x12d   :  { %v5115_v28 = vpop.eup %4303  ;;  %4309 = vpow2.f32 %v424_v54  ;;  %v188_v48 = vmul.f32 0.6931472, %v4302_v11  ;;  %v191_v19 = vmul.f32 %v5052_v26, %v190_v3  ;;  %v431_v32 = vmul.f32 %v5054_v10, %v430_v18 }
 0x12e   :  { %v557_v12 = vsel %vm5098_vm6, %v554_v7, %v551_v57  ;;  %v788_v9 = vand.u32 2147483647, %v5103_v21  ;;  %713 = vmatpush.msra.mxu3 %v4969_v49  ;;  %v168_v7 = vmax.f32 %v5020_v13, 0.0  ;;  %vm193_vm7 = vcmp.lt.f32.partialorder %v192_v4, 0.0004427343 }
 0x12f   :  { %v567_v33 = vadd.f32 %v557_v12, %v539_v46  ;;  %v6610_v27 = vmov 2   ;;  %vm5128_vm8 = vcmp.lt.f32.partialorder %v432_v6, 0.0004427343  ;;  %v665_v26 = vand.u32 2147483647, %v5111_v61 }
 0x130   :  { %4178 = vset.pattern.permute.xlu1 %v6603_v16  ;;  %4179 = vset.pattern.permute.xlu2 %v6610_v27  ;;  %v194_v15 = vsel %vm193_vm7, %v191_v19, %v188_v48  ;;  %v434_v10 = vsel %vm5128_vm8, %v431_v32, %v428_v14  ;;  %v558_v3 = vadd.f32 1.0, %v5115_v28  ;;  %v6613_v18 = vmov 11  }
 0x131   :  { %v5118_v5 = vpop.eup %4305  ;;  %714 = vmatpush.msra.mxu3 %v4978_v51  ;;  %847 = vperm.xlu1 %4178, %v5014_v17   ;;  %v3934_v16 = vadd.f32 -0.6931472, %v567_v33  ;;  %v196_v57 = vadd.f32 %v194_v15, %v168_v7  ;;  %v416_v46 = vmax.f32 %v5023_v63, 0.0  ;;  %v790_v6 = vsub.f32 0.0, %v788_v9 }
 0x132   :  { %v902_v43 = vpop.f32.mrf.mxu1  ;;  %v672_v22 = vadd.f32 1.0, %v5118_v5  ;;  %v5138_v13 = vpop.eup %4307  ;;  %482 = vperm.xlu2 %4179, %v5090_v29   ;;  %4190 = vset.pattern.permute.xlu0 %v6613_v18  ;;  %v667_v48 = vsub.f32 0.0, %v665_v26  ;;  %v675_v19 = vmul.f32 -0.5, %v5118_v5 }
 0x133   :  { %v1025_v54 = vpop.f32.mrf.mxu0  ;;  %v5134_v42 = vadd.f32 %v4964_v40, %v902_v43  ;;  %v795_v45 = vadd.f32 1.0, %v5138_v13  ;;  %v798_v11 = vmul.f32 -0.5, %v5138_v13  ;;  %715 = vmatpush.msra.mxu3 %v4988_v60  ;;  %1585 = vperm.xlu0 %4190, %v5014_v17   ;;  %v5150_v12 = vpop.eup %4309  ;;  %v3917_v4 = vadd.f32 -0.6931472, %v196_v57 }
 0x134   :  { %4311 = vlog2.f32 %v672_v22  ;;  %v444_v33 = vadd.f32 %v434_v10, %v416_v46  ;;  %v5154_v63 = vadd.f32 %v4964_v40, %v1025_v54  ;;  %3936 = vmatmul.msk.f32.vlgmr.msrb.gmra.mxu2 %vm86_vm1, %v3934_v16  ;;  %v561_v43 = vmul.f32 -0.5, %v5115_v28 }
 0x135   :  { %v910_v14 = vand.u32 2147483647, %v5134_v42  ;;  %4313 = vlog2.f32 %v795_v45  ;;  %3919 = vmatmul.msk.f32.gmra.mxu3 %vm86_vm1, %v3917_v4  ;;  %v799_v7 = vadd.f32 1.0, %v798_v11  ;;  %v793_v32 = vmul.f32 1.442695, %v790_v6  ;;  %1081 = vmatpush.msrb.mxu2 %v4957_v37 }
 0x136   :  { %4315 = vlog2.f32 %v558_v3  ;;  %v1033_v22 = vand.u32 2147483647, %v5154_v63  ;;  %v435_v31 = vadd.f32 1.0, %v5150_v12  ;;  %v562_v15 = vadd.f32 1.0, %v561_v43 }
 0x137   :  { %v912_v9 = vsub.f32 0.0, %v910_v14  ;;  %v564_v10 = vand.u32 2147483647, %v5115_v28  ;;  %v3928_v16 = vadd.f32 -0.6931472, %v444_v33  ;;  %v6614_v45 = vmov 3   ;;  %1082 = vmatpush.msrb.mxu2 %v4969_v49 }
 0x138   :  { %v670_v3 = vmul.f32 1.442695, %v667_v48  ;;  %v1035_v46 = vsub.f32 0.0, %v1033_v22  ;;  %4317 = vlog2.f32 %v435_v31  ;;  %v676_v6 = vadd.f32 1.0, %v675_v19 }
 0x139   :  { %v914_v26 = vmul.f32 1.442695, %v912_v9  ;;  %4181 = vset.pattern.permute.xlu1 %v6614_v45  ;;  %v678_v4 = vand.u32 2147483647, %v5118_v5  ;;  %v801_v14 = vand.u32 2147483647, %v5138_v13  ;;  %v800_v48 = vmul.f32 %v5138_v13, %v799_v7  ;;  %1083 = vmatpush.msrb.mxu2 %v4978_v51 }
 0x13a   :  { %v905_v27 = vpop.f32.mrf.mxu1  ;;  %v4312_v11 = vpop.eup %4311  ;;  %605 = vperm.xlu1 %4181, %v5090_v29   ;;  %v6615_v43 = vmov 7   ;;  %4319 = vpow2.f32 %v793_v32  ;;  %v1037_v22 = vmul.f32 1.442695, %v1035_v46  ;;  %vm5181_vm9 = vcmp.lt.f32.partialorder %v564_v10, 0.0004427343 }
 0x13b   :  { %v1028_v57 = vpop.f32.mrf.mxu0  ;;  %4182 = vset.pattern.permute.xlu2 %v6615_v43  ;;  %v4314_v33 = vpop.eup %4313  ;;  %v5176_v31 = vadd.f32 %v4964_v40, %v905_v27  ;;  %4321 = vpow2.f32 %v914_v26  ;;  %v438_v54 = vmul.f32 -0.5, %v5150_v12  ;;  %v6618_v13 = vmov 10   ;;  %1084 = vmatpush.msrb.mxu2 %v4988_v60 }
 0x13c   :  { %v5170_v9 = vadd.f32 %v4964_v40, %v1028_v57  ;;  %1093 = vperm.xlu2 %4182, %v5014_v17   ;;  %v4316_v19 = vpop.eup %4315  ;;  %v563_v57 = vmul.f32 %v5115_v28, %v562_v15  ;;  %4195 = vset.pattern.permute.xlu0 %v6618_v13  ;;  %v797_v7 = vmul.f32 0.6931472, %v4314_v33  ;;  %4323 = vpow2.f32 %v1037_v22 }
 0x13d   :  { %v560_v32 = vmul.f32 0.6931472, %v4316_v19  ;;  %v441_v27 = vand.u32 2147483647, %v5150_v12  ;;  %1466 = vperm.xlu0 %4195, %v5090_v29   ;;  %v540_v26 = vmax.f32 %v5040_v8, 0.0  ;;  %3930 = vmatmul.msk.f32.vlgmr.msrb.gmra.mxu3 %vm86_vm1, %v3928_v16  ;;  %v439_v10 = vadd.f32 1.0, %v438_v54 }
 0x13e   :  { %vm5191_vm10 = vcmp.lt.f32.partialorder %v801_v14, 0.0004427343  ;;  %v1034_v15 = vand.u32 2147483647, %v5170_v9  ;;  %v4318_v46 = vpop.eup %4317  ;;  %v674_v33 = vmul.f32 0.6931472, %v4312_v11  ;;  %v677_v22 = vmul.f32 %v5118_v5, %v676_v6  ;;  %958 = vmatpush.msrb.mxu3 %v4957_v37 }
 0x13f   :  { %v566_v19 = vsel %vm5181_vm9, %v563_v57, %v560_v32  ;;  %vm5200_vm11 = vcmp.lt.f32.partialorder %v441_v27, 0.0004427343  ;;  %vm5205_vm12 = vcmp.lt.f32.partialorder %v678_v4, 0.0004427343  ;;  %v437_v54 = vmul.f32 0.6931472, %v4318_v46 }
 0x140   :  { %v568_v16 = vadd.f32 %v566_v19, %v540_v26  ;;  %v440_v11 = vmul.f32 %v5150_v12, %v439_v10  ;;  %v5210_v5 = vpop.eup %4319  ;;  %v785_v6 = vmax.f32 %v5074_v58, 0.0  ;;  %v803_v57 = vsel %vm5191_vm10, %v800_v48, %v797_v7  ;;  %959 = vmatpush.msrb.mxu3 %v4969_v49 }
 0x141   :  { %4325 = vpow2.f32 %v670_v3  ;;  %v911_v45 = vand.u32 2147483647, %v5176_v31  ;;  %v5217_v4 = vpop.eup %4321  ;;  %v1036_v27 = vsub.f32 0.0, %v1034_v15  ;;  %v6625_v10 = vmov 4  }
 0x142   :  { %v1148_v8 = vpop.f32.mrf.mxu1  ;;  %v3935_v32 = vadd.f32 -0.6931472, %v568_v16  ;;  %v443_v12 = vsel %vm5200_vm11, %v440_v11, %v437_v54  ;;  %4183 = vset.pattern.permute.xlu1 %v6625_v10  ;;  %v5225_v58 = vpop.eup %4323  ;;  %v680_v3 = vsel %vm5205_vm12, %v677_v22, %v674_v33  ;;  %v6626_v48 = vmax.f32 %v5045_v52, 0.0  ;;  %960 = vmatpush.msrb.mxu3 %v4978_v51 }
 0x143   :  { %v1271_v59 = vpop.f32.mrf.mxu0  ;;  %v5222_v26 = vadd.f32 %v4964_v40, %v1148_v8  ;;  %728 = vperm.xlu1 %4183, %v5090_v29   ;;  %v813_v28 = vadd.f32 %v803_v57, %v785_v6  ;;  %v1041_v15 = vadd.f32 1.0, %v5225_v58  ;;  %v6627_v46 = vmov 8  }
 0x144   :  { %v445_v7 = vadd.f32 %v443_v12, %v6626_v48  ;;  %3937 = vmatmul.msk.f32.gmra.mxu2 %vm86_vm1, %v3935_v32  ;;  %4184 = vset.pattern.permute.xlu2 %v6627_v46  ;;  %v918_v19 = vadd.f32 1.0, %v5217_v4  ;;  %v5240_v52 = vadd.f32 %v4964_v40, %v1271_v59  ;;  %v690_v56 = vadd.f32 %v680_v3, %v662_v30 }
 0x145   :  { %v1156_v33 = vand.u32 2147483647, %v5222_v26  ;;  %961 = vmatpush.msrb.mxu3 %v4988_v60  ;;  %1216 = vperm.xlu2 %4184, %v5014_v17   ;;  %v913_v22 = vsub.f32 0.0, %v911_v45  ;;  %v1039_v14 = vmul.f32 1.442695, %v1036_v27  ;;  %v804_v16 = vadd.f32 1.0, %v5210_v5 }
 0x146   :  { %v3929_v8 = vadd.f32 -0.6931472, %v445_v7  ;;  %v6628_v54 = vmov 13   ;;  %4327 = vlog2.f32 %v1041_v15  ;;  %v1279_v59 = vand.u32 2147483647, %v5240_v52 }
 0x147   :  { %4200 = vset.pattern.permute.xlu0 %v6628_v54  ;;  %v5246_v11 = vpop.eup %4325  ;;  %v1158_v6 = vsub.f32 0.0, %v1156_v33  ;;  %v807_v32 = vmul.f32 -0.5, %v5210_v5  ;;  %v3946_v12 = vadd.f32 -0.6931472, %v813_v28  ;;  %v921_v45 = vmul.f32 -0.5, %v5217_v4 }
 0x148   :  { %3931 = vmatmul.msk.f32.gmra.mxu3 %vm86_vm1, %v3929_v8  ;;  %1835 = vperm.xlu0 %4200, %v5090_v29   ;;  %v1044_v27 = vmul.f32 -0.5, %v5225_v58  ;;  %4329 = vlog2.f32 %v804_v16  ;;  %v1281_v48 = vsub.f32 0.0, %v1279_v59  ;;  %v810_v30 = vand.u32 2147483647, %v5210_v5 }
 0x149   :  { %4331 = vlog2.f32 %v918_v19  ;;  %v1160_v3 = vmul.f32 1.442695, %v1158_v6  ;;  %v808_v7 = vadd.f32 1.0, %v807_v32  ;;  %v681_v15 = vadd.f32 1.0, %v5246_v11 }
 0x14a   :  { %v1151_v57 = vpop.f32.mrf.mxu1  ;;  %4333 = vpow2.f32 %v1039_v14  ;;  %v1283_v8 = vmul.f32 1.442695, %v1281_v48  ;;  %v6629_v33 = vmov 9   ;;  %v3940_v35 = vadd.f32 -0.6931472, %v690_v56 }
 0x14b   :  { %v1274_v10 = vpop.f32.mrf.mxu0  ;;  %4186 = vset.pattern.permute.xlu1 %v6629_v33  ;;  %v1045_v28 = vadd.f32 1.0, %v1044_v27  ;;  %v916_v25 = vmul.f32 1.442695, %v913_v22  ;;  %4335 = vpow2.f32 %v1160_v3  ;;  %v922_v16 = vadd.f32 1.0, %v921_v45 }
 0x14c   :  { %3948 = vmatmul.msk.f32.vlgmr.msra.gmra.mxu2 %vm86_vm1, %v3946_v12  ;;  %1339 = vperm.xlu1 %4186, %v5014_v17   ;;  %v4328_v19 = vpop.eup %4327  ;;  %v1047_v6 = vand.u32 2147483647, %v5225_v58  ;;  %4337 = vpow2.f32 %v1283_v8  ;;  %v809_v59 = vmul.f32 %v5210_v5, %v808_v7  ;;  %vm5263_vm13 = vcmp.lt.f32.partialorder %v810_v30, 0.0004427343 }
 0x14d   :  { %1327 = vmatpush.msra.mxu2 %v4957_v37  ;;  %4187 = vset.pattern.permute.xlu2 %v6600_v36  ;;  %v5268_v22 = vadd.f32 %v4964_v40, %v1274_v10  ;;  %4339 = vlog2.f32 %v681_v15  ;;  %v684_v32 = vmul.f32 -0.5, %v5246_v11  ;;  %v924_v45 = vand.u32 2147483647, %v5217_v4 }
 0x14e   :  { %v4330_v14 = vpop.eup %4329  ;;  %974 = vperm.xlu2 %4187, %v5090_v29   ;;  %v786_v3 = vmax.f32 %v5103_v21, 0.0  ;;  %v1043_v10 = vmul.f32 0.6931472, %v4328_v19  ;;  %v1046_v48 = vmul.f32 %v5225_v58, %v1045_v28  ;;  %4341 = vpow2.f32 %v916_v25 }
 0x14f   :  { %v4332_v12 = vpop.eup %4331  ;;  %v806_v36 = vmul.f32 0.6931472, %v4330_v14  ;;  %1328 = vmatpush.msra.mxu2 %v4969_v49  ;;  %v6632_v30 = vmov 15   ;;  %vm5282_vm14 = vcmp.lt.f32.partialorder %v1047_v6, 0.0004427343  ;;  %v923_v19 = vmul.f32 %v5217_v4, %v922_v16 }
 0x150   :  { %3942 = vmatmul.msk.f32.vlgmr.msra.gmra.mxu3 %vm86_vm1, %v3940_v35  ;;  %4203 = vset.pattern.permute.xlu0 %v6632_v30  ;;  %v5280_v15 = vpop.eup %4333  ;;  %v5287_v35 = vadd.f32 %v4964_v40, %v1151_v57  ;;  %v920_v28 = vmul.f32 0.6931472, %v4332_v12  ;;  %v1280_v6 = vand.u32 2147483647, %v5268_v22  ;;  %v685_v14 = vadd.f32 1.0, %v684_v32 }
 0x151   :  { %1204 = vmatpush.msra.mxu3 %v4957_v37  ;;  %v812_v21 = vsel %vm5263_vm13, %v809_v59, %v806_v36  ;;  %1329 = vmatpush.msra.mxu2 %v4978_v51  ;;  %v5295_v25 = vpop.eup %4335  ;;  %vm5302_vm15 = vcmp.lt.f32.partialorder %v924_v45, 0.0004427343  ;;  %v687_v36 = vand.u32 2147483647, %v5246_v11  ;;  %v908_v4 = vmax.f32 %v5134_v42, 0.0 }
 0x152   :  { %v1394_v27 = vpop.f32.mrf.mxu1  ;;  %v5300_v57 = vpop.eup %4337  ;;  %v814_v59 = vadd.f32 %v812_v21, %v786_v3  ;;  %v1049_v16 = vsel %vm5282_vm14, %v1046_v48, %v1043_v10  ;;  %v1031_v3 = vmax.f32 %v5154_v63, 0.0  ;;  %v1157_v21 = vand.u32 2147483647, %v5287_v35 }
 0x153   :  { %v1517_v7 = vpop.f32.mrf.mxu0  ;;  %v5292_v58 = vadd.f32 %v4964_v40, %v1394_v27  ;;  %1205 = vmatpush.msra.mxu3 %v4969_v49  ;;  %1330 = vmatpush.msra.mxu2 %v4988_v60  ;;  %v4340_v12 = vpop.eup %4339  ;;  %v1287_v32 = vadd.f32 1.0, %v5300_v57  ;;  %v926_v10 = vsel %vm5302_vm15, %v923_v19, %v920_v28  ;;  %v1282_v48 = vsub.f32 0.0, %v1280_v6 }
 0x154   :  { %v5314_v45 = vadd.f32 %v4964_v40, %v1517_v7  ;;  %4188 = vset.pattern.permute.xlu1 %v6618_v13  ;;  %v3947_v5 = vadd.f32 -0.6931472, %v814_v59  ;;  %v5321_v42 = vpop.eup %4341  ;;  %v683_v7 = vmul.f32 0.6931472, %v4340_v12  ;;  %v686_v8 = vmul.f32 %v5246_v11, %v685_v14 }
 0x155   :  { %v1402_v27 = vand.u32 2147483647, %v5292_v58  ;;  %1206 = vmatpush.msra.mxu3 %v4978_v51  ;;  %1462 = vperm.xlu1 %4188, %v5014_v17   ;;  %v1059_v63 = vadd.f32 %v1049_v16, %v1031_v3  ;;  %v1164_v13 = vadd.f32 1.0, %v5295_v25  ;;  %vm688_vm0 = vcmp.lt.f32.partialorder %v687_v36, 0.0004427343 }
 0x156   :  { %4189 = vset.pattern.permute.xlu2 %v6615_v43  ;;  %3949 = vmatmul.msk.f32.gmra.mxu2 %vm86_vm1, %v3947_v5  ;;  %4343 = vlog2.f32 %v1287_v32  ;;  %v1290_v28 = vmul.f32 -0.5, %v5300_v57  ;;  %v689_v11 = vsel %vm688_vm0, %v686_v8, %v683_v7  ;;  %v1525_v19 = vand.u32 2147483647, %v5314_v45 }
 0x157   :  { %v1404_v23 = vsub.f32 0.0, %v1402_v27  ;;  %1207 = vmatpush.msra.mxu3 %v4988_v60  ;;  %v1050_v27 = vadd.f32 1.0, %v5280_v15  ;;  %1097 = vperm.xlu2 %4189, %v5090_v29   ;;  %v6637_v14 = vmax.f32 %v5111_v61, 0.0  ;;  %v1053_v36 = vmul.f32 -0.5, %v5280_v15 }
 0x158   :  { %v1159_v12 = vsub.f32 0.0, %v1157_v21  ;;  %v1285_v16 = vmul.f32 1.442695, %v1282_v48  ;;  %v1527_v3 = vsub.f32 0.0, %v1525_v19  ;;  %v936_v2 = vadd.f32 %v926_v10, %v908_v4 }
 0x159   :  { %v691_v56 = vadd.f32 %v689_v11, %v6637_v14  ;;  %v1406_v5 = vmul.f32 1.442695, %v1404_v23  ;;  %4345 = vlog2.f32 %v1050_v27  ;;  %v3958_v32 = vadd.f32 -0.6931472, %v1059_v63 }
 0x15a   :  { %v5330_v59 = vpop.f32.mrf.mxu1  ;;  %v1167_v38 = vmul.f32 -0.5, %v5295_v25  ;;  %4347 = vlog2.f32 %v1164_v13  ;;  %v1291_v8 = vadd.f32 1.0, %v1290_v28  ;;  %v1529_v0 = vmul.f32 1.442695, %v1527_v3 }
 0x15b   :  { %v1520_v6 = vpop.f32.mrf.mxu0  ;;  %v3941_v7 = vadd.f32 -0.6931472, %v691_v56  ;;  %v927_v43 = vadd.f32 1.0, %v5321_v42  ;;  %v1032_v61 = vmax.f32 %v5170_v9, 0.0  ;;  %4349 = vpow2.f32 %v1406_v5 }
 0x15c   :  { %v1054_v23 = vadd.f32 1.0, %v1053_v36  ;;  %v5345_v21 = vadd.f32 %v4964_v40, %v1520_v6  ;;  %v4344_v4 = vpop.eup %4343  ;;  %v1154_v10 = vmax.f32 %v5222_v26, 0.0  ;;  %v1293_v48 = vand.u32 2147483647, %v5300_v57 }
 0x15d   :  { %3943 = vmatmul.msk.f32.gmra.mxu3 %vm86_vm1, %v3941_v7  ;;  %4191 = vset.pattern.permute.xlu1 %v6627_v46  ;;  %4351 = vpow2.f32 %v1529_v0  ;;  %v1056_v63 = vand.u32 2147483647, %v5280_v15  ;;  %v1170_v9 = vand.u32 2147483647, %v5295_v25  ;;  %v1162_v13 = vmul.f32 1.442695, %v1159_v12 }
 0x15e   :  { %1220 = vperm.xlu1 %4191, %v5090_v29   ;;  %3960 = vmatmul.msk.f32.vlgmr.msrb.gmra.mxu2 %vm86_vm1, %v3958_v32  ;;  %4353 = vlog2.f32 %v927_v43  ;;  %v930_v27 = vmul.f32 -0.5, %v5321_v42  ;;  %v6638_v46 = vmov 12   ;;  %v3952_v19 = vadd.f32 -0.6931472, %v936_v2 }
 0x15f   :  { %4192 = vset.pattern.permute.xlu2 %v6638_v46  ;;  %v4346_v11 = vpop.eup %4345  ;;  %v1168_v6 = vadd.f32 1.0, %v1167_v38  ;;  %v1292_v0 = vmul.f32 %v5300_v57, %v1291_v8  ;;  %4355 = vpow2.f32 %v1285_v16  ;;  %1573 = vmatpush.msrb.mxu2 %v4957_v37  ;;  %v1289_v56 = vmul.f32 0.6931472, %v4344_v4 }
 0x160   :  { %1708 = vperm.xlu2 %4192, %v5014_v17   ;;  %v1052_v5 = vmul.f32 0.6931472, %v4346_v11  ;;  %v1055_v43 = vmul.f32 %v5280_v15, %v1054_v23  ;;  %v1526_v36 = vand.u32 2147483647, %v5345_v21  ;;  %v4348_v12 = vpop.eup %4347  ;;  %v1277_v3 = vmax.f32 %v5240_v52, 0.0 }
 0x161   :  { %vm5362_vm3 = vcmp.lt.f32.partialorder %v1293_v48, 0.0004427343  ;;  %vm1057_vm4 = vcmp.lt.f32.partialorder %v1056_v63, 0.0004427343  ;;  %v931_v38 = vadd.f32 1.0, %v930_v27  ;;  %1574 = vmatpush.msrb.mxu2 %v4969_v49  ;;  %v5367_v57 = vpop.eup %4349  ;;  %4357 = vpow2.f32 %v1162_v13 }
 0x162   :  { %v1640_v28 = vpop.f32.mrf.mxu1  ;;  %vm5369_vm5 = vcmp.lt.f32.partialorder %v1170_v9, 0.0004427343  ;;  %v1058_v15 = vsel %vm1057_vm4, %v1055_v43, %v1052_v5  ;;  %v933_v32 = vand.u32 2147483647, %v5321_v42  ;;  %v5377_v52 = vmul.f32 %v5295_v25, %v1168_v6 }
 0x163   :  { %v1763_v14 = vpop.f32.mrf.mxu0  ;;  %v5374_v7 = vpop.eup %4351  ;;  %v5381_v8 = vadd.f32 %v4964_v40, %v5330_v59  ;;  %v1060_v23 = vadd.f32 %v1058_v15, %v1032_v61  ;;  %v5384_v4 = vadd.f32 %v4964_v40, %v1640_v28  ;;  %1575 = vmatpush.msrb.mxu2 %v4978_v51  ;;  %v1166_v63 = vmul.f32 0.6931472, %v4348_v12 }
 0x164   :  { %v4354_v48 = vpop.eup %4353  ;;  %v1295_v9 = vsel %vm5362_vm3, %v1292_v0, %v1289_v56  ;;  %v1533_v13 = vadd.f32 1.0, %v5374_v7  ;;  %v1528_v25 = vsub.f32 0.0, %v1526_v36  ;;  %v932_v61 = vmul.f32 %v5321_v42, %v931_v38  ;;  %v5422_v38 = vld [vmem:[%s6520_s3 + $0x20] sm:$0xff] }
 0x165   :  { %3954 = vmatmul.msk.f32.vlgmr.msrb.gmra.mxu3 %vm86_vm1, %v3952_v19  ;;  %v5391_v27 = vpop.eup %4355  ;;  %v3959_v59 = vadd.f32 -0.6931472, %v1060_v23  ;;  %v929_v11 = vmul.f32 0.6931472, %v4354_v48  ;;  %v5395_v28 = vadd.f32 %v4964_v40, %v1763_v14  ;;  %1576 = vmatpush.msrb.mxu2 %v4988_v60  ;;  %v1410_v51 = vadd.f32 1.0, %v5367_v57  ;;  %v5430_v23 = vld [vmem:[%s6520_s3 + $0x18] sm:$0xff] }
 0x166   :  { %1450 = vmatpush.msrb.mxu3 %v4957_v37  ;;  %4359 = vlog2.f32 %v1533_v13  ;;  %vm934_vm6 = vcmp.lt.f32.partialorder %v933_v32, 0.0004427343  ;;  %v1648_v19 = vand.u32 2147483647, %v5384_v4  ;;  %4193 = vset.pattern.permute.xlu1 %v6629_v33  ;;  %v1305_v0 = vadd.f32 %v1295_v9, %v1277_v3  ;;  %v5438_v9 = vld [vmem:[%s6521_s4 + $0x1] ss:$0 sm:$0xff] }
 0x167   :  { %v1536_v56 = vmul.f32 -0.5, %v5374_v7  ;;  %3961 = vmatmul.msk.f32.gmra.mxu2 %vm86_vm1, %v3959_v59  ;;  %v935_v40 = vsel %vm934_vm6, %v932_v61, %v929_v11  ;;  %v1771_v42 = vand.u32 2147483647, %v5395_v28  ;;  %v5406_v60 = vpop.eup %4357  ;;  %v1155_v14 = vmax.f32 %v5287_v35, 0.0  ;;  %1343 = vperm.xlu1 %4193, %v5090_v29  }
 0x168   :  { %1451 = vmatpush.msrb.mxu3 %v4969_v49  ;;  %v1403_v5 = vand.u32 2147483647, %v5381_v8  ;;  %v1531_v43 = vmul.f32 1.442695, %v1528_v25  ;;  %v6643_v33 = vmax.f32 %v5176_v31, 0.0  ;;  %4194 = vset.pattern.permute.xlu2 %v6628_v54  ;;  %v1172_v12 = vsel %vm5369_vm5, %v5377_v52, %v1166_v63 }
 0x169   :  { %v1278_v49 = vmax.f32 %v5268_v22, 0.0  ;;  %v1773_v3 = vsub.f32 0.0, %v1771_v42  ;;  %v1296_v2 = vadd.f32 1.0, %v5391_v27  ;;  %1831 = vperm.xlu2 %4194, %v5014_v17   ;;  %4361 = vlog2.f32 %v1410_v51 }
 0x16a   :  { %v1643_v6 = vpop.f32.mrf.mxu1  ;;  %v937_v36 = vadd.f32 %v935_v40, %v6643_v33  ;;  %1452 = vmatpush.msrb.mxu3 %v5422_v38  ;;  %v1650_v54 = vsub.f32 0.0, %v1648_v19  ;;  %v1299_v16 = vmul.f32 -0.5, %v5391_v27  ;;  %v3970_v15 = vadd.f32 -0.6931472, %v1305_v0 }
 0x16b   :  { %v1766_v37 = vpop.f32.mrf.mxu0  ;;  %v1537_v32 = vadd.f32 1.0, %v1536_v56  ;;  %v1775_v52 = vmul.f32 1.442695, %v1773_v3  ;;  %4363 = vlog2.f32 %v1296_v2  ;;  %v1539_v63 = vand.u32 2147483647, %v5374_v7 }
 0x16c   :  { %v3953_v31 = vadd.f32 -0.6931472, %v937_v36  ;;  %1453 = vmatpush.msrb.mxu3 %v5430_v23  ;;  %v4360_v48 = vpop.eup %4359  ;;  %v1405_v17 = vsub.f32 0.0, %v1403_v5  ;;  %4365 = vpow2.f32 %v1531_v43  ;;  %v5441_v13 = vadd.f32 %v5438_v9, %v1766_v37 }
 0x16d   :  { %v1182_v25 = vadd.f32 %v1172_v12, %v1154_v10  ;;  %v1400_v59 = vmax.f32 %v5292_v58, 0.0  ;;  %v1413_v11 = vmul.f32 -0.5, %v5367_v57  ;;  %4367 = vpow2.f32 %v1775_v52 }
 0x16e   :  { %3955 = vmatmul.msk.f32.gmra.mxu3 %vm86_vm1, %v3953_v31  ;;  %v1652_v61 = vmul.f32 1.442695, %v1650_v54  ;;  %v5448_v51 = vadd.f32 %v5438_v9, %v1643_v6  ;;  %v1300_v19 = vadd.f32 1.0, %v1299_v16  ;;  %v1302_v0 = vand.u32 2147483647, %v5391_v27  ;;  %v4563_v54 = vld [vmem:[%s6519_s2] sm:$0xff] }
 0x16f   :  { %v1535_v56 = vmul.f32 0.6931472, %v4360_v48  ;;  %v1538_v40 = vmul.f32 %v5374_v7, %v1537_v32  ;;  %3972 = vmatmul.msk.f32.vlgmr.msra.gmra.mxu2 %vm86_vm1, %v3970_v15  ;;  %v1772_v26 = vand.u32 2147483647, %v5441_v13  ;;  %v1173_v10 = vadd.f32 1.0, %v5406_v60  ;;  %v4362_v37 = vpop.eup %4361  ;;  %v5464_v7 = vld [vmem:[%s6520_s3 + $0x30] sm:$0xff] }
 0x170   :  { %v1523_v5 = vmax.f32 %v5314_v45, 0.0  ;;  %vm5456_vm7 = vcmp.lt.f32.partialorder %v1539_v63, 0.0004427343  ;;  %v1408_v6 = vmul.f32 1.442695, %v1405_v17  ;;  %v1176_v33 = vmul.f32 -0.5, %v5406_v60  ;;  %1819 = vmatpush.msra.mxu2 %v5464_v7 }
 0x171   :  { %v6646_v12 = vmov 14   ;;  %v4364_v3 = vpop.eup %4363  ;;  %v3964_v2 = vadd.f32 -0.6931472, %v1182_v25  ;;  %v1414_v45 = vadd.f32 1.0, %v1413_v11  ;;  %v1416_v31 = vand.u32 2147483647, %v5367_v57  ;;  %4197 = vset.pattern.permute.xlu2 %v6613_v18 }
 0x172   :  { %v1886_v36 = vpop.f32.mrf.mxu1  ;;  %4196 = vset.pattern.permute.xlu1 %v6646_v12  ;;  %4369 = vlog2.f32 %v1173_v10  ;;  %v5473_v16 = vpop.eup %4365  ;;  %v1649_v15 = vand.u32 2147483647, %v5448_v51  ;;  %v1298_v32 = vmul.f32 0.6931472, %v4364_v3  ;;  %v1301_v52 = vmul.f32 %v5391_v27, %v1300_v19  ;;  %v5480_v48 = vld [vmem:[%s6520_s3 + $0x28] sm:$0xff]  ;;  %1589 = vperm.xlu2 %4197, %v5090_v29  }
 0x173   :  { %v2009_v42 = vpop.f32.mrf.mxu0  ;;  %1954 = vperm.xlu1 %4196, %v4563_v54   ;;  %4371 = vpow2.f32 %v1652_v61  ;;  %1820 = vmatpush.msra.mxu2 %v5480_v48  ;;  %v5484_v63 = vpop.eup %4367  ;;  %v1541_v18 = vsel %vm5456_vm7, %v1538_v40, %v1535_v56  ;;  %vm1303_vm8 = vcmp.lt.f32.partialorder %v1302_v0, 0.0004427343  ;;  %v1774_v17 = vsub.f32 0.0, %v1772_v26 }
 0x174   :  { %v1179_v25 = vand.u32 2147483647, %v5406_v60  ;;  %v1779_v27 = vadd.f32 1.0, %v5484_v63  ;;  %v1304_v11 = vsel %vm1303_vm8, %v1301_v52, %v1298_v32  ;;  %v1177_v61 = vadd.f32 1.0, %v1176_v33 }
 0x175   :  { %v5492_v19 = vadd.f32 %v5438_v9, %v1886_v36  ;;  %1821 = vmatpush.msra.mxu2 %v5422_v38  ;;  %vm5495_vm9 = vcmp.lt.f32.partialorder %v1416_v31, 0.0004427343  ;;  %v1306_v0 = vadd.f32 %v1304_v11, %v1278_v49  ;;  %v5502_v56 = vadd.f32 %v5438_v9, %v2009_v42 }
 0x176   :  { %3966 = vmatmul.msk.f32.vlgmr.msra.gmra.mxu3 %vm86_vm1, %v3964_v2  ;;  %v1542_v40 = vadd.f32 1.0, %v5473_v16  ;;  %v1412_v26 = vmul.f32 0.6931472, %v4362_v37  ;;  %v1415_v43 = vmul.f32 %v5367_v57, %v1414_v45  ;;  %v1551_v33 = vadd.f32 %v1541_v18, %v1523_v5 }
 0x177   :  { %1696 = vmatpush.msra.mxu3 %v5464_v7  ;;  %v1651_v36 = vsub.f32 0.0, %v1649_v15  ;;  %1822 = vmatpush.msra.mxu2 %v5430_v23  ;;  %4373 = vpow2.f32 %v1408_v6  ;;  %v3971_v2 = vadd.f32 -0.6931472, %v1306_v0  ;;  %v1777_v31 = vmul.f32 1.442695, %v1774_v17 }
 0x178   :  { %v4370_v3 = vpop.eup %4369  ;;  %vm5508_vm10 = vcmp.lt.f32.partialorder %v1179_v25, 0.0004427343  ;;  %4375 = vlog2.f32 %v1779_v27  ;;  %v1178_v57 = vmul.f32 %v5406_v60, %v1177_v61  ;;  %v1894_v37 = vand.u32 2147483647, %v5492_v19 }
 0x179   :  { %1697 = vmatpush.msra.mxu3 %v5480_v48  ;;  %v5513_v49 = vpop.eup %4371  ;;  %v1175_v42 = vmul.f32 0.6931472, %v4370_v3  ;;  %v1782_v5 = vmul.f32 -0.5, %v5484_v63  ;;  %3973 = vmatmul.msk.f32.gmra.mxu2 %vm86_vm1, %v3971_v2  ;;  %v2017_v6 = vand.u32 2147483647, %v5502_v56  ;;  %4377 = vlog2.f32 %v1542_v40 }
 0x17a   :  { %v1545_v45 = vmul.f32 -0.5, %v5473_v16  ;;  %v1418_v32 = vsel %vm5495_vm9, %v1415_v43, %v1412_v26  ;;  %v3982_v52 = vadd.f32 -0.6931472, %v1551_v33  ;;  %v1654_v18 = vmul.f32 1.442695, %v1651_v36  ;;  %v1889_v17 = vpop.f32.mrf.mxu1  ;;  %4199 = vset.pattern.permute.xlu2 %v6638_v46 }
 0x17b   :  { %v2012_v15 = vpop.f32.mrf.mxu0  ;;  %1698 = vmatpush.msra.mxu3 %v5422_v38  ;;  %v1181_v60 = vsel %vm5508_vm10, %v1178_v57, %v1175_v42  ;;  %4198 = vset.pattern.permute.xlu1 %v6632_v30  ;;  %v1656_v25 = vadd.f32 1.0, %v5513_v49  ;;  %v2019_v11 = vsub.f32 0.0, %v2017_v6  ;;  %v1548_v61 = vand.u32 2147483647, %v5473_v16 }
 0x17c   :  { %v1183_v27 = vadd.f32 %v1181_v60, %v1155_v14  ;;  %2077 = vperm.xlu1 %4198, %v4563_v54   ;;  %4379 = vpow2.f32 %v1777_v31  ;;  %v1896_v10 = vsub.f32 0.0, %v1894_v37  ;;  %v1546_v0 = vadd.f32 1.0, %v1545_v45  ;;  %1712 = vperm.xlu2 %4199, %v5090_v29   ;;  %v4565_v60 = vld [vmem:[%s6519_s2 + $0x8] sm:$0xff] }
 0x17d   :  { %1699 = vmatpush.msra.mxu3 %v5430_v23  ;;  %v5534_v40 = vadd.f32 %v5438_v9, %v2012_v15  ;;  %v5537_v46 = vpop.eup %4373  ;;  %v1783_v26 = vadd.f32 1.0, %v1782_v5  ;;  %v2021_v35 = vmul.f32 1.442695, %v2019_v11  ;;  %v5540_v14 = vadd.f32 %v5438_v9, %v1889_v17 }
 0x17e   :  { %v3965_v43 = vadd.f32 -0.6931472, %v1183_v27  ;;  %v4376_v33 = vpop.eup %4375  ;;  %v1524_v36 = vmax.f32 %v5345_v21, 0.0  ;;  %4381 = vpow2.f32 %v1654_v18  ;;  %v1428_v3 = vadd.f32 %v1418_v32, %v1400_v59 }
 0x17f   :  { %v4378_v54 = vpop.eup %4377  ;;  %v1785_v2 = vand.u32 2147483647, %v5484_v63  ;;  %4383 = vpow2.f32 %v2021_v35  ;;  %vm5547_vm11 = vcmp.lt.f32.partialorder %v1548_v61, 0.0004427343  ;;  %v1898_v31 = vmul.f32 1.442695, %v1896_v10 }
 0x180   :  { %3967 = vmatmul.msk.f32.gmra.mxu3 %vm86_vm1, %v3965_v43  ;;  %v1544_v9 = vmul.f32 0.6931472, %v4378_v54  ;;  %v1547_v22 = vmul.f32 %v5473_v16, %v1546_v0  ;;  %v2018_v21 = vand.u32 2147483647, %v5534_v40  ;;  %4385 = vlog2.f32 %v1656_v25 }
 0x181   :  { %v1784_v42 = vmul.f32 %v5484_v63, %v1783_v26  ;;  %3984 = vmatmul.msk.f32.vlgmr.msrb.gmra.mxu2 %vm86_vm1, %v3982_v52  ;;  %v1895_v58 = vand.u32 2147483647, %v5540_v14  ;;  %v1419_v59 = vadd.f32 1.0, %v5537_v46  ;;  %v1781_v37 = vmul.f32 0.6931472, %v4376_v33 }
 0x182   :  { %v5557_v57 = vpop.eup %4379  ;;  %v1550_v5 = vsel %vm5547_vm11, %v1547_v22, %v1544_v9  ;;  %v2020_v6 = vsub.f32 0.0, %v2018_v21  ;;  %v1422_v16 = vmul.f32 -0.5, %v5537_v46  ;;  %2065 = vmatpush.msrb.mxu2 %v5464_v7  ;;  %v1659_v45 = vmul.f32 -0.5, %v5513_v49 }
 0x183   :  { %vm5564_vm12 = vcmp.lt.f32.partialorder %v1785_v2, 0.0004427343  ;;  %v1552_v15 = vadd.f32 %v1550_v5, %v1524_v36  ;;  %4387 = vlog2.f32 %v1419_v59  ;;  %v3976_v52 = vadd.f32 -0.6931472, %v1428_v3 }
 0x184   :  { %4201 = vset.pattern.permute.xlu1 %v6646_v12  ;;  %v5569_v32 = vpop.eup %4381  ;;  %4389 = vpow2.f32 %v1898_v31  ;;  %v2023_v18 = vmul.f32 1.442695, %v2020_v6  ;;  %2066 = vmatpush.msrb.mxu2 %v5480_v48  ;;  %v1897_v25 = vsub.f32 0.0, %v1895_v58  ;;  %v1425_v11 = vand.u32 2147483647, %v5537_v46 }
 0x185   :  { %1958 = vperm.xlu1 %4201, %v4565_v60   ;;  %v5575_v17 = vpop.eup %4383  ;;  %v3983_v27 = vadd.f32 -0.6931472, %v1552_v15  ;;  %v1788_v12 = vadd.f32 1.0, %v5557_v57  ;;  %4202 = vset.pattern.permute.xlu2 %v6632_v30  ;;  %v1787_v61 = vsel %vm5564_vm12, %v1784_v42, %v1781_v37  ;;  %v1423_v0 = vadd.f32 1.0, %v1422_v16 }
 0x186   :  { %v2025_v10 = vadd.f32 1.0, %v5575_v17  ;;  %4391 = vpow2.f32 %v2023_v18  ;;  %2067 = vmatpush.msrb.mxu2 %v5422_v38  ;;  %2081 = vperm.xlu2 %4202, %v4565_v60   ;;  %v4386_v26 = vpop.eup %4385  ;;  %v1660_v43 = vadd.f32 1.0, %v1659_v45  ;;  %v1769_v35 = vmax.f32 %v5395_v28, 0.0  ;;  %v5625_v60 = vld [vmem:[%s6520_s3 + $0xa0] sm:$0xff] }
 0x187   :  { %v1662_v33 = vand.u32 2147483647, %v5513_v49  ;;  %v1791_v30 = vmul.f32 -0.5, %v5557_v57  ;;  %vm5591_vm13 = vcmp.lt.f32.partialorder %v1425_v11, 0.0004427343  ;;  %v1665_v28 = vadd.f32 1.0, %v5569_v32 }
 0x188   :  { %3978 = vmatmul.msk.f32.vlgmr.msrb.gmra.mxu3 %vm86_vm1, %v3976_v52  ;;  %4393 = vlog2.f32 %v2025_v10  ;;  %2068 = vmatpush.msrb.mxu2 %v5430_v23  ;;  %v1797_v54 = vadd.f32 %v1787_v61, %v1769_v35  ;;  %v2028_v29 = vmul.f32 -0.5, %v5575_v17  ;;  %v1424_v9 = vmul.f32 %v5537_v46, %v1423_v0 }
 0x189   :  { %1942 = vmatpush.msrb.mxu3 %v5464_v7  ;;  %v4388_v36 = vpop.eup %4387  ;;  %3985 = vmatmul.msk.f32.gmra.mxu2 %vm86_vm1, %v3983_v27  ;;  %4395 = vlog2.f32 %v1788_v12  ;;  %v1900_v7 = vmul.f32 1.442695, %v1897_v25  ;;  %v1401_v22 = vmax.f32 %v5381_v8, 0.0  ;;  %v1661_v21 = vmul.f32 %v5513_v49, %v1660_v43 }
 0x18a   :  { %v5596_v2 = vpop.eup %4389  ;;  %v1421_v31 = vmul.f32 0.6931472, %v4388_v36  ;;  %v1794_v42 = vand.u32 2147483647, %v5557_v57  ;;  %4397 = vlog2.f32 %v1665_v28  ;;  %v1658_v59 = vmul.f32 0.6931472, %v4386_v26 }
 0x18b   :  { %1943 = vmatpush.msrb.mxu3 %v5480_v48  ;;  %v1792_v5 = vadd.f32 1.0, %v1791_v30  ;;  %v1668_v6 = vmul.f32 -0.5, %v5569_v32  ;;  %vm5610_vm14 = vcmp.lt.f32.partialorder %v1662_v33, 0.0004427343  ;;  %v3994_v8 = vadd.f32 -0.6931472, %v1797_v54 }
 0x18c   :  { %v5604_v58 = vpop.eup %4391  ;;  %v1427_v37 = vsel %vm5591_vm13, %v1424_v9, %v1421_v31  ;;  %v2029_v45 = vadd.f32 1.0, %v2028_v29  ;;  %v2031_v63 = vand.u32 2147483647, %v5575_v17  ;;  %4399 = vpow2.f32 %v1900_v7  ;;  %v5638_v26 = vld [vmem:[%s6520_s3 + $0x98] sm:$0xff] }
 0x18d   :  { %1944 = vmatpush.msrb.mxu3 %v5422_v38  ;;  %v1429_v49 = vadd.f32 %v1427_v37, %v1401_v22  ;;  %v2034_v46 = vadd.f32 1.0, %v5604_v58  ;;  %v1902_v52 = vadd.f32 1.0, %v5596_v2  ;;  %vm5618_vm15 = vcmp.lt.f32.partialorder %v1794_v42, 0.0004427343 }
 0x18e   :  { %v4394_v16 = vpop.eup %4393  ;;  %v1664_v25 = vsel %vm5610_vm14, %v1661_v21, %v1658_v59  ;;  %v1793_v11 = vmul.f32 %v5557_v57, %v1792_v5  ;;  %v1646_v61 = vmax.f32 %v5384_v4, 0.0  ;;  %v1770_v10 = vmax.f32 %v5441_v13, 0.0 }
 0x18f   :  { %1945 = vmatpush.msrb.mxu3 %v5430_v23  ;;  %v4396_v15 = vpop.eup %4395  ;;  %v3977_v18 = vadd.f32 -0.6931472, %v1429_v49  ;;  %v1669_v23 = vadd.f32 1.0, %v1668_v6  ;;  %v1671_v0 = vand.u32 2147483647, %v5569_v32  ;;  %4401 = vlog2.f32 %v2034_v46 }
 0x190   :  { %v1790_v27 = vmul.f32 0.6931472, %v4396_v15  ;;  %v4398_v12 = vpop.eup %4397  ;;  %v2027_v43 = vmul.f32 0.6931472, %v4394_v16  ;;  %v2030_v57 = vmul.f32 %v5575_v17, %v2029_v45  ;;  %v2037_v13 = vmul.f32 -0.5, %v5604_v58 }
 0x191   :  { %3979 = vmatmul.msk.f32.gmra.mxu3 %vm86_vm1, %v3977_v18  ;;  %3996 = vmatmul.msk.f32.vlgmr.msra.gmra.mxu2 %vm86_vm1, %v3994_v8  ;;  %v1674_v35 = vadd.f32 %v1664_v25, %v1646_v61  ;;  %4403 = vlog2.f32 %v1902_v52  ;;  %vm5645_vm0 = vcmp.lt.f32.partialorder %v2031_v63, 0.0004427343  ;;  %v1905_v54 = vmul.f32 -0.5, %v5596_v2 }
 0x192   :  { %v1796_v4 = vsel %vm5618_vm15, %v1793_v11, %v1790_v27  ;;  %2251 = vmatpush.msra.mxu2 %v5625_v60  ;;  %v4400_v36 = vpop.eup %4399  ;;  %v1667_v3 = vmul.f32 0.6931472, %v4398_v12  ;;  %v1670_v17 = vmul.f32 %v5569_v32, %v1669_v23  ;;  %vm5652_vm3 = vcmp.lt.f32.partialorder %v1671_v0, 0.0004427343 }
 0x193   :  { %v1798_v30 = vadd.f32 %v1796_v4, %v1770_v10  ;;  %v2033_v7 = vsel %vm5645_vm0, %v2030_v57, %v2027_v43  ;;  %v2038_v31 = vadd.f32 1.0, %v2037_v13  ;;  %v3988_v22 = vadd.f32 -0.6931472, %v1674_v35 }
 0x194   :  { %2252 = vmatpush.msra.mxu2 %v5638_v26  ;;  %v2015_v21 = vmax.f32 %v5502_v56, 0.0  ;;  %v2040_v42 = vand.u32 2147483647, %v5604_v58  ;;  %v1911_v59 = vadd.f32 1.0, %v4400_v36  ;;  %v1906_v37 = vadd.f32 1.0, %v1905_v54 }
 0x195   :  { %v3995_v28 = vadd.f32 -0.6931472, %v1798_v30  ;;  %v4402_v9 = vpop.eup %4401  ;;  %v1673_v32 = vsel %vm5652_vm3, %v1670_v17, %v1667_v3  ;;  %v1647_v6 = vmax.f32 %v5448_v51, 0.0  ;;  %v1908_v48 = vand.u32 2147483647, %v5596_v2  ;;  %v5692_v30 = vpop.permute.xlu1 %231 }
 0x196   :  { %v2043_v8 = vadd.f32 %v2033_v7, %v2015_v21  ;;  %v2036_v49 = vmul.f32 0.6931472, %v4402_v9  ;;  %v2039_v56 = vmul.f32 %v5604_v58, %v2038_v31  ;;  %vm2041_vm4 = vcmp.lt.f32.partialorder %v2040_v42, 0.0004427343 }
 0x197   :  { %v4404_v5 = vpop.eup %4403  ;;  %v1675_v46 = vadd.f32 %v1673_v32, %v1647_v6  ;;  %4405 = vlog2.f32 %v1911_v59  ;;  %v1907_v45 = vmul.f32 %v5596_v2, %v1906_v37  ;;  %vm1909_vm5 = vcmp.lt.f32.partialorder %v1908_v48, 0.0004427343 }
 0x198   :  { %v1904_v16 = vmul.f32 0.6931472, %v4404_v5  ;;  %v4006_v63 = vadd.f32 -0.6931472, %v2043_v8  ;;  %v2042_v15 = vsel %vm2041_vm4, %v2039_v56, %v2036_v49  ;;  %v1914_v51 = vmul.f32 -0.5, %v4400_v36  ;;  %v5769_v49 = vpop.permute.xlu0 %724 }
 0x199   :  { %3990 = vmatmul.msk.f32.vlgmr.msra.gmra.mxu3 %vm86_vm1, %v3988_v22  ;;  %3997 = vmatmul.msk.f32.gmra.mxu2 %vm86_vm1, %v3995_v28  ;;  %v2016_v52 = vmax.f32 %v5534_v40, 0.0  ;;  %v3989_v18 = vadd.f32 -0.6931472, %v1675_v46  ;;  %v1892_v27 = vmax.f32 %v5492_v19, 0.0  ;;  %v1917_v23 = vand.u32 2147483647, %v4400_v36 }
 0x19a   :  { %v1910_v38 = vsel %vm1909_vm5, %v1907_v45, %v1904_v16  ;;  %v1915_v11 = vadd.f32 1.0, %v1914_v51  ;;  %v1893_v19 = vmax.f32 %v5540_v14, 0.0 }
 0x19b   :  { %v2044_v58 = vadd.f32 %v2042_v15, %v2016_v52  ;;  %v1920_v2 = vadd.f32 %v1910_v38, %v1892_v27  ;;  %vm1918_vm6 = vcmp.lt.f32.partialorder %v1917_v23, 0.0004427343  ;;  %v241_v52 = vperm.slane %v4973_v50, 0 }
 0x19c   :  { %v1916_v40 = vmul.f32 %v4400_v36, %v1915_v11  ;;  %v487_v27 = vperm.slane %v4973_v50, 2 }
 0x19d   :  { %v4406_v25 = vpop.eup %4405  ;;  %v4007_v61 = vadd.f32 -0.6931472, %v2044_v58  ;;  %v4000_v10 = vadd.f32 -0.6931472, %v1920_v2  ;;  %v6665_v2 = vld [vmem:[#allocation18_spill] sm:$0xff] }
 0x19e   :  { %v1913_v12 = vmul.f32 0.6931472, %v4406_v25 }
 0x1a0   :  { %v1919_v0 = vsel %vm1918_vm6, %v1916_v40, %v1913_v12  ;;  %v5797_v58 = vpop.permute.xlu0 %970 }
 0x1a1   :  { %3991 = vmatmul.msk.f32.gmra.mxu3 %vm86_vm1, %v3989_v18  ;;  %4008 = vmatmul.msk.f32.vlgmr.msrb.gmra.mxu2 %vm86_vm1, %v4006_v63  ;;  %v1921_v57 = vadd.f32 %v1919_v0, %v1893_v19  ;;  %v364_v18 = vperm.slane %v4973_v50, 1  ;;  %v79_v0 = vld [vmem:[%s6520_s3 + $0x70] sm:$0xff] }
 0x1a2   :  { %2434 = vmatpush.msrb.mxu2 %v5625_v60  ;;  %2110 = vmatpush.msra.mxu1 %v79_v0 }
 0x1a3   :  { %v4001_v13 = vadd.f32 -0.6931472, %v1921_v57 }
 0x1a4   :  { %2435 = vmatpush.msrb.mxu2 %v5638_v26 }
 0x1a5   :  { %v5674_v43 = vpop.f32.mrf.mxu2 }
 0x1a9   :  { %4002 = vmatmul.msk.f32.vlgmr.msrb.gmra.mxu3 %vm86_vm1, %v4000_v10  ;;  %4009 = vmatmul.msk.f32.gmra.mxu2 %vm86_vm1, %v4007_v61 }
 0x1ae   :  { %v223_v4 = vpop.f32.mrf.mxu3 }
 0x1af   :  { %v5682_v35 = vpop.f32.mrf.mxu2 }
 0x1b1   :  { %4003 = vmatmul.msk.f32.gmra.mxu3 %vm86_vm1, %v4001_v13  ;;  %4018 = vmatmul.msk.f32.vlgmr.msra.gmra.mxu2 %vm137_vm2, %v4774_v62  ;;  %v5696_v62 = vpop.permute.xlu2 %355 }
 0x1b2   :  { %2616 = vmatpush.msra.mxu2 %v5625_v60 }
 0x1b4   :  { %2617 = vmatpush.msra.mxu2 %v5638_v26 }
 0x1b7   :  { %v5690_v14 = vpop.f32.mrf.mxu2 }
 0x1b8   :  { %v5686_v33 = vpop.f32.mrf.mxu3 }
 0x1b9   :  { %4019 = vmatmul.msk.f32.gmra.mxu2 %vm137_vm2, %v4793_v34  ;;  %v5704_v34 = vpop.permute.xlu1 %478  ;;  %v5706_v17 = vpop.permute.xlu2 %601 }
 0x1c0   :  { %v471_v36 = vpop.f32.mrf.mxu3 }
 0x1c1   :  { %4030 = vmatmul.msk.f32.vlgmr.msrb.gmra.mxu2 %vm137_vm2, %v4800_v41  ;;  %v5714_v41 = vpop.permute.xlu1 %236  ;;  %v5716_v7 = vpop.permute.xlu2 %359 }
 0x1c2   :  { %2798 = vmatpush.msrb.mxu2 %v5625_v60 }
 0x1c4   :  { %2799 = vmatpush.msrb.mxu2 %v5638_v26 }
 0x1c7   :  { %v5700_v54 = vpop.f32.mrf.mxu2 }
 0x1c9   :  { %4031 = vmatmul.msk.f32.gmra.mxu2 %vm137_vm2, %v4814_v55  ;;  %v5722_v31 = vpop.permute.xlu2 %482  ;;  %v5724_v9 = vpop.permute.xlu1 %847 }
 0x1cb   :  { %v474_v3 = vpop.f32.mrf.mxu3 }
 0x1cf   :  { %v5708_v28 = vpop.f32.mrf.mxu2 }
 0x1d1   :  { %4042 = vmatmul.msk.f32.vlgmr.msra.gmra.mxu2 %vm137_vm2, %v4824_v20  ;;  %v5734_v42 = vpop.permute.xlu2 %1093 }
 0x1d2   :  { %2980 = vmatpush.msra.mxu2 %v5625_v60 }
 0x1d3   :  { %v717_v29 = vpop.f32.mrf.mxu3 }
 0x1d4   :  { %2981 = vmatpush.msra.mxu2 %v5638_v26 }
 0x1d9   :  { %4043 = vmatmul.msk.f32.gmra.mxu2 %vm137_vm2, %v4838_v39  ;;  %v5720_v55 = vpop.f32.mrf.mxu2  ;;  %v5736_v39 = vpop.permute.xlu1 %605 }
 0x1e0   :  { %v5726_v22 = vpop.f32.mrf.mxu3 }
 0x1e1   :  { %4054 = vmatmul.msk.f32.vlgmr.msrb.gmra.mxu2 %vm137_vm2, %v4848_v53  ;;  %v5730_v20 = vpop.f32.mrf.mxu2  ;;  %v5744_v32 = vpop.permute.xlu1 %728 }
 0x1e2   :  { %3162 = vmatpush.msrb.mxu2 %v5625_v60  ;;  %v5748_v53 = vpop.permute.xlu2 %1216 }
 0x1e4   :  { %3163 = vmatpush.msrb.mxu2 %v5638_v26 }
 0x1e8   :  { %v963_v21 = vpop.f32.mrf.mxu3 }
 0x1e9   :  { %4055 = vmatmul.msk.f32.gmra.mxu2 %vm137_vm2, %v4862_v24  ;;  %v5758_v24 = vpop.permute.xlu1 %1339 }
 0x1ea   :  { %v5740_v59 = vpop.f32.mrf.mxu2  ;;  %v5760_v48 = vpop.permute.xlu2 %974 }
 0x1f1   :  { %v5742_v37 = vpop.f32.mrf.mxu3  ;;  %4066 = vmatmul.msk.f32.vlgmr.msra.gmra.mxu2 %vm137_vm2, %v4872_v47  ;;  %v5767_v47 = vld [vmem:[%s6521_s4 + $0x2] ss:$0 sm:$0xff]  ;;  %v5784_v15 = vpop.permute.xlu1 %1462 }
 0x1f2   :  { %v5750_v5 = vpop.f32.mrf.mxu2  ;;  %3344 = vmatpush.msra.mxu2 %v5625_v60  ;;  %v224_v56 = vadd.f32 %v5767_v47, %v223_v4  ;;  %v472_v16 = vadd.f32 %v5767_v47, %v471_v36  ;;  %v5786_v51 = vpop.permute.xlu2 %1097  ;;  %v227_v38 = vadd.f32 %v5767_v47, %v5686_v33  ;;  %v718_v11 = vadd.f32 %v5767_v47, %v717_v29 }
 0x1f3   :  { %v352_v23 = vadd.f32 %v5767_v47, %v5682_v35  ;;  %v475_v12 = vadd.f32 %v5767_v47, %v474_v3 }
 0x1f4   :  { %3345 = vmatpush.msra.mxu2 %v5638_v26  ;;  %v239_v63 = vmul.f32 %v5692_v30, %v224_v56  ;;  %v240_v19 = vmul.f32 %v5714_v41, %v227_v38  ;;  %v731_v35 = vmul.f32 %v5769_v49, %v718_v11  ;;  %v841_v56 = vadd.f32 %v5767_v47, %v5708_v28  ;;  %v6666_v11 = vld [vmem:[#allocation20_spill] sm:$0xff] }
 0x1f5   :  { %v363_v33 = vmul.f32 %v5716_v7, %v352_v23  ;;  %v486_v36 = vmul.f32 %v5722_v31, %v475_v12  ;;  %v721_v38 = vadd.f32 %v5767_v47, %v5726_v22 }
 0x1f6   :  { %v242_v25 = vmul.f32 %v241_v52, %v239_v63  ;;  %v854_v23 = vmul.f32 %v5724_v9, %v841_v56 }
 0x1f7   :  { %v489_v28 = vmul.f32 %v487_v27, %v486_v36  ;;  %v732_v22 = vmul.f32 %v5744_v32, %v721_v38  ;;  %v844_v36 = vadd.f32 %v5767_v47, %v5720_v55 }
 0x1f9   :  { %v5754_v6 = vpop.f32.mrf.mxu3  ;;  %4067 = vmatmul.msk.f32.gmra.mxu2 %vm137_vm2, %v4886_v1  ;;  %v349_v1 = vadd.f32 %v5767_v47, %v5674_v43  ;;  %v78_v43 = vld [vmem:[%s6520_s3 + $0x68] sm:$0xff]  ;;  %v5827_v63 = vpop.permute.xlu1 %1220 }
 0x1fa   :  { %v5821_v3 = vpop.permute.xlu2 %1708  ;;  %2111 = vmatpush.msra.mxu1 %v78_v43 }
 0x1fc   :  { %v5762_v8 = vpop.f32.mrf.mxu2 }
 0x201   :  { %4078 = vmatmul.msk.f32.vlgmr.msrb.gmra.mxu2 %vm137_vm2, %v4896_v44  ;;  %v362_v44 = vmul.f32 %v5696_v62, %v349_v1  ;;  %v733_v1 = vperm.slane %v4973_v50, 4 }
 0x202   :  { %3526 = vmatpush.msrb.mxu2 %v5625_v60  ;;  %v485_v60 = vmul.f32 %v5704_v34, %v472_v16  ;;  %v964_v16 = vadd.f32 %v5767_v47, %v963_v21  ;;  %v5836_v21 = vpop.permute.xlu0 %851 }
 0x203   :  { %v5774_v46 = vpop.f32.mrf.mxu3  ;;  %v365_v40 = vmul.f32 %v364_v18, %v362_v44  ;;  %v243_v44 = vmul.f32 %v241_v52, %v240_v19  ;;  %v855_v55 = vmul.f32 %v5836_v21, %v844_v36 }
 0x204   :  { %v5780_v45 = vpop.f32.mrf.mxu2  ;;  %3527 = vmatpush.msrb.mxu2 %v5638_v26  ;;  %v595_v26 = vadd.f32 %v5767_v47, %v5690_v14  ;;  %v488_v10 = vmul.f32 %v487_v27, %v485_v60  ;;  %v610_v14 = vperm.slane %v4973_v50, 3  ;;  %v598_v60 = vadd.f32 %v5767_v47, %v5700_v54 }
 0x205   :  { %v367_v4 = vadd.f32 %v365_v40, %v242_v25  ;;  %v977_v52 = vmul.f32 %v5797_v58, %v964_v16  ;;  %v979_v27 = vperm.slane %v4973_v50, 6 }
 0x206   :  { %v608_v13 = vmul.f32 %v5706_v17, %v595_v26  ;;  %v734_v26 = vmul.f32 %v733_v1, %v731_v35  ;;  %v609_v54 = vmul.f32 %v5736_v39, %v598_v60  ;;  %v76_v35 = vld [vmem:[%s6520_s3 + $0x58] sm:$0xff] }
 0x207   :  { %v490_v29 = vadd.f32 %v488_v10, %v367_v4  ;;  %v856_v10 = vperm.slane %v4973_v50, 5  ;;  %v1210_v4 = vadd.f32 %v5767_v47, %v5754_v6  ;;  %v980_v56 = vmul.f32 %v979_v27, %v977_v52 }
 0x208   :  { %v611_v25 = vmul.f32 %v610_v14, %v608_v13  ;;  %v77_v13 = vld [vmem:[%s6520_s3 + $0x60] sm:$0xff]  ;;  %v612_v16 = vmul.f32 %v610_v14, %v609_v54  ;;  %v735_v6 = vmul.f32 %v733_v1, %v732_v22  ;;  %v1090_v22 = vadd.f32 %v5767_v47, %v5740_v59 }
 0x209   :  { %4079 = vmatmul.msk.f32.gmra.mxu2 %vm137_vm2, %v6665_v2  ;;  %v366_v2 = vmul.f32 %v364_v18, %v363_v33  ;;  %v1087_v18 = vadd.f32 %v5767_v47, %v5730_v20  ;;  %v967_v20 = vadd.f32 %v5767_v47, %v5742_v37  ;;  %2112 = vmatpush.msra.mxu1 %v77_v13 }
 0x20a   :  { %v613_v12 = vadd.f32 %v611_v25, %v490_v29  ;;  %v857_v29 = vmul.f32 %v856_v10, %v854_v23  ;;  %v1223_v25 = vmul.f32 %v5748_v53, %v1210_v4  ;;  %v6668_v23 = vld [vmem:[#allocation28_spill] sm:$0xff]  ;;  %v5873_v52 = vpop.permute.xlu0 %1585 }
 0x20b   :  { %v5805_v61 = vpop.f32.mrf.mxu3  ;;  %v368_v40 = vadd.f32 %v366_v2, %v243_v44  ;;  %v5859_v44 = vpop.permute.xlu2 %1831  ;;  %2113 = vmatpush.msra.mxu1 %v76_v35  ;;  %v1100_v60 = vmul.f32 %v5734_v42, %v1087_v18  ;;  %v1102_v2 = vperm.slane %v4973_v50, 7  ;;  %v978_v14 = vmul.f32 %v5760_v48, %v967_v20 }
 0x20c   :  { %v5814_v57 = vpop.f32.mrf.mxu2  ;;  %v736_v19 = vadd.f32 %v734_v26, %v613_v12  ;;  %v5863_v26 = vpop.permute.xlu1 %1343  ;;  %v1225_v12 = vperm.slane %v6668_v23, 0  ;;  %v1213_v50 = vadd.f32 %v5767_v47, %v5774_v46  ;;  %v1348_v59 = vperm.slane %v6668_v23, 1 }
 0x20d   :  { %v491_v33 = vadd.f32 %v489_v28, %v368_v40  ;;  %v1333_v28 = vadd.f32 %v5767_v47, %v5750_v5  ;;  %v1456_v40 = vadd.f32 %v5767_v47, %v5805_v61  ;;  %v1103_v4 = vmul.f32 %v1102_v2, %v1100_v60  ;;  %v6669_v60 = vld [vmem:[#allocation24_spill] sm:$0xff] }
 0x20e   :  { %v859_v38 = vadd.f32 %v857_v29, %v736_v19  ;;  %v1226_v13 = vmul.f32 %v1225_v12, %v1223_v25  ;;  %v858_v5 = vmul.f32 %v856_v10, %v855_v55  ;;  %v981_v35 = vmul.f32 %v979_v27, %v978_v14 }
 0x20f   :  { %v614_v37 = vadd.f32 %v612_v16, %v491_v33  ;;  %v1346_v33 = vmul.f32 %v5758_v24, %v1333_v28  ;;  %v1469_v20 = vmul.f32 %v5784_v15, %v1456_v40  ;;  %v1101_v61 = vmul.f32 %v5786_v51, %v1090_v22 }
 0x210   :  { %v982_v1 = vadd.f32 %v980_v56, %v859_v38  ;;  %v1224_v56 = vmul.f32 %v5827_v63, %v1213_v50  ;;  %v1579_v16 = vadd.f32 %v5767_v47, %v5780_v45  ;;  %v1336_v25 = vadd.f32 %v5767_v47, %v5762_v8 }
 0x211   :  { %4090 = vmatmul.msk.f32.vlgmr.msra.gmra.mxu2 %vm137_vm2, %v6666_v11  ;;  %v6667_v11 = vld [vmem:[#allocation22_spill] sm:$0xff]  ;;  %v737_v54 = vadd.f32 %v735_v6, %v614_v37  ;;  %v1471_v6 = vperm.slane %v6668_v23, 2  ;;  %v1349_v37 = vmul.f32 %v1348_v59, %v1346_v33  ;;  %v1582_v33 = vadd.f32 %v5767_v47, %v5814_v57 }
 0x212   :  { %v1105_v36 = vadd.f32 %v1103_v4, %v982_v1  ;;  %v5901_v45 = vpop.permute.xlu0 %1466  ;;  %v1104_v1 = vmul.f32 %v1102_v2, %v1101_v61  ;;  %v1227_v28 = vmul.f32 %v1225_v12, %v1224_v56  ;;  %v1592_v22 = vmul.f32 %v5873_v52, %v1579_v16 }
 0x213   :  { %v860_v29 = vadd.f32 %v858_v5, %v737_v54  ;;  %v1472_v14 = vmul.f32 %v1471_v6, %v1469_v20  ;;  %v1347_v4 = vmul.f32 %v5863_v26, %v1336_v25  ;;  %v1717_v2 = vperm.slane %v6668_v23, 4 }
 0x214   :  { %v1458_v0 = vpop.f32.mrf.mxu3  ;;  %v5842_v43 = vpop.f32.mrf.mxu2  ;;  %v1228_v46 = vadd.f32 %v1226_v13, %v1105_v36 }
 0x215   :  { %v5892_v27 = vpop.permute.xlu1 %1954  ;;  %v983_v38 = vadd.f32 %v981_v35, %v860_v29  ;;  %v1459_v55 = vadd.f32 %v5767_v47, %v1458_v0  ;;  %v1594_v0 = vperm.slane %v6668_v23, 3  ;;  %v1825_v35 = vadd.f32 %v5767_v47, %v5842_v43  ;;  %v6670_v29 = vld [vmem:[#allocation26_spill] sm:$0xff] }
 0x216   :  { %v1351_v50 = vadd.f32 %v1349_v37, %v1228_v46  ;;  %v1350_v56 = vmul.f32 %v1348_v59, %v1347_v4 }
 0x217   :  { %v1106_v8 = vadd.f32 %v1104_v1, %v983_v38  ;;  %v1470_v13 = vmul.f32 %v5901_v45, %v1459_v55  ;;  %v1595_v36 = vmul.f32 %v1594_v0, %v1592_v22 }
 0x218   :  { %v1474_v5 = vadd.f32 %v1472_v14, %v1351_v50  ;;  %v1840_v14 = vperm.slane %v6668_v23, 5 }
 0x219   :  { %4091 = vmatmul.msk.f32.gmra.mxu2 %vm137_vm2, %v6667_v11  ;;  %v5898_v11 = vpop.permute.xlu2 %1589  ;;  %v1229_v12 = vadd.f32 %v1227_v28, %v1106_v8  ;;  %v1473_v46 = vmul.f32 %v1471_v6, %v1470_v13 }
 0x21a   :  { %v1597_v43 = vadd.f32 %v1595_v36, %v1474_v5  ;;  %v1593_v57 = vmul.f32 %v5898_v11, %v1582_v33  ;;  %v5931_v8 = vpop.permute.xlu0 %1835  ;;  %v2086_v5 = vperm.slane %v6668_v23, 7  ;;  %v5937_v33 = vld [vmem:[%s6521_s4 + $0x5] ss:$0 sm:$0xff] }
 0x21b   :  { %v1352_v25 = vadd.f32 %v1350_v56, %v1229_v12 }
 0x21c   :  { %v1701_v19 = vpop.f32.mrf.mxu3  ;;  %v5881_v18 = vpop.f32.mrf.mxu2  ;;  %v1596_v4 = vmul.f32 %v1594_v0, %v1593_v57  ;;  %v5950_v57 = vld [vmem:[%s6520_s3 + $0xc0] sm:$0xff] }
 0x21d   :  { %v1702_v10 = vadd.f32 %v5767_v47, %v1701_v19  ;;  %v5920_v38 = vpop.permute.xlu1 %2077  ;;  %v1475_v28 = vadd.f32 %v1473_v46, %v1352_v25  ;;  %2311 = vmatpush.msrb.mxu1 %v5950_v57 }
 0x21f   :  { %v1715_v19 = vmul.f32 %v5821_v3, %v1702_v10  ;;  %v1838_v10 = vmul.f32 %v5859_v44, %v1825_v35  ;;  %v1598_v36 = vadd.f32 %v1596_v4, %v1475_v28  ;;  %v5971_v4 = vld [vmem:[%s6520_s3 + $0xa8] sm:$0xff] }
 0x221   :  { %4102 = vmatmul.msk.f32.vlgmr.msrb.gmra.mxu2 %vm137_vm2, %v6669_v60  ;;  %v1718_v20 = vmul.f32 %v1717_v2, %v1715_v19  ;;  %v5916_v16 = vpop.permute.xlu2 %1712  ;;  %v1841_v22 = vmul.f32 %v1840_v14, %v1838_v10 }
 0x223   :  { %v1720_v1 = vadd.f32 %v1718_v20, %v1597_v43 }
 0x224   :  { %v1704_v40 = vpop.f32.mrf.mxu3  ;;  %v2070_v54 = vpop.f32.mrf.mxu2 }
 0x225   :  { %v1705_v61 = vadd.f32 %v5767_v47, %v1704_v40  ;;  %v2071_v60 = vadd.f32 %v5767_v47, %v2070_v54  ;;  %v1963_v40 = vperm.slane %v6668_v23, 6  ;;  %v1828_v54 = vadd.f32 %v5767_v47, %v5881_v18  ;;  %v5943_v56 = vpop.permute.xlu1 %1958 }
 0x226   :  { %v1843_v35 = vadd.f32 %v1841_v22, %v1720_v1 }
 0x227   :  { %v1716_v59 = vmul.f32 %v5916_v16, %v1705_v61  ;;  %v2084_v50 = vmul.f32 %v5920_v38, %v2071_v60  ;;  %v1839_v18 = vmul.f32 %v5931_v8, %v1828_v54 }
 0x229   :  { %4103 = vmatmul.msk.f32.gmra.mxu2 %vm137_vm2, %v6670_v29  ;;  %v1719_v13 = vmul.f32 %v1717_v2, %v1716_v59  ;;  %v2087_v20 = vmul.f32 %v2086_v5, %v2084_v50  ;;  %v5941_v0 = vpop.permute.xlu2 %2081  ;;  %v1842_v25 = vmul.f32 %v1840_v14, %v1839_v18  ;;  %v5965_v14 = vld [vmem:[%s6520_s3 + $0xb0] sm:$0xff] }
 0x22a   :  { %6671 = vst [vmem:[#allocation18_spill] sm:$0xff] %v5941_v0 }
 0x22b   :  { %v1721_v46 = vadd.f32 %v1719_v13, %v1598_v36 }
 0x22c   :  { %v1947_v55 = vpop.f32.mrf.mxu3  ;;  %v2073_v37 = vpop.f32.mrf.mxu2 }
 0x22d   :  { %v1948_v6 = vadd.f32 %v5767_v47, %v1947_v55  ;;  %v2074_v29 = vadd.f32 %v5767_v47, %v2073_v37  ;;  %v1844_v59 = vadd.f32 %v1842_v25, %v1721_v46 }
 0x22f   :  { %v1961_v19 = vmul.f32 %v5892_v27, %v1948_v6  ;;  %v2085_v55 = vmul.f32 %v5941_v0, %v2074_v29 }
 0x231   :  { %v1964_v12 = vmul.f32 %v1963_v40, %v1961_v19  ;;  %v2088_v22 = vmul.f32 %v2086_v5, %v2085_v55 }
 0x233   :  { %v1966_v61 = vadd.f32 %v1964_v12, %v1843_v35 }
 0x234   :  { %v1950_v2 = vpop.f32.mrf.mxu3  ;;  %v2254_v23 = vpop.f32.mrf.mxu2 }
 0x235   :  { %v2089_v10 = vadd.f32 %v2087_v20, %v1966_v61  ;;  %v1951_v43 = vadd.f32 %v5767_v47, %v1950_v2  ;;  %v2255_v60 = vadd.f32 %v5937_v33, %v2254_v23  ;;  %v5959_v47 = vld [vmem:[%s6520_s3 + $0xb8] sm:$0xff] }
 0x236   :  { %2312 = vmatpush.msrb.mxu1 %v5959_v47 }
 0x237   :  { %v1962_v37 = vmul.f32 %v5943_v56, %v1951_v43  ;;  %v2262_v1 = vand.u32 2147483647, %v2255_v60  ;;  %4010 = vmatmul.msk.f32.vlgmr.msra.gmra.mxu1 %vm86_vm1, %v2089_v10 }
 0x238   :  { %2313 = vmatpush.msrb.mxu1 %v5965_v14 }
 0x239   :  { %v1965_v6 = vmul.f32 %v1963_v40, %v1962_v37  ;;  %v2264_v28 = vsub.f32 0.0, %v2262_v1 }
 0x23a   :  { %2314 = vmatpush.msrb.mxu1 %v5971_v4 }
 0x23b   :  { %v1967_v54 = vadd.f32 %v1965_v6, %v1844_v59  ;;  %v2266_v50 = vmul.f32 1.442695, %v2264_v28 }
 0x23c   :  { %v2257_v19 = vpop.f32.mrf.mxu2  ;;  %2493 = vmatpush.msra.mxu1 %v5950_v57 }
 0x23d   :  { %4407 = vpow2.f32 %v2266_v50  ;;  %v2258_v40 = vadd.f32 %v5937_v33, %v2257_v19  ;;  %v2090_v13 = vadd.f32 %v2088_v22, %v1967_v54  ;;  %v2260_v54 = vmax.f32 %v2255_v60, 0.0 }
 0x23e   :  { %2494 = vmatpush.msra.mxu1 %v5959_v47 }
 0x23f   :  { %v2263_v35 = vand.u32 2147483647, %v2258_v40  ;;  %4011 = vmatmul.msk.f32.gmra.mxu1 %vm86_vm1, %v2090_v13 }
 0x240   :  { %2495 = vmatpush.msra.mxu1 %v5965_v14 }
 0x241   :  { %v2265_v5 = vsub.f32 0.0, %v2263_v35 }
 0x242   :  { %2496 = vmatpush.msra.mxu1 %v5971_v4 }
 0x243   :  { %v4408_v12 = vpop.eup %4407  ;;  %v2268_v36 = vmul.f32 1.442695, %v2265_v5 }
 0x244   :  { %v2270_v18 = vadd.f32 1.0, %v4408_v12  ;;  %v2273_v20 = vmul.f32 -0.5, %v4408_v12  ;;  %v2437_v61 = vpop.f32.mrf.mxu2  ;;  %v2276_v10 = vand.u32 2147483647, %v4408_v12 }
 0x245   :  { %4409 = vpow2.f32 %v2268_v36  ;;  %v5980_v29 = vadd.f32 %v5937_v33, %v2437_v61 }
 0x246   :  { %4411 = vlog2.f32 %v2270_v18  ;;  %v2274_v23 = vadd.f32 1.0, %v2273_v20  ;;  %vm2277_vm7 = vcmp.lt.f32.partialorder %v2276_v10, 0.0004427343 }
 0x247   :  { %v2445_v2 = vand.u32 2147483647, %v5980_v29 }
 0x248   :  { %v2275_v37 = vmul.f32 %v4408_v12, %v2274_v23 }
 0x249   :  { %v2447_v46 = vsub.f32 0.0, %v2445_v2 }
 0x24b   :  { %v4410_v43 = vpop.eup %4409  ;;  %v2449_v25 = vmul.f32 1.442695, %v2447_v46 }
 0x24c   :  { %v4412_v55 = vpop.eup %4411  ;;  %v2440_v1 = vpop.f32.mrf.mxu2  ;;  %v2279_v59 = vadd.f32 1.0, %v4410_v43  ;;  %v2282_v22 = vmul.f32 -0.5, %v4410_v43  ;;  %v2285_v18 = vand.u32 2147483647, %v4410_v43 }
 0x24d   :  { %v2272_v6 = vmul.f32 0.6931472, %v4412_v55  ;;  %4413 = vpow2.f32 %v2449_v25  ;;  %v5985_v28 = vadd.f32 %v5937_v33, %v2440_v1  ;;  %v2261_v55 = vmax.f32 %v2258_v40, 0.0 }
 0x24e   :  { %4415 = vlog2.f32 %v2279_v59  ;;  %v2283_v5 = vadd.f32 1.0, %v2282_v22  ;;  %vm2286_vm8 = vcmp.lt.f32.partialorder %v2285_v18, 0.0004427343 }
 0x24f   :  { %v2278_v50 = vsel %vm2277_vm7, %v2275_v37, %v2272_v6  ;;  %v2446_v19 = vand.u32 2147483647, %v5985_v28 }
 0x250   :  { %v2288_v13 = vadd.f32 %v2278_v50, %v2260_v54  ;;  %v2284_v25 = vmul.f32 %v4410_v43, %v2283_v5 }
 0x251   :  { %v2448_v35 = vsub.f32 0.0, %v2446_v19 }
 0x252   :  { %v4020_v36 = vadd.f32 -0.6931472, %v2288_v13 }
 0x253   :  { %v4414_v12 = vpop.eup %4413  ;;  %v2451_v20 = vmul.f32 1.442695, %v2448_v35 }
 0x254   :  { %v4416_v61 = vpop.eup %4415  ;;  %v2453_v2 = vadd.f32 1.0, %v4414_v12  ;;  %v2456_v23 = vmul.f32 -0.5, %v4414_v12  ;;  %4022 = vmatmul.msk.f32.vlgmr.msrb.gmra.mxu1 %vm86_vm1, %v4020_v36  ;;  %v2619_v46 = vpop.f32.mrf.mxu2  ;;  %v2459_v54 = vand.u32 2147483647, %v4414_v12 }
 0x255   :  { %4417 = vpow2.f32 %v2451_v20  ;;  %v5990_v60 = vadd.f32 %v5937_v33, %v2619_v46  ;;  %v2281_v10 = vmul.f32 0.6931472, %v4416_v61  ;;  %2675 = vmatpush.msrb.mxu1 %v5950_v57  ;;  %v2443_v61 = vmax.f32 %v5980_v29, 0.0 }
 0x256   :  { %4419 = vlog2.f32 %v2453_v2  ;;  %v2457_v59 = vadd.f32 1.0, %v2456_v23  ;;  %vm2460_vm9 = vcmp.lt.f32.partialorder %v2459_v54, 0.0004427343 }
 0x257   :  { %v2627_v37 = vand.u32 2147483647, %v5990_v60  ;;  %v2287_v1 = vsel %vm2286_vm8, %v2284_v25, %v2281_v10  ;;  %2676 = vmatpush.msrb.mxu1 %v5959_v47 }
 0x258   :  { %v2289_v6 = vadd.f32 %v2287_v1, %v2261_v55  ;;  %v2458_v40 = vmul.f32 %v4414_v12, %v2457_v59 }
 0x259   :  { %v2629_v22 = vsub.f32 0.0, %v2627_v37  ;;  %2677 = vmatpush.msrb.mxu1 %v5965_v14 }
 0x25a   :  { %v4021_v50 = vadd.f32 -0.6931472, %v2289_v6 }
 0x25b   :  { %v4418_v19 = vpop.eup %4417  ;;  %v2631_v13 = vmul.f32 1.442695, %v2629_v22  ;;  %2678 = vmatpush.msrb.mxu1 %v5971_v4 }
 0x25c   :  { %v4420_v43 = vpop.eup %4419  ;;  %4023 = vmatmul.msk.f32.gmra.mxu1 %vm86_vm1, %v4021_v50  ;;  %v2622_v35 = vpop.f32.mrf.mxu2  ;;  %v2462_v5 = vadd.f32 1.0, %v4418_v19  ;;  %v2465_v20 = vmul.f32 -0.5, %v4418_v19  ;;  %v2468_v55 = vand.u32 2147483647, %v4418_v19 }
 0x25d   :  { %v2455_v36 = vmul.f32 0.6931472, %v4420_v43  ;;  %4421 = vpow2.f32 %v2631_v13  ;;  %v5999_v18 = vadd.f32 %v5937_v33, %v2622_v35  ;;  %v2444_v43 = vmax.f32 %v5985_v28, 0.0 }
 0x25e   :  { %4423 = vlog2.f32 %v2462_v5  ;;  %v2466_v12 = vadd.f32 1.0, %v2465_v20  ;;  %vm2469_vm10 = vcmp.lt.f32.partialorder %v2468_v55, 0.0004427343 }
 0x25f   :  { %v2461_v2 = vsel %vm2460_vm9, %v2458_v40, %v2455_v36  ;;  %v2628_v23 = vand.u32 2147483647, %v5999_v18 }
 0x260   :  { %v2471_v46 = vadd.f32 %v2461_v2, %v2443_v61  ;;  %v2467_v13 = vmul.f32 %v4418_v19, %v2466_v12 }
 0x261   :  { %v2630_v10 = vsub.f32 0.0, %v2628_v23 }
 0x262   :  { %v4032_v25 = vadd.f32 -0.6931472, %v2471_v46 }
 0x263   :  { %v4422_v37 = vpop.eup %4421  ;;  %v2633_v1 = vmul.f32 1.442695, %v2630_v10 }
 0x264   :  { %v4424_v59 = vpop.eup %4423  ;;  %v2635_v6 = vadd.f32 1.0, %v4422_v37  ;;  %v2638_v22 = vmul.f32 -0.5, %v4422_v37  ;;  %4034 = vmatmul.msk.f32.vlgmr.msra.gmra.mxu1 %vm86_vm1, %v4032_v25  ;;  %v2801_v50 = vpop.f32.mrf.mxu2  ;;  %v2641_v61 = vand.u32 2147483647, %v4422_v37 }
 0x265   :  { %4425 = vpow2.f32 %v2633_v1  ;;  %v6005_v29 = vadd.f32 %v5937_v33, %v2801_v50  ;;  %v2464_v54 = vmul.f32 0.6931472, %v4424_v59  ;;  %2857 = vmatpush.msra.mxu1 %v5950_v57  ;;  %v2625_v59 = vmax.f32 %v5990_v60, 0.0 }
 0x266   :  { %4427 = vlog2.f32 %v2635_v6  ;;  %v2639_v5 = vadd.f32 1.0, %v2638_v22  ;;  %vm2642_vm11 = vcmp.lt.f32.partialorder %v2641_v61, 0.0004427343 }
 0x267   :  { %v2809_v40 = vand.u32 2147483647, %v6005_v29  ;;  %v2470_v35 = vsel %vm2469_vm10, %v2467_v13, %v2464_v54  ;;  %2858 = vmatpush.msra.mxu1 %v5959_v47 }
 0x268   :  { %v2472_v36 = vadd.f32 %v2470_v35, %v2444_v43  ;;  %v2640_v28 = vmul.f32 %v4422_v37, %v2639_v5 }
 0x269   :  { %v2811_v20 = vsub.f32 0.0, %v2809_v40  ;;  %2859 = vmatpush.msra.mxu1 %v5965_v14 }
 0x26a   :  { %v4033_v2 = vadd.f32 -0.6931472, %v2472_v36 }
 0x26b   :  { %v4426_v23 = vpop.eup %4425  ;;  %v2813_v19 = vmul.f32 1.442695, %v2811_v20  ;;  %2860 = vmatpush.msra.mxu1 %v5971_v4 }
 0x26c   :  { %v4428_v46 = vpop.eup %4427  ;;  %4035 = vmatmul.msk.f32.gmra.mxu1 %vm86_vm1, %v4033_v2  ;;  %v2804_v10 = vpop.f32.mrf.mxu2  ;;  %v2644_v12 = vadd.f32 1.0, %v4426_v23  ;;  %v2647_v1 = vmul.f32 -0.5, %v4426_v23  ;;  %v2650_v43 = vand.u32 2147483647, %v4426_v23 }
 0x26d   :  { %v2637_v25 = vmul.f32 0.6931472, %v4428_v46  ;;  %4429 = vpow2.f32 %v2813_v19  ;;  %v6015_v55 = vadd.f32 %v5937_v33, %v2804_v10  ;;  %v2626_v46 = vmax.f32 %v5999_v18, 0.0 }
 0x26e   :  { %4431 = vlog2.f32 %v2644_v12  ;;  %v2648_v37 = vadd.f32 1.0, %v2647_v1  ;;  %vm2651_vm12 = vcmp.lt.f32.partialorder %v2650_v43, 0.0004427343 }
 0x26f   :  { %v2643_v6 = vsel %vm2642_vm11, %v2640_v28, %v2637_v25  ;;  %v2810_v22 = vand.u32 2147483647, %v6015_v55 }
 0x270   :  { %v2653_v50 = vadd.f32 %v2643_v6, %v2625_v59  ;;  %v2649_v19 = vmul.f32 %v4426_v23, %v2648_v37 }
 0x271   :  { %v2812_v54 = vsub.f32 0.0, %v2810_v22 }
 0x272   :  { %v4044_v13 = vadd.f32 -0.6931472, %v2653_v50 }
 0x273   :  { %v4430_v40 = vpop.eup %4429  ;;  %v2815_v35 = vmul.f32 1.442695, %v2812_v54 }
 0x274   :  { %v4432_v5 = vpop.eup %4431  ;;  %v2817_v36 = vadd.f32 1.0, %v4430_v40  ;;  %v2820_v20 = vmul.f32 -0.5, %v4430_v40  ;;  %4046 = vmatmul.msk.f32.vlgmr.msrb.gmra.mxu1 %vm86_vm1, %v4044_v13  ;;  %v2983_v2 = vpop.f32.mrf.mxu2  ;;  %v2823_v59 = vand.u32 2147483647, %v4430_v40 }
 0x275   :  { %4433 = vpow2.f32 %v2815_v35  ;;  %v6021_v60 = vadd.f32 %v5937_v33, %v2983_v2  ;;  %v2646_v61 = vmul.f32 0.6931472, %v4432_v5  ;;  %3039 = vmatpush.msrb.mxu1 %v5950_v57  ;;  %v2807_v5 = vmax.f32 %v6005_v29, 0.0 }
 0x276   :  { %4435 = vlog2.f32 %v2817_v36  ;;  %v2821_v12 = vadd.f32 1.0, %v2820_v20  ;;  %vm2824_vm13 = vcmp.lt.f32.partialorder %v2823_v59, 0.0004427343 }
 0x277   :  { %v2991_v28 = vand.u32 2147483647, %v6021_v60  ;;  %v2652_v10 = vsel %vm2651_vm12, %v2649_v19, %v2646_v61  ;;  %3040 = vmatpush.msrb.mxu1 %v5959_v47 }
 0x278   :  { %v2654_v25 = vadd.f32 %v2652_v10, %v2626_v46  ;;  %v2822_v18 = vmul.f32 %v4430_v40, %v2821_v12 }
 0x279   :  { %v2993_v1 = vsub.f32 0.0, %v2991_v28  ;;  %3041 = vmatpush.msrb.mxu1 %v5965_v14 }
 0x27a   :  { %v4045_v6 = vadd.f32 -0.6931472, %v2654_v25 }
 0x27b   :  { %v4434_v22 = vpop.eup %4433  ;;  %v2995_v23 = vmul.f32 1.442695, %v2993_v1  ;;  %3042 = vmatpush.msrb.mxu1 %v5971_v4 }
 0x27c   :  { %v4436_v50 = vpop.eup %4435  ;;  %v2826_v54 = vadd.f32 1.0, %v4434_v22  ;;  %4047 = vmatmul.msk.f32.gmra.mxu1 %vm86_vm1, %v4045_v6  ;;  %v2986_v37 = vpop.f32.mrf.mxu2  ;;  %v2829_v43 = vmul.f32 -0.5, %v4434_v22  ;;  %v2832_v46 = vand.u32 2147483647, %v4434_v22 }
 0x27d   :  { %v2819_v13 = vmul.f32 0.6931472, %v4436_v50  ;;  %4437 = vpow2.f32 %v2995_v23  ;;  %v6031_v35 = vadd.f32 %v5937_v33, %v2986_v37  ;;  %v2808_v50 = vmax.f32 %v6015_v55, 0.0 }
 0x27e   :  { %4439 = vlog2.f32 %v2826_v54  ;;  %v2830_v61 = vadd.f32 1.0, %v2829_v43  ;;  %vm2833_vm14 = vcmp.lt.f32.partialorder %v2832_v46, 0.0004427343 }
 0x27f   :  { %v2825_v36 = vsel %vm2824_vm13, %v2822_v18, %v2819_v13  ;;  %v2992_v20 = vand.u32 2147483647, %v6031_v35 }
 0x280   :  { %v2835_v2 = vadd.f32 %v2825_v36, %v2807_v5  ;;  %v2831_v29 = vmul.f32 %v4434_v22, %v2830_v61 }
 0x281   :  { %v2994_v40 = vsub.f32 0.0, %v2992_v20 }
 0x282   :  { %v4056_v19 = vadd.f32 -0.6931472, %v2835_v2 }
 0x283   :  { %v4438_v28 = vpop.eup %4437  ;;  %v2997_v10 = vmul.f32 1.442695, %v2994_v40 }
 0x284   :  { %v4440_v12 = vpop.eup %4439  ;;  %v2999_v25 = vadd.f32 1.0, %v4438_v28  ;;  %v3002_v1 = vmul.f32 -0.5, %v4438_v28  ;;  %4058 = vmatmul.msk.f32.vlgmr.msra.gmra.mxu1 %vm86_vm1, %v4056_v19  ;;  %v3165_v6 = vpop.f32.mrf.mxu2  ;;  %v3005_v5 = vand.u32 2147483647, %v4438_v28 }
 0x285   :  { %v2828_v23 = vmul.f32 0.6931472, %v4440_v12  ;;  %4441 = vpow2.f32 %v2997_v10  ;;  %v6037_v59 = vadd.f32 %v5937_v33, %v3165_v6  ;;  %3221 = vmatpush.msra.mxu1 %v5950_v57  ;;  %v2989_v12 = vmax.f32 %v6021_v60, 0.0 }
 0x286   :  { %4443 = vlog2.f32 %v2999_v25  ;;  %v3003_v13 = vadd.f32 1.0, %v3002_v1  ;;  %vm3006_vm15 = vcmp.lt.f32.partialorder %v3005_v5, 0.0004427343 }
 0x287   :  { %v2834_v18 = vsel %vm2833_vm14, %v2831_v29, %v2828_v23  ;;  %v3173_v54 = vand.u32 2147483647, %v6037_v59  ;;  %3222 = vmatpush.msra.mxu1 %v5959_v47 }
 0x288   :  { %v2836_v37 = vadd.f32 %v2834_v18, %v2808_v50  ;;  %v3004_v55 = vmul.f32 %v4438_v28, %v3003_v13 }
 0x289   :  { %v3175_v43 = vsub.f32 0.0, %v3173_v54  ;;  %3223 = vmatpush.msra.mxu1 %v5965_v14 }
 0x28a   :  { %v4057_v22 = vadd.f32 -0.6931472, %v2836_v37 }
 0x28b   :  { %v4442_v36 = vpop.eup %4441  ;;  %v3177_v20 = vmul.f32 1.442695, %v3175_v43  ;;  %3224 = vmatpush.msra.mxu1 %v5971_v4 }
 0x28c   :  { %v4444_v2 = vpop.eup %4443  ;;  %v3008_v61 = vadd.f32 1.0, %v4442_v36  ;;  %4059 = vmatmul.msk.f32.gmra.mxu1 %vm86_vm1, %v4057_v22  ;;  %v3168_v40 = vpop.f32.mrf.mxu2  ;;  %v3011_v46 = vmul.f32 -0.5, %v4442_v36  ;;  %v3014_v50 = vand.u32 2147483647, %v4442_v36 }
 0x28d   :  { %v3001_v19 = vmul.f32 0.6931472, %v4444_v2  ;;  %4445 = vpow2.f32 %v3177_v20  ;;  %v6047_v10 = vadd.f32 %v5937_v33, %v3168_v40  ;;  %v2990_v2 = vmax.f32 %v6031_v35, 0.0 }
 0x28e   :  { %4447 = vlog2.f32 %v3008_v61  ;;  %v3012_v23 = vadd.f32 1.0, %v3011_v46  ;;  %vm3015_vm0 = vcmp.lt.f32.partialorder %v3014_v50, 0.0004427343 }
 0x28f   :  { %v3007_v25 = vsel %vm3006_vm15, %v3004_v55, %v3001_v19  ;;  %v3174_v1 = vand.u32 2147483647, %v6047_v10 }
 0x290   :  { %v3017_v6 = vadd.f32 %v3007_v25, %v2989_v12  ;;  %v3013_v60 = vmul.f32 %v4442_v36, %v3012_v23 }
 0x291   :  { %v3176_v28 = vsub.f32 0.0, %v3174_v1 }
 0x292   :  { %v4068_v29 = vadd.f32 -0.6931472, %v3017_v6 }
 0x293   :  { %v4446_v18 = vpop.eup %4445  ;;  %v3179_v54 = vmul.f32 1.442695, %v3176_v28 }
 0x294   :  { %v4448_v37 = vpop.eup %4447  ;;  %v3181_v13 = vadd.f32 1.0, %v4446_v18  ;;  %v3184_v43 = vmul.f32 -0.5, %v4446_v18  ;;  %4070 = vmatmul.msk.f32.vlgmr.msrb.gmra.mxu1 %vm86_vm1, %v4068_v29  ;;  %v3347_v22 = vpop.f32.mrf.mxu2  ;;  %v3187_v12 = vand.u32 2147483647, %v4446_v18 }
 0x295   :  { %v3010_v20 = vmul.f32 0.6931472, %v4448_v37  ;;  %4449 = vpow2.f32 %v3179_v54  ;;  %v6053_v5 = vadd.f32 %v5937_v33, %v3347_v22  ;;  %3403 = vmatpush.msrb.mxu1 %v5950_v57  ;;  %v3171_v37 = vmax.f32 %v6037_v59, 0.0 }
 0x296   :  { %4451 = vlog2.f32 %v3181_v13  ;;  %v3185_v19 = vadd.f32 1.0, %v3184_v43  ;;  %vm3188_vm3 = vcmp.lt.f32.partialorder %v3187_v12, 0.0004427343 }
 0x297   :  { %v3016_v55 = vsel %vm3015_vm0, %v3013_v60, %v3010_v20  ;;  %v3355_v61 = vand.u32 2147483647, %v6053_v5  ;;  %3404 = vmatpush.msrb.mxu1 %v5959_v47 }
 0x298   :  { %v3018_v40 = vadd.f32 %v3016_v55, %v2990_v2  ;;  %v3186_v35 = vmul.f32 %v4446_v18, %v3185_v19 }
 0x299   :  { %v3357_v46 = vsub.f32 0.0, %v3355_v61  ;;  %3405 = vmatpush.msrb.mxu1 %v5965_v14 }
 0x29a   :  { %v4069_v36 = vadd.f32 -0.6931472, %v3018_v40 }
 0x29b   :  { %v4450_v25 = vpop.eup %4449  ;;  %v3359_v1 = vmul.f32 1.442695, %v3357_v46  ;;  %3406 = vmatpush.msrb.mxu1 %v5971_v4 }
 0x29c   :  { %v4452_v6 = vpop.eup %4451  ;;  %v3190_v23 = vadd.f32 1.0, %v4450_v25  ;;  %4071 = vmatmul.msk.f32.gmra.mxu1 %vm86_vm1, %v4069_v36  ;;  %v3350_v28 = vpop.f32.mrf.mxu2  ;;  %v3193_v50 = vmul.f32 -0.5, %v4450_v25  ;;  %v3196_v2 = vand.u32 2147483647, %v4450_v25 }
 0x29d   :  { %v3183_v29 = vmul.f32 0.6931472, %v4452_v6  ;;  %4453 = vpow2.f32 %v3359_v1  ;;  %v6063_v54 = vadd.f32 %v5937_v33, %v3350_v28  ;;  %v3172_v6 = vmax.f32 %v6047_v10, 0.0 }
 0x29e   :  { %4455 = vlog2.f32 %v3190_v23  ;;  %v3194_v20 = vadd.f32 1.0, %v3193_v50  ;;  %vm3197_vm4 = vcmp.lt.f32.partialorder %v3196_v2, 0.0004427343 }
 0x29f   :  { %v3189_v13 = vsel %vm3188_vm3, %v3186_v35, %v3183_v29  ;;  %v3356_v43 = vand.u32 2147483647, %v6063_v54 }
 0x2a0   :  { %v3199_v22 = vadd.f32 %v3189_v13, %v3171_v37  ;;  %v3195_v59 = vmul.f32 %v4450_v25, %v3194_v20 }
 0x2a1   :  { %v3358_v18 = vsub.f32 0.0, %v3356_v43 }
 0x2a2   :  { %v4080_v60 = vadd.f32 -0.6931472, %v3199_v22 }
 0x2a3   :  { %v4454_v55 = vpop.eup %4453  ;;  %v3361_v61 = vmul.f32 1.442695, %v3358_v18 }
 0x2a4   :  { %v4456_v40 = vpop.eup %4455  ;;  %v3363_v19 = vadd.f32 1.0, %v4454_v55  ;;  %v3366_v46 = vmul.f32 -0.5, %v4454_v55  ;;  %4082 = vmatmul.msk.f32.vlgmr.msra.gmra.mxu1 %vm86_vm1, %v4080_v60  ;;  %v3529_v36 = vpop.f32.mrf.mxu2  ;;  %v3369_v37 = vand.u32 2147483647, %v4454_v55 }
 0x2a5   :  { %v3192_v1 = vmul.f32 0.6931472, %v4456_v40  ;;  %4457 = vpow2.f32 %v3361_v61  ;;  %v6069_v12 = vadd.f32 %v5937_v33, %v3529_v36  ;;  %3585 = vmatpush.msra.mxu1 %v5950_v57  ;;  %v3353_v40 = vmax.f32 %v6053_v5, 0.0  ;;  %v83_v5 = vld [vmem:[%s6520_s3 + $0x88] sm:$0xff] }
 0x2a6   :  { %4459 = vlog2.f32 %v3363_v19  ;;  %v3367_v29 = vadd.f32 1.0, %v3366_v46  ;;  %vm3370_vm5 = vcmp.lt.f32.partialorder %v3369_v37, 0.0004427343 }
 0x2a7   :  { %v3198_v35 = vsel %vm3197_vm4, %v3195_v59, %v3192_v1  ;;  %v3537_v23 = vand.u32 2147483647, %v6069_v12  ;;  %3586 = vmatpush.msra.mxu1 %v5959_v47  ;;  %v4208_v59 = vld [vmem:[%s6521_s4 + $0x3] ss:$0 sm:$0xff] }
 0x2a8   :  { %v3200_v28 = vadd.f32 %v3198_v35, %v3172_v6  ;;  %v3368_v10 = vmul.f32 %v4454_v55, %v3367_v29 }
 0x2a9   :  { %v3539_v50 = vsub.f32 0.0, %v3537_v23  ;;  %3587 = vmatpush.msra.mxu1 %v5965_v14  ;;  %v84_v23 = vld [vmem:[%s6520_s3 + $0x90] sm:$0xff] }
 0x2aa   :  { %v4081_v25 = vadd.f32 -0.6931472, %v3200_v28  ;;  %2172 = vmatpush.msra.mxu3 %v84_v23 }
 0x2ab   :  { %v4458_v13 = vpop.eup %4457  ;;  %v3541_v43 = vmul.f32 1.442695, %v3539_v50  ;;  %3588 = vmatpush.msra.mxu1 %v5971_v4 }
 0x2ac   :  { %v4460_v22 = vpop.eup %4459  ;;  %v3372_v20 = vadd.f32 1.0, %v4458_v13  ;;  %4083 = vmatmul.msk.f32.gmra.mxu1 %vm86_vm1, %v4081_v25  ;;  %v3532_v18 = vpop.f32.mrf.mxu2  ;;  %v3375_v2 = vmul.f32 -0.5, %v4458_v13  ;;  %v3378_v35 = vand.u32 2147483647, %v4458_v13  ;;  %2173 = vmatpush.msra.mxu3 %v83_v5 }
 0x2ad   :  { %v3365_v60 = vmul.f32 0.6931472, %v4460_v22  ;;  %4461 = vpow2.f32 %v3541_v43  ;;  %v6079_v61 = vadd.f32 %v5937_v33, %v3532_v18  ;;  %v82_v22 = vld [vmem:[%s6520_s3 + $0x80] sm:$0xff] }
 0x2ae   :  { %4463 = vlog2.f32 %v3372_v20  ;;  %v3376_v1 = vadd.f32 1.0, %v3375_v2  ;;  %vm3379_vm6 = vcmp.lt.f32.partialorder %v3378_v35, 0.0004427343  ;;  %v81_v2 = vld [vmem:[%s6520_s3 + $0x78] sm:$0xff]  ;;  %2174 = vmatpush.msra.mxu3 %v82_v22 }
 0x2af   :  { %v3371_v19 = vsel %vm3370_vm5, %v3368_v10, %v3365_v60  ;;  %v3538_v46 = vand.u32 2147483647, %v6079_v61  ;;  %v3354_v60 = vmax.f32 %v6063_v54, 0.0  ;;  %v6106_v54 = vld [vmem:[%s6520_s3 + $0xa0] sm:$0xff] }
 0x2b0   :  { %v3381_v36 = vadd.f32 %v3371_v19, %v3353_v40  ;;  %v3377_v20 = vmul.f32 %v4458_v13, %v3376_v1  ;;  %2175 = vmatpush.msra.mxu3 %v81_v2 }
 0x2b1   :  { %v3540_v55 = vsub.f32 0.0, %v3538_v46 }
 0x2b2   :  { %v4092_v6 = vadd.f32 -0.6931472, %v3381_v36  ;;  %2343 = vmatpush.msrb.mxu3 %v6106_v54 }
 0x2b3   :  { %v4462_v28 = vpop.eup %4461  ;;  %v3543_v29 = vmul.f32 1.442695, %v3540_v55 }
 0x2b4   :  { %v4464_v50 = vpop.eup %4463  ;;  %v3545_v25 = vadd.f32 1.0, %v4462_v28  ;;  %v3548_v37 = vmul.f32 -0.5, %v4462_v28  ;;  %v2115_v43 = vpop.f32.mrf.mxu1  ;;  %4094 = vmatmul.msk.f32.vlgmr.msrb.gmra.mxu1 %vm86_vm1, %v4092_v6  ;;  %v3551_v1 = vand.u32 2147483647, %v4462_v28 }
 0x2b5   :  { %v3374_v10 = vmul.f32 0.6931472, %v4464_v50  ;;  %4465 = vpow2.f32 %v3543_v29  ;;  %v6096_v18 = vadd.f32 %v4208_v59, %v2115_v43 }
 0x2b6   :  { %4467 = vlog2.f32 %v3545_v25  ;;  %v3549_v36 = vadd.f32 1.0, %v3548_v37  ;;  %v6113_v25 = vld [vmem:[%s6520_s3 + $0x98] sm:$0xff]  ;;  %vm3552_vm7 = vcmp.lt.f32.partialorder %v3551_v1, 0.0004427343 }
 0x2b7   :  { %v3380_v40 = vsel %vm3379_vm6, %v3377_v20, %v3374_v10  ;;  %v2123_v19 = vand.u32 2147483647, %v6096_v18  ;;  %2344 = vmatpush.msrb.mxu3 %v6113_v25  ;;  %v3535_v10 = vmax.f32 %v6069_v12, 0.0  ;;  %v3536_v12 = vmax.f32 %v6079_v61, 0.0 }
 0x2b8   :  { %v3382_v46 = vadd.f32 %v3380_v40, %v3354_v60  ;;  %v3550_v5 = vmul.f32 %v4462_v28, %v3549_v36 }
 0x2b9   :  { %v2125_v55 = vsub.f32 0.0, %v2123_v19 }
 0x2ba   :  { %v4093_v13 = vadd.f32 -0.6931472, %v3382_v46 }
 0x2bb   :  { %v4466_v6 = vpop.eup %4465  ;;  %v2127_v35 = vmul.f32 1.442695, %v2125_v55 }
 0x2bc   :  { %v4468_v23 = vpop.eup %4467  ;;  %v3554_v29 = vadd.f32 1.0, %v4466_v6  ;;  %v2118_v50 = vpop.f32.mrf.mxu1  ;;  %4095 = vmatmul.msk.f32.gmra.mxu1 %vm86_vm1, %v4093_v13  ;;  %v3557_v43 = vmul.f32 -0.5, %v4466_v6  ;;  %v3560_v46 = vand.u32 2147483647, %v4466_v6 }
 0x2bd   :  { %v3547_v37 = vmul.f32 0.6931472, %v4468_v23  ;;  %4469 = vpow2.f32 %v2127_v35  ;;  %v2119_v22 = vadd.f32 %v4208_v59, %v2118_v50 }
 0x2be   :  { %4471 = vlog2.f32 %v3554_v29  ;;  %v3558_v2 = vadd.f32 1.0, %v3557_v43  ;;  %vm3561_vm8 = vcmp.lt.f32.partialorder %v3560_v46, 0.0004427343 }
 0x2bf   :  { %v3553_v28 = vsel %vm3552_vm7, %v3550_v5, %v3547_v37  ;;  %v2124_v20 = vand.u32 2147483647, %v2119_v22 }
 0x2c0   :  { %v3563_v60 = vadd.f32 %v3553_v28, %v3535_v10  ;;  %v3559_v35 = vmul.f32 %v4466_v6, %v3558_v2  ;;  %v2121_v6 = vmax.f32 %v6096_v18, 0.0 }
 0x2c1   :  { %v2126_v40 = vsub.f32 0.0, %v2124_v20 }
 0x2c2   :  { %v4104_v19 = vadd.f32 -0.6931472, %v3563_v60 }
 0x2c3   :  { %v4470_v36 = vpop.eup %4469  ;;  %v2129_v55 = vmul.f32 1.442695, %v2126_v40 }
 0x2c4   :  { %v4472_v13 = vpop.eup %4471  ;;  %v2131_v0 = vadd.f32 1.0, %v4470_v36  ;;  %4106 = vmatmul.msk.f32.vlgmr.msra.gmra.mxu1 %vm86_vm1, %v4104_v19  ;;  %v2134_v59 = vmul.f32 -0.5, %v4470_v36  ;;  %v2137_v37 = vand.u32 2147483647, %v4470_v36 }
 0x2c5   :  { %v3556_v23 = vmul.f32 0.6931472, %v4472_v13  ;;  %4473 = vpow2.f32 %v2129_v55 }
 0x2c6   :  { %4475 = vlog2.f32 %v2131_v0  ;;  %v2135_v29 = vadd.f32 1.0, %v2134_v59  ;;  %vm2138_vm9 = vcmp.lt.f32.partialorder %v2137_v37, 0.0004427343  ;;  %v6678_v37 = vld [vmem:[#allocation13_spill] sm:$0xff] }
 0x2c7   :  { %v3562_v1 = vsel %vm3561_vm8, %v3559_v35, %v3556_v23  ;;  %v2122_v35 = vmax.f32 %v2119_v22, 0.0  ;;  %v6675_v22 = vld [vmem:[#allocation10_spill] sm:$0xff] }
 0x2c8   :  { %v3564_v5 = vadd.f32 %v3562_v1, %v3536_v12  ;;  %v2136_v60 = vmul.f32 %v4470_v36, %v2135_v29  ;;  %v6672_v12 = vld [vmem:[#allocation6_spill] sm:$0xff]  ;;  %v6673_v1 = vld [vmem:[#allocation8_spill] sm:$0xff]  ;;  %v6676_v29 = vld [vmem:[#allocation11_spill] sm:$0xff] }
 0x2ca   :  { %v4105_v50 = vadd.f32 -0.6931472, %v3564_v5  ;;  %v6674_v5 = vld [vmem:[#allocation9_spill] sm:$0xff] }
 0x2cb   :  { %v4474_v43 = vpop.eup %4473 }
 0x2cc   :  { %v4476_v10 = vpop.eup %4475  ;;  %4107 = vmatmul.msk.f32.gmra.mxu1 %vm86_vm1, %v4105_v50  ;;  %v2140_v28 = vadd.f32 1.0, %v4474_v43  ;;  %v2143_v40 = vmul.f32 -0.5, %v4474_v43  ;;  %v2146_v46 = vand.u32 2147483647, %v4474_v43  ;;  %v6677_v50 = vld [vmem:[#allocation12_spill] sm:$0xff] }
 0x2cd   :  { %v2133_v20 = vmul.f32 0.6931472, %v4476_v10  ;;  %v6680_v10 = vld [vmem:[#allocation15_spill] sm:$0xff] }
 0x2ce   :  { %4477 = vlog2.f32 %v2140_v28  ;;  %v2144_v0 = vadd.f32 1.0, %v2143_v40  ;;  %vm2147_vm10 = vcmp.lt.f32.partialorder %v2146_v46, 0.0004427343  ;;  %v6681_v28 = vld [vmem:[#allocation16_spill] sm:$0xff]  ;;  %v2195_v40 = vld [vmem:[%s6520_s3 + $0xd8] sm:$0xff] }
 0x2cf   :  { %v2139_v61 = vsel %vm2138_vm9, %v2136_v60, %v2133_v20  ;;  %v6682_v20 = vld [vmem:[#allocation17_spill] sm:$0xff]  ;;  %v2196_v60 = vld [vmem:[%s6520_s3 + $0xe0] sm:$0xff] }
 0x2d0   :  { %v2149_v2 = vadd.f32 %v2139_v61, %v2121_v6  ;;  %v2145_v23 = vmul.f32 %v4474_v43, %v2144_v0  ;;  %v6679_v43 = vld [vmem:[#allocation14_spill] sm:$0xff]  ;;  %2225 = vmatpush.msrb.mxu0 %v2196_v60  ;;  %v2194_v6 = vld [vmem:[%s6520_s3 + $0xd0] sm:$0xff]  ;;  %v6683_v61 = vld [vmem:[#allocation19_spill] sm:$0xff] }
 0x2d1   :  { %v6686_v0 = vld [vmem:[#allocation25_spill] sm:$0xff]  ;;  %v6207_v60 = vld [vmem:[%s6521_s4 + $0x5] ss:$0 sm:$0xff] }
 0x2d2   :  { %v4012_v19 = vadd.f32 -0.6931472, %v2149_v2  ;;  %2226 = vmatpush.msrb.mxu0 %v2195_v40  ;;  %v2193_v2 = vld [vmem:[%s6520_s3 + $0xc8] sm:$0xff] }
 0x2d4   :  { %v4478_v55 = vpop.eup %4477  ;;  %4014 = vmatmul.msk.f32.vlgmr.msra.gmra.mxu3 %vm86_vm1, %v4012_v19  ;;  %2227 = vmatpush.msrb.mxu0 %v2194_v6  ;;  %v4210_v19 = vld [vmem:[%s6521_s4 + $0x4] ss:$0 sm:$0xff] }
 0x2d5   :  { %v2142_v13 = vmul.f32 0.6931472, %v4478_v55  ;;  %2525 = vmatpush.msra.mxu3 %v6106_v54 }
 0x2d6   :  { %2228 = vmatpush.msrb.mxu0 %v2193_v2 }
 0x2d7   :  { %v2148_v36 = vsel %vm2147_vm10, %v2145_v23, %v2142_v13  ;;  %2526 = vmatpush.msra.mxu3 %v6113_v25  ;;  %v6687_v13 = vld [vmem:[#allocation5_spill] sm:$0xff] }
 0x2d8   :  { %v2150_v18 = vadd.f32 %v2148_v36, %v2122_v35  ;;  %2402 = vmatpush.msra.mxu0 %v5950_v57  ;;  %v6688_v35 = vld [vmem:[#allocation27_spill] sm:$0xff] }
 0x2da   :  { %v4013_v59 = vadd.f32 -0.6931472, %v2150_v18  ;;  %2403 = vmatpush.msra.mxu0 %v5959_v47 }
 0x2dc   :  { %4015 = vmatmul.msk.f32.gmra.mxu3 %vm86_vm1, %v4013_v59  ;;  %2404 = vmatpush.msra.mxu0 %v5965_v14  ;;  %v6689_v59 = vld [vmem:[#allocation7_spill] sm:$0xff] }
 0x2de   :  { %2405 = vmatpush.msra.mxu0 %v5971_v4 }
 0x2e4   :  { %4024 = vmatmul.msk.f32.vlgmr.msrb.gmra.mxu3 %vm137_vm2, %v6672_v12 }
 0x2e5   :  { %2707 = vmatpush.msrb.mxu3 %v6106_v54 }
 0x2e7   :  { %2708 = vmatpush.msrb.mxu3 %v6113_v25 }
 0x2ec   :  { %4025 = vmatmul.msk.f32.gmra.mxu3 %vm137_vm2, %v6673_v1 }
 0x2f4   :  { %4036 = vmatmul.msk.f32.vlgmr.msra.gmra.mxu3 %vm137_vm2, %v6674_v5 }
 0x2f5   :  { %2889 = vmatpush.msra.mxu3 %v6106_v54 }
 0x2f7   :  { %2890 = vmatpush.msra.mxu3 %v6113_v25 }
 0x2fc   :  { %4037 = vmatmul.msk.f32.gmra.mxu3 %vm137_vm2, %v6675_v22 }
 0x304   :  { %4048 = vmatmul.msk.f32.vlgmr.msrb.gmra.mxu3 %vm137_vm2, %v6676_v29 }
 0x305   :  { %3071 = vmatpush.msrb.mxu3 %v6106_v54 }
 0x307   :  { %3072 = vmatpush.msrb.mxu3 %v6113_v25 }
 0x30c   :  { %4049 = vmatmul.msk.f32.gmra.mxu3 %vm137_vm2, %v6677_v50 }
 0x314   :  { %4060 = vmatmul.msk.f32.vlgmr.msra.gmra.mxu3 %vm137_vm2, %v6678_v37 }
 0x315   :  { %3253 = vmatpush.msra.mxu3 %v6106_v54 }
 0x317   :  { %3254 = vmatpush.msra.mxu3 %v6113_v25 }
 0x31c   :  { %4061 = vmatmul.msk.f32.gmra.mxu3 %vm137_vm2, %v6679_v43 }
 0x324   :  { %4072 = vmatmul.msk.f32.vlgmr.msrb.gmra.mxu3 %vm137_vm2, %v6680_v10 }
 0x325   :  { %3435 = vmatpush.msrb.mxu3 %v6106_v54 }
 0x327   :  { %3436 = vmatpush.msrb.mxu3 %v6113_v25 }
 0x32c   :  { %4073 = vmatmul.msk.f32.gmra.mxu3 %vm137_vm2, %v6681_v28 }
 0x334   :  { %4084 = vmatmul.msk.f32.vlgmr.msra.gmra.mxu3 %vm137_vm2, %v6682_v20 }
 0x335   :  { %3617 = vmatpush.msra.mxu3 %v6106_v54  ;;  %v6684_v54 = vld [vmem:[#allocation21_spill] sm:$0xff] }
 0x337   :  { %3618 = vmatpush.msra.mxu3 %v6113_v25  ;;  %v6685_v25 = vld [vmem:[#allocation23_spill] sm:$0xff] }
 0x33c   :  { %4085 = vmatmul.msk.f32.gmra.mxu3 %vm137_vm2, %v6683_v61 }
 0x344   :  { %4096 = vmatmul.msk.f32.vlgmr.msrb.gmra.mxu3 %vm137_vm2, %v6684_v54 }
 0x34c   :  { %4097 = vmatmul.msk.f32.gmra.mxu3 %vm137_vm2, %v6685_v25 }
 0x354   :  { %4108 = vmatmul.msk.f32.vlgmr.msra.gmra.mxu3 %vm137_vm2, %v6686_v0 }
 0x357   :  { %v2177_v46 = vpop.f32.mrf.mxu3 }
 0x358   :  { %v2178_v55 = vadd.f32 %v4210_v19, %v2177_v46 }
 0x35a   :  { %v6187_v23 = vadd.f32 %v2178_v55, %v6687_v13 }
 0x35c   :  { %4016 = vmatmul.msk.f32.vlgmr.msrb.gmra.mxu0 %vm86_vm1, %v6187_v23  ;;  %4109 = vmatmul.msk.f32.gmra.mxu3 %vm137_vm2, %v6688_v35 }
 0x35d   :  { %2584 = vmatpush.msrb.mxu0 %v5950_v57 }
 0x35f   :  { %v2180_v36 = vpop.f32.mrf.mxu3  ;;  %2585 = vmatpush.msrb.mxu0 %v5959_v47 }
 0x360   :  { %v2181_v18 = vadd.f32 %v4210_v19, %v2180_v36 }
 0x361   :  { %2586 = vmatpush.msrb.mxu0 %v5965_v14 }
 0x362   :  { %v6197_v12 = vadd.f32 %v2181_v18, %v6689_v59 }
 0x363   :  { %2587 = vmatpush.msrb.mxu0 %v5971_v4 }
 0x364   :  { %6690 = vst [vmem:[#allocation20_spill] sm:$0xff] %v6197_v12  ;;  %4017 = vmatmul.msk.f32.gmra.mxu0 %vm86_vm1, %v6197_v12 }
 0x367   :  { %v2346_v1 = vpop.f32.mrf.mxu3 }
 0x368   :  { %v2347_v5 = vadd.f32 %v5937_v33, %v2346_v1 }
 0x36a   :  { %v2354_v22 = vand.u32 2147483647, %v2347_v5  ;;  %v2352_v18 = vmax.f32 %v2347_v5, 0.0 }
 0x36c   :  { %v2356_v29 = vsub.f32 0.0, %v2354_v22 }
 0x36e   :  { %v2358_v57 = vmul.f32 1.442695, %v2356_v29 }
 0x36f   :  { %v2349_v50 = vpop.f32.mrf.mxu3 }
 0x370   :  { %4479 = vpow2.f32 %v2358_v57  ;;  %v2350_v47 = vadd.f32 %v5937_v33, %v2349_v50 }
 0x372   :  { %v2355_v37 = vand.u32 2147483647, %v2350_v47 }
 0x374   :  { %v2357_v14 = vsub.f32 0.0, %v2355_v37 }
 0x376   :  { %v4480_v43 = vpop.eup %4479  ;;  %v2360_v10 = vmul.f32 1.442695, %v2357_v14 }
 0x377   :  { %v2362_v28 = vadd.f32 1.0, %v4480_v43  ;;  %v2365_v20 = vmul.f32 -0.5, %v4480_v43  ;;  %v2528_v4 = vpop.f32.mrf.mxu3  ;;  %v2368_v2 = vand.u32 2147483647, %v4480_v43 }
 0x378   :  { %4481 = vpow2.f32 %v2360_v10  ;;  %v6210_v40 = vadd.f32 %v6207_v60, %v2528_v4 }
 0x379   :  { %4483 = vlog2.f32 %v2362_v28  ;;  %v2366_v33 = vadd.f32 1.0, %v2365_v20  ;;  %vm2369_vm2 = vcmp.lt.f32.partialorder %v2368_v2, 0.0004427343  ;;  %v2353_v2 = vmax.f32 %v2350_v47, 0.0 }
 0x37a   :  { %v2536_v6 = vand.u32 2147483647, %v6210_v40 }
 0x37b   :  { %v2367_v19 = vmul.f32 %v4480_v43, %v2366_v33 }
 0x37c   :  { %v2538_v61 = vsub.f32 0.0, %v2536_v6 }
 0x37e   :  { %v4482_v54 = vpop.eup %4481  ;;  %v2540_v25 = vmul.f32 1.442695, %v2538_v61  ;;  %v6224_v61 = vld [vmem:[%s6520_s3 + $0xc0] sm:$0xff] }
 0x37f   :  { %v4484_v0 = vpop.eup %4483  ;;  %v2531_v46 = vpop.f32.mrf.mxu3  ;;  %v2371_v55 = vadd.f32 1.0, %v4482_v54  ;;  %v2374_v36 = vmul.f32 -0.5, %v4482_v54  ;;  %v2377_v37 = vand.u32 2147483647, %v4482_v54 }
 0x380   :  { %v2364_v13 = vmul.f32 0.6931472, %v4484_v0  ;;  %4485 = vpow2.f32 %v2540_v25  ;;  %v6214_v35 = vadd.f32 %v6207_v60, %v2531_v46 }
 0x381   :  { %4487 = vlog2.f32 %v2371_v55  ;;  %v2375_v57 = vadd.f32 1.0, %v2374_v36  ;;  %vm2378_vm11 = vcmp.lt.f32.partialorder %v2377_v37, 0.0004427343 }
 0x382   :  { %v2370_v59 = vsel %vm2369_vm2, %v2367_v19, %v2364_v13  ;;  %v2537_v1 = vand.u32 2147483647, %v6214_v35  ;;  %v6231_v19 = vld [vmem:[%s6520_s3 + $0xb8] sm:$0xff]  ;;  %v6237_v13 = vld [vmem:[%s6520_s3 + $0xb0] sm:$0xff] }
 0x383   :  { %v2380_v22 = vadd.f32 %v2370_v59, %v2352_v18  ;;  %v2376_v33 = vmul.f32 %v4482_v54, %v2375_v57 }
 0x384   :  { %v2539_v29 = vsub.f32 0.0, %v2537_v1  ;;  %v6243_v1 = vld [vmem:[%s6520_s3 + $0xa8] sm:$0xff] }
 0x385   :  { %v4026_v50 = vadd.f32 -0.6931472, %v2380_v22 }
 0x386   :  { %v4486_v14 = vpop.eup %4485  ;;  %v2542_v43 = vmul.f32 1.442695, %v2539_v29 }
 0x387   :  { %v4488_v10 = vpop.eup %4487  ;;  %v2544_v28 = vadd.f32 1.0, %v4486_v14  ;;  %v2547_v20 = vmul.f32 -0.5, %v4486_v14  ;;  %4028 = vmatmul.msk.f32.vlgmr.msra.gmra.mxu0 %vm86_vm1, %v4026_v50  ;;  %v2710_v4 = vpop.f32.mrf.mxu3  ;;  %v2550_v47 = vand.u32 2147483647, %v4486_v14 }
 0x388   :  { %4489 = vpow2.f32 %v2542_v43  ;;  %v6219_v5 = vadd.f32 %v6207_v60, %v2710_v4  ;;  %v2373_v6 = vmul.f32 0.6931472, %v4488_v10  ;;  %2766 = vmatpush.msra.mxu0 %v6224_v61 }
 0x389   :  { %4491 = vlog2.f32 %v2544_v28  ;;  %v2548_v54 = vadd.f32 1.0, %v2547_v20  ;;  %v2534_v28 = vmax.f32 %v6210_v40, 0.0  ;;  %vm2551_vm12 = vcmp.lt.f32.partialorder %v2550_v47, 0.0004427343 }
 0x38a   :  { %v2718_v25 = vand.u32 2147483647, %v6219_v5  ;;  %v2379_v0 = vsel %vm2378_vm11, %v2376_v33, %v2373_v6  ;;  %2767 = vmatpush.msra.mxu0 %v6231_v19 }
 0x38b   :  { %v2381_v46 = vadd.f32 %v2379_v0, %v2353_v2  ;;  %v2549_v29 = vmul.f32 %v4486_v14, %v2548_v54 }
 0x38c   :  { %v2720_v55 = vsub.f32 0.0, %v2718_v25  ;;  %2768 = vmatpush.msra.mxu0 %v6237_v13 }
 0x38d   :  { %v4027_v36 = vadd.f32 -0.6931472, %v2381_v46 }
 0x38e   :  { %v4490_v18 = vpop.eup %4489  ;;  %v2722_v59 = vmul.f32 1.442695, %v2720_v55  ;;  %2769 = vmatpush.msra.mxu0 %v6243_v1 }
 0x38f   :  { %v4492_v22 = vpop.eup %4491  ;;  %4029 = vmatmul.msk.f32.gmra.mxu0 %vm86_vm1, %v4027_v36  ;;  %v2713_v57 = vpop.f32.mrf.mxu3  ;;  %v2553_v50 = vadd.f32 1.0, %v4490_v18  ;;  %v2556_v10 = vmul.f32 -0.5, %v4490_v18  ;;  %v2559_v25 = vand.u32 2147483647, %v4490_v18 }
 0x390   :  { %v2546_v37 = vmul.f32 0.6931472, %v4492_v22  ;;  %4493 = vpow2.f32 %v2722_v59  ;;  %v6248_v43 = vadd.f32 %v6207_v60, %v2713_v57 }
 0x391   :  { %4495 = vlog2.f32 %v2553_v50  ;;  %v2557_v14 = vadd.f32 1.0, %v2556_v10  ;;  %vm2560_vm13 = vcmp.lt.f32.partialorder %v2559_v25, 0.0004427343 }
 0x392   :  { %v2552_v20 = vsel %vm2551_vm12, %v2549_v29, %v2546_v37  ;;  %v2719_v4 = vand.u32 2147483647, %v6248_v43  ;;  %v2535_v29 = vmax.f32 %v6214_v35, 0.0 }
 0x393   :  { %v2562_v6 = vadd.f32 %v2552_v20, %v2534_v28  ;;  %v2558_v22 = vmul.f32 %v4490_v18, %v2557_v14 }
 0x394   :  { %v2721_v33 = vsub.f32 0.0, %v2719_v4 }
 0x395   :  { %v4038_v2 = vadd.f32 -0.6931472, %v2562_v6 }
 0x396   :  { %v4494_v0 = vpop.eup %4493  ;;  %v2724_v54 = vmul.f32 1.442695, %v2721_v33 }
 0x397   :  { %v4496_v46 = vpop.eup %4495  ;;  %v2726_v55 = vadd.f32 1.0, %v4494_v0  ;;  %v2729_v36 = vmul.f32 -0.5, %v4494_v0  ;;  %4040 = vmatmul.msk.f32.vlgmr.msrb.gmra.mxu0 %vm86_vm1, %v4038_v2  ;;  %v2892_v59 = vpop.f32.mrf.mxu3  ;;  %v2732_v20 = vand.u32 2147483647, %v4494_v0 }
 0x398   :  { %4497 = vpow2.f32 %v2724_v54  ;;  %v6254_v40 = vadd.f32 %v6207_v60, %v2892_v59  ;;  %v2555_v47 = vmul.f32 0.6931472, %v4496_v46  ;;  %2948 = vmatpush.msrb.mxu0 %v6224_v61 }
 0x399   :  { %4499 = vlog2.f32 %v2726_v55  ;;  %v2730_v37 = vadd.f32 1.0, %v2729_v36  ;;  %v2716_v55 = vmax.f32 %v6219_v5, 0.0  ;;  %vm2733_vm14 = vcmp.lt.f32.partialorder %v2732_v20, 0.0004427343 }
 0x39a   :  { %v2900_v57 = vand.u32 2147483647, %v6254_v40  ;;  %v2561_v50 = vsel %vm2560_vm13, %v2558_v22, %v2555_v47  ;;  %2949 = vmatpush.msrb.mxu0 %v6231_v19 }
 0x39b   :  { %v2563_v10 = vadd.f32 %v2561_v50, %v2535_v29  ;;  %v2731_v35 = vmul.f32 %v4494_v0, %v2730_v37 }
 0x39c   :  { %v2902_v28 = vsub.f32 0.0, %v2900_v57  ;;  %2950 = vmatpush.msrb.mxu0 %v6237_v13 }
 0x39d   :  { %v4039_v4 = vadd.f32 -0.6931472, %v2563_v10 }
 0x39e   :  { %v4498_v6 = vpop.eup %4497  ;;  %v2904_v18 = vmul.f32 1.442695, %v2902_v28  ;;  %2951 = vmatpush.msrb.mxu0 %v6243_v1 }
 0x39f   :  { %v4500_v33 = vpop.eup %4499  ;;  %v2735_v14 = vadd.f32 1.0, %v4498_v6  ;;  %4041 = vmatmul.msk.f32.gmra.mxu0 %vm86_vm1, %v4039_v4  ;;  %v2895_v2 = vpop.f32.mrf.mxu3  ;;  %v2738_v54 = vmul.f32 -0.5, %v4498_v6  ;;  %v2741_v57 = vand.u32 2147483647, %v4498_v6 }
 0x3a0   :  { %v2728_v25 = vmul.f32 0.6931472, %v4500_v33  ;;  %4501 = vpow2.f32 %v2904_v18  ;;  %v6264_v46 = vadd.f32 %v6207_v60, %v2895_v2 }
 0x3a1   :  { %4503 = vlog2.f32 %v2735_v14  ;;  %v2739_v22 = vadd.f32 1.0, %v2738_v54  ;;  %vm2742_vm15 = vcmp.lt.f32.partialorder %v2741_v57, 0.0004427343 }
 0x3a2   :  { %v2734_v36 = vsel %vm2733_vm14, %v2731_v35, %v2728_v25  ;;  %v2901_v59 = vand.u32 2147483647, %v6264_v46  ;;  %v2717_v35 = vmax.f32 %v6248_v43, 0.0 }
 0x3a3   :  { %v2744_v47 = vadd.f32 %v2734_v36, %v2716_v55  ;;  %v2740_v5 = vmul.f32 %v4498_v6, %v2739_v22 }
 0x3a4   :  { %v2903_v0 = vsub.f32 0.0, %v2901_v59 }
 0x3a5   :  { %v4050_v29 = vadd.f32 -0.6931472, %v2744_v47 }
 0x3a6   :  { %v4502_v50 = vpop.eup %4501  ;;  %v2906_v37 = vmul.f32 1.442695, %v2903_v0 }
 0x3a7   :  { %v4504_v10 = vpop.eup %4503  ;;  %v2908_v28 = vadd.f32 1.0, %v4502_v50  ;;  %v2911_v4 = vmul.f32 -0.5, %v4502_v50  ;;  %4052 = vmatmul.msk.f32.vlgmr.msra.gmra.mxu0 %vm86_vm1, %v4050_v29  ;;  %v3074_v18 = vpop.f32.mrf.mxu3  ;;  %v2914_v36 = vand.u32 2147483647, %v4502_v50 }
 0x3a8   :  { %v2737_v33 = vmul.f32 0.6931472, %v4504_v10  ;;  %4505 = vpow2.f32 %v2906_v37  ;;  %v6270_v20 = vadd.f32 %v6207_v60, %v3074_v18  ;;  %3130 = vmatpush.msra.mxu0 %v6224_v61 }
 0x3a9   :  { %4507 = vlog2.f32 %v2908_v28  ;;  %v2912_v54 = vadd.f32 1.0, %v2911_v4  ;;  %v2898_v28 = vmax.f32 %v6254_v40, 0.0  ;;  %vm2915_vm0 = vcmp.lt.f32.partialorder %v2914_v36, 0.0004427343 }
 0x3aa   :  { %v2743_v14 = vsel %vm2742_vm15, %v2740_v5, %v2737_v33  ;;  %v3082_v2 = vand.u32 2147483647, %v6270_v20  ;;  %3131 = vmatpush.msra.mxu0 %v6231_v19 }
 0x3ab   :  { %v2745_v25 = vadd.f32 %v2743_v14, %v2717_v35  ;;  %v2913_v43 = vmul.f32 %v4502_v50, %v2912_v54 }
 0x3ac   :  { %v3084_v55 = vsub.f32 0.0, %v3082_v2  ;;  %3132 = vmatpush.msra.mxu0 %v6237_v13 }
 0x3ad   :  { %v4051_v6 = vadd.f32 -0.6931472, %v2745_v25  ;;  %v6284_v25 = vpop.f32.mrf.mxu1 }
 0x3ae   :  { %v4506_v59 = vpop.eup %4505  ;;  %v3086_v47 = vmul.f32 1.442695, %v3084_v55  ;;  %3133 = vmatpush.msra.mxu0 %v6243_v1 }
 0x3af   :  { %v4508_v22 = vpop.eup %4507  ;;  %v2917_v0 = vadd.f32 1.0, %v4506_v59  ;;  %4053 = vmatmul.msk.f32.gmra.mxu0 %vm86_vm1, %v4051_v6  ;;  %v3077_v29 = vpop.f32.mrf.mxu3  ;;  %v2920_v37 = vmul.f32 -0.5, %v4506_v59  ;;  %v2923_v14 = vand.u32 2147483647, %v4506_v59 }
 0x3b0   :  { %v2910_v57 = vmul.f32 0.6931472, %v4508_v22  ;;  %4509 = vpow2.f32 %v3086_v47  ;;  %v6280_v10 = vadd.f32 %v6207_v60, %v3077_v29 }
 0x3b1   :  { %4511 = vlog2.f32 %v2917_v0  ;;  %v2921_v5 = vadd.f32 1.0, %v2920_v37  ;;  %v2899_v0 = vmax.f32 %v6264_v46, 0.0  ;;  %vm2924_vm3 = vcmp.lt.f32.partialorder %v2923_v14, 0.0004427343 }
 0x3b2   :  { %v2916_v4 = vsel %vm2915_vm0, %v2913_v43, %v2910_v57  ;;  %v3083_v18 = vand.u32 2147483647, %v6280_v10 }
 0x3b3   :  { %v2926_v33 = vadd.f32 %v2916_v4, %v2898_v28  ;;  %v2922_v22 = vmul.f32 %v4506_v59, %v2921_v5 }
 0x3b4   :  { %v3085_v50 = vsub.f32 0.0, %v3083_v18 }
 0x3b5   :  { %v4062_v35 = vadd.f32 -0.6931472, %v2926_v33 }
 0x3b6   :  { %v4510_v2 = vpop.eup %4509  ;;  %v3088_v54 = vmul.f32 1.442695, %v3085_v50 }
 0x3b7   :  { %v4512_v55 = vpop.eup %4511  ;;  %v3090_v6 = vadd.f32 1.0, %v4510_v2  ;;  %v3093_v47 = vmul.f32 -0.5, %v4510_v2  ;;  %4064 = vmatmul.msk.f32.vlgmr.msrb.gmra.mxu0 %vm86_vm1, %v4062_v35  ;;  %v3256_v40 = vpop.f32.mrf.mxu3  ;;  %v3096_v18 = vand.u32 2147483647, %v4510_v2 }
 0x3b8   :  { %v2919_v36 = vmul.f32 0.6931472, %v4512_v55  ;;  %4513 = vpow2.f32 %v3088_v54  ;;  %v6288_v43 = vadd.f32 %v6207_v60, %v3256_v40  ;;  %3312 = vmatpush.msrb.mxu0 %v6224_v61  ;;  %v6297_v54 = vpop.f32.mrf.mxu1  ;;  %v3080_v40 = vmax.f32 %v6270_v20, 0.0 }
 0x3b9   :  { %4515 = vlog2.f32 %v3090_v6  ;;  %v3094_v28 = vadd.f32 1.0, %v3093_v47  ;;  %vm3097_vm4 = vcmp.lt.f32.partialorder %v3096_v18, 0.0004427343 }
 0x3ba   :  { %v2925_v29 = vsel %vm2924_vm3, %v2922_v22, %v2919_v36  ;;  %v3264_v57 = vand.u32 2147483647, %v6288_v43  ;;  %3313 = vmatpush.msrb.mxu0 %v6231_v19 }
 0x3bb   :  { %v2927_v37 = vadd.f32 %v2925_v29, %v2899_v0  ;;  %v3095_v46 = vmul.f32 %v4510_v2, %v3094_v28 }
 0x3bc   :  { %v3266_v4 = vsub.f32 0.0, %v3264_v57  ;;  %3314 = vmatpush.msrb.mxu0 %v6237_v13 }
 0x3bd   :  { %v4063_v59 = vadd.f32 -0.6931472, %v2927_v37 }
 0x3be   :  { %v4514_v33 = vpop.eup %4513  ;;  %v3268_v5 = vmul.f32 1.442695, %v3266_v4  ;;  %3315 = vmatpush.msrb.mxu0 %v6243_v1 }
 0x3bf   :  { %v4516_v50 = vpop.eup %4515  ;;  %v3099_v35 = vadd.f32 1.0, %v4514_v33  ;;  %4065 = vmatmul.msk.f32.gmra.mxu0 %vm86_vm1, %v4063_v59  ;;  %v3259_v14 = vpop.f32.mrf.mxu3  ;;  %v3102_v6 = vmul.f32 -0.5, %v4514_v33  ;;  %v3105_v37 = vand.u32 2147483647, %v4514_v33 }
 0x3c0   :  { %v3092_v55 = vmul.f32 0.6931472, %v4516_v50  ;;  %4517 = vpow2.f32 %v3268_v5  ;;  %v6300_v47 = vadd.f32 %v6207_v60, %v3259_v14 }
 0x3c1   :  { %4519 = vlog2.f32 %v3099_v35  ;;  %v3103_v0 = vadd.f32 1.0, %v3102_v6  ;;  %vm3106_vm5 = vcmp.lt.f32.partialorder %v3105_v37, 0.0004427343  ;;  %v2498_v35 = vpop.f32.mrf.mxu1 }
 0x3c2   :  { %v3098_v36 = vsel %vm3097_vm4, %v3095_v46, %v3092_v55  ;;  %v3265_v22 = vand.u32 2147483647, %v6300_v47  ;;  %v3081_v46 = vmax.f32 %v6280_v10, 0.0 }
 0x3c3   :  { %v3108_v2 = vadd.f32 %v3098_v36, %v3080_v40  ;;  %v3104_v20 = vmul.f32 %v4514_v33, %v3103_v0 }
 0x3c4   :  { %v3267_v29 = vsub.f32 0.0, %v3265_v22 }
 0x3c5   :  { %v4074_v57 = vadd.f32 -0.6931472, %v3108_v2 }
 0x3c6   :  { %v4518_v28 = vpop.eup %4517  ;;  %v3270_v4 = vmul.f32 1.442695, %v3267_v29 }
 0x3c7   :  { %v4520_v59 = vpop.eup %4519  ;;  %v3272_v50 = vadd.f32 1.0, %v4518_v28  ;;  %v3275_v5 = vmul.f32 -0.5, %v4518_v28  ;;  %4076 = vmatmul.msk.f32.vlgmr.msra.gmra.mxu0 %vm86_vm1, %v4074_v57  ;;  %v3438_v14 = vpop.f32.mrf.mxu3  ;;  %v3278_v2 = vand.u32 2147483647, %v4518_v28 }
 0x3c8   :  { %v3101_v12 = vmul.f32 0.6931472, %v4520_v59  ;;  %4521 = vpow2.f32 %v3270_v4  ;;  %v6306_v18 = vadd.f32 %v6207_v60, %v3438_v14  ;;  %3494 = vmatpush.msra.mxu0 %v6224_v61  ;;  %v3262_v14 = vmax.f32 %v6288_v43, 0.0 }
 0x3c9   :  { %4523 = vlog2.f32 %v3272_v50  ;;  %v3276_v36 = vadd.f32 1.0, %v3275_v5  ;;  %vm3279_vm6 = vcmp.lt.f32.partialorder %v3278_v2, 0.0004427343 }
 0x3ca   :  { %v3107_v55 = vsel %vm3106_vm5, %v3104_v20, %v3101_v12  ;;  %v3446_v6 = vand.u32 2147483647, %v6306_v18  ;;  %3495 = vmatpush.msra.mxu0 %v6231_v19  ;;  %v6317_v12 = vld [vmem:[%s6521_s4 + $0x6] ss:$0 sm:$0xff] }
 0x3cb   :  { %v3109_v40 = vadd.f32 %v3107_v55, %v3081_v46  ;;  %v3277_v57 = vmul.f32 %v4518_v28, %v3276_v36  ;;  %v2317_v28 = vadd.f32 %v6317_v12, %v6284_v25  ;;  %v2499_v43 = vadd.f32 %v6317_v12, %v2498_v35 }
 0x3cc   :  { %v3448_v22 = vsub.f32 0.0, %v3446_v6  ;;  %3496 = vmatpush.msra.mxu0 %v6237_v13  ;;  %v2501_v6 = vpop.f32.mrf.mxu1 }
 0x3cd   :  { %v4075_v33 = vadd.f32 -0.6931472, %v3109_v40 }
 0x3ce   :  { %v4522_v0 = vpop.eup %4521  ;;  %v3450_v29 = vmul.f32 1.442695, %v3448_v22  ;;  %3497 = vmatpush.msra.mxu0 %v6243_v1  ;;  %v2320_v22 = vadd.f32 %v6317_v12, %v6297_v54 }
 0x3cf   :  { %v4524_v10 = vpop.eup %4523  ;;  %v3281_v37 = vadd.f32 1.0, %v4522_v0  ;;  %4077 = vmatmul.msk.f32.gmra.mxu0 %vm86_vm1, %v4075_v33  ;;  %v3441_v4 = vpop.f32.mrf.mxu3  ;;  %v3284_v50 = vmul.f32 -0.5, %v4522_v0 }
 0x3d0   :  { %v3274_v59 = vmul.f32 0.6931472, %v4524_v10  ;;  %4525 = vpow2.f32 %v3450_v29  ;;  %v6321_v5 = vadd.f32 %v6207_v60, %v3441_v4  ;;  %v3287_v29 = vand.u32 2147483647, %v4522_v0 }
 0x3d1   :  { %4527 = vlog2.f32 %v3281_v37  ;;  %v3285_v40 = vadd.f32 1.0, %v3284_v50  ;;  %v2502_v4 = vadd.f32 %v6317_v12, %v2501_v6  ;;  %v2323_v35 = vmul.f32 %v2320_v22, %v5714_v41 }
 0x3d2   :  { %v3280_v20 = vsel %vm3279_vm6, %v3277_v57, %v3274_v59  ;;  %v3447_v46 = vand.u32 2147483647, %v6321_v5  ;;  %v2322_v57 = vmul.f32 %v2317_v28, %v5692_v30  ;;  %vm3288_vm7 = vcmp.lt.f32.partialorder %v3287_v29, 0.0004427343 }
 0x3d3   :  { %v3290_v55 = vadd.f32 %v3280_v20, %v3262_v14  ;;  %v3286_v20 = vmul.f32 %v4522_v0, %v3285_v40  ;;  %v2504_v28 = vmul.f32 %v2499_v43, %v5704_v34  ;;  %v2505_v40 = vmul.f32 %v2502_v4, %v5722_v31 }
 0x3d4   :  { %v3449_v36 = vsub.f32 0.0, %v3447_v46  ;;  %v3263_v46 = vmax.f32 %v6300_v47, 0.0 }
 0x3d5   :  { %v4086_v33 = vadd.f32 -0.6931472, %v3290_v55 }
 0x3d6   :  { %v4526_v10 = vpop.eup %4525  ;;  %v3452_v2 = vmul.f32 1.442695, %v3449_v36 }
 0x3d7   :  { %v4528_v37 = vpop.eup %4527  ;;  %v3454_v59 = vadd.f32 1.0, %v4526_v10  ;;  %v3457_v25 = vmul.f32 -0.5, %v4526_v10  ;;  %4088 = vmatmul.msk.f32.vlgmr.msrb.gmra.mxu0 %vm86_vm1, %v4086_v33  ;;  %v3620_v50 = vpop.f32.mrf.mxu3  ;;  %v3460_v29 = vand.u32 2147483647, %v4526_v10 }
 0x3d8   :  { %v3283_v14 = vmul.f32 0.6931472, %v4528_v37  ;;  %4529 = vpow2.f32 %v3452_v2  ;;  %v6334_v54 = vadd.f32 %v6207_v60, %v3620_v50  ;;  %3676 = vmatpush.msrb.mxu0 %v6224_v61 }
 0x3d9   :  { %4531 = vlog2.f32 %v3454_v59  ;;  %v6339_v30 = vpop.f32.mrf.mxu0  ;;  %v3458_v36 = vadd.f32 1.0, %v3457_v25  ;;  %vm3461_vm8 = vcmp.lt.f32.partialorder %v3460_v29, 0.0004427343 }
 0x3da   :  { %v3289_v55 = vsel %vm3288_vm7, %v3286_v20, %v3283_v14  ;;  %v3628_v6 = vand.u32 2147483647, %v6334_v54  ;;  %3677 = vmatpush.msrb.mxu0 %v6231_v19  ;;  %v2324_v0 = vperm.slane %v6339_v30, 0  ;;  %v2506_v41 = vperm.slane %v6339_v30, 2 }
 0x3db   :  { %v3291_v61 = vadd.f32 %v3289_v55, %v3263_v46  ;;  %v3459_v4 = vmul.f32 %v4526_v10, %v3458_v36  ;;  %v3444_v14 = vmax.f32 %v6306_v18, 0.0  ;;  %v3445_v18 = vmax.f32 %v6321_v5, 0.0 }
 0x3dc   :  { %v3630_v47 = vsub.f32 0.0, %v3628_v6  ;;  %3678 = vmatpush.msrb.mxu0 %v6237_v13  ;;  %v6348_v22 = vmul.f32 %v2324_v0, %v2322_v57  ;;  %v6350_v33 = vmul.f32 %v2324_v0, %v2323_v35  ;;  %v6352_v43 = vmul.f32 %v2506_v41, %v2504_v28 }
 0x3dd   :  { %v4087_v34 = vadd.f32 -0.6931472, %v3291_v61  ;;  %v6354_v19 = vmul.f32 %v2506_v41, %v2505_v40 }
 0x3de   :  { %v4530_v2 = vpop.eup %4529  ;;  %v3632_v37 = vmul.f32 1.442695, %v3630_v47  ;;  %3679 = vmatpush.msrb.mxu0 %v6243_v1 }
 0x3df   :  { %v4532_v31 = vpop.eup %4531  ;;  %v3463_v59 = vadd.f32 1.0, %v4530_v2  ;;  %4089 = vmatmul.msk.f32.gmra.mxu0 %vm86_vm1, %v4087_v34  ;;  %v3623_v13 = vpop.f32.mrf.mxu3  ;;  %v3466_v25 = vmul.f32 -0.5, %v4530_v2  ;;  %v3469_v10 = vand.u32 2147483647, %v4530_v2 }
 0x3e0   :  { %v3456_v57 = vmul.f32 0.6931472, %v4532_v31  ;;  %4533 = vpow2.f32 %v3632_v37  ;;  %v3624_v50 = vadd.f32 %v6207_v60, %v3623_v13 }
 0x3e1   :  { %4535 = vlog2.f32 %v3463_v59  ;;  %v3467_v28 = vadd.f32 1.0, %v3466_v25  ;;  %vm3470_vm9 = vcmp.lt.f32.partialorder %v3469_v10, 0.0004427343 }
 0x3e2   :  { %v3462_v20 = vsel %vm3461_vm8, %v3459_v4, %v3456_v57  ;;  %v3629_v35 = vand.u32 2147483647, %v3624_v50 }
 0x3e3   :  { %v3472_v46 = vadd.f32 %v3462_v20, %v3444_v14  ;;  %v3468_v41 = vmul.f32 %v4530_v2, %v3467_v28  ;;  %v3626_v2 = vmax.f32 %v6334_v54, 0.0 }
 0x3e4   :  { %v3631_v1 = vsub.f32 0.0, %v3629_v35 }
 0x3e5   :  { %v4098_v55 = vadd.f32 -0.6931472, %v3472_v46 }
 0x3e6   :  { %v4534_v6 = vpop.eup %4533  ;;  %v3634_v0 = vmul.f32 1.442695, %v3631_v1 }
 0x3e7   :  { %v4536_v40 = vpop.eup %4535  ;;  %v3636_v61 = vadd.f32 1.0, %v4534_v6  ;;  %4100 = vmatmul.msk.f32.vlgmr.msra.gmra.mxu0 %vm86_vm1, %v4098_v55  ;;  %v3639_v60 = vmul.f32 -0.5, %v4534_v6  ;;  %v3642_v31 = vand.u32 2147483647, %v4534_v6 }
 0x3e8   :  { %v3465_v36 = vmul.f32 0.6931472, %v4536_v40  ;;  %4537 = vpow2.f32 %v3634_v0  ;;  %v3627_v0 = vmax.f32 %v3624_v50, 0.0 }
 0x3e9   :  { %4539 = vlog2.f32 %v3636_v61  ;;  %v3640_v29 = vadd.f32 1.0, %v3639_v60  ;;  %vm3643_vm10 = vcmp.lt.f32.partialorder %v3642_v31, 0.0004427343 }
 0x3ea   :  { %v3471_v47 = vsel %vm3470_vm9, %v3468_v41, %v3465_v36  ;;  %v6365_v36 = vpop.f32.mrf.mxu0 }
 0x3eb   :  { %v3473_v34 = vadd.f32 %v3471_v47, %v3445_v18  ;;  %v3641_v25 = vmul.f32 %v4534_v6, %v3640_v29  ;;  %v2680_v6 = vpop.f32.mrf.mxu1 }
 0x3ed   :  { %v4099_v37 = vadd.f32 -0.6931472, %v3473_v34  ;;  %v2415_v34 = vperm.slane %v6339_v30, 1 }
 0x3ee   :  { %v4538_v4 = vpop.eup %4537 }
 0x3ef   :  { %v4540_v59 = vpop.eup %4539  ;;  %v3645_v13 = vadd.f32 1.0, %v4538_v4  ;;  %4101 = vmatmul.msk.f32.gmra.mxu0 %vm86_vm1, %v4099_v37  ;;  %v3648_v14 = vmul.f32 -0.5, %v4538_v4  ;;  %v3651_v28 = vand.u32 2147483647, %v4538_v4 }
 0x3f0   :  { %v3638_v57 = vmul.f32 0.6931472, %v4540_v59 }
 0x3f1   :  { %4541 = vlog2.f32 %v3645_v13  ;;  %v3649_v35 = vadd.f32 1.0, %v3648_v14  ;;  %vm3652_vm2 = vcmp.lt.f32.partialorder %v3651_v28, 0.0004427343 }
 0x3f2   :  { %v3644_v5 = vsel %vm3643_vm10, %v3641_v25, %v3638_v57 }
 0x3f3   :  { %v3654_v20 = vadd.f32 %v3644_v5, %v3626_v2  ;;  %v3650_v10 = vmul.f32 %v4538_v4, %v3649_v35  ;;  %v2683_v18 = vpop.f32.mrf.mxu1  ;;  %v2681_v2 = vadd.f32 %v6317_v12, %v2680_v6  ;;  %v2688_v35 = vperm.slane %v6339_v30, 4 }
 0x3f5   :  { %v4110_v46 = vadd.f32 -0.6931472, %v3654_v20  ;;  %v2597_v20 = vperm.slane %v6339_v30, 3 }
 0x3f7   :  { %v4542_v1 = vpop.eup %4541  ;;  %4112 = vmatmul.msk.f32.vlgmr.msrb.gmra.mxu0 %vm86_vm1, %v4110_v46 }
 0x3f8   :  { %v3647_v55 = vmul.f32 0.6931472, %v4542_v1 }
 0x3fa   :  { %v3653_v40 = vsel %vm3652_vm2, %v3650_v10, %v3647_v55  ;;  %v2684_v55 = vadd.f32 %v6317_v12, %v2683_v18  ;;  %v2779_v18 = vperm.slane %v6339_v30, 5 }
 0x3fb   :  { %v3655_v61 = vadd.f32 %v3653_v40, %v3627_v0  ;;  %v2862_v13 = vpop.f32.mrf.mxu1 }
 0x3fd   :  { %v4111_v54 = vadd.f32 -0.6931472, %v3655_v61 }
 0x3ff   :  { %4113 = vmatmul.msk.f32.gmra.mxu0 %vm86_vm1, %v4111_v54 }
 0x403   :  { %v2865_v46 = vpop.f32.mrf.mxu1 }
 0x404   :  { %v2407_v41 = vpop.f32.mrf.mxu0 }
 0x405   :  { %v2408_v60 = vadd.f32 %v6317_v12, %v2407_v41 }
 0x407   :  { %v2413_v47 = vmul.f32 %v2408_v60, %v5696_v62 }
 0x409   :  { %v2416_v29 = vmul.f32 %v2415_v34, %v2413_v47 }
 0x40b   :  { %v2418_v50 = vadd.f32 %v2416_v29, %v6348_v22  ;;  %v3044_v54 = vpop.f32.mrf.mxu1  ;;  %v2870_v29 = vperm.slane %v6339_v30, 6 }
 0x40c   :  { %v2410_v37 = vpop.f32.mrf.mxu0 }
 0x40d   :  { %v2411_v31 = vadd.f32 %v6317_v12, %v2410_v37  ;;  %v2509_v4 = vadd.f32 %v6352_v43, %v2418_v50  ;;  %v2686_v43 = vmul.f32 %v2681_v2, %v5769_v49  ;;  %v2863_v49 = vadd.f32 %v6317_v12, %v2862_v13 }
 0x40f   :  { %v2414_v59 = vmul.f32 %v2411_v31, %v5716_v7  ;;  %v2689_v1 = vmul.f32 %v2688_v35, %v2686_v43  ;;  %v2961_v43 = vperm.slane %v6339_v30, 7 }
 0x411   :  { %v2417_v57 = vmul.f32 %v2415_v34, %v2414_v59 }
 0x413   :  { %v2419_v25 = vadd.f32 %v2417_v57, %v6350_v33  ;;  %v3047_v57 = vpop.f32.mrf.mxu1 }
 0x414   :  { %v2589_v14 = vpop.f32.mrf.mxu0 }
 0x415   :  { %v2590_v62 = vadd.f32 %v6317_v12, %v2589_v14  ;;  %v2510_v5 = vadd.f32 %v6354_v19, %v2419_v25 }
 0x417   :  { %v2595_v22 = vmul.f32 %v2590_v62, %v5706_v17  ;;  %v2687_v17 = vmul.f32 %v2684_v55, %v5744_v32  ;;  %v3048_v55 = vadd.f32 %v6317_v12, %v3047_v57  ;;  %v2199_v57 = vld [vmem:[%s6520_s3 + $0xf8] sm:$0xff] }
 0x419   :  { %v2598_v7 = vmul.f32 %v2597_v20, %v2595_v22  ;;  %v2690_v6 = vmul.f32 %v2688_v35, %v2687_v17 }
 0x41b   :  { %v2600_v28 = vadd.f32 %v2598_v7, %v2509_v4  ;;  %v2866_v4 = vadd.f32 %v6317_v12, %v2865_v46  ;;  %v3052_v7 = vperm.slane %v6365_v36, 0  ;;  %v3226_v46 = vpop.f32.mrf.mxu1 }
 0x41c   :  { %v2592_v33 = vpop.f32.mrf.mxu0 }
 0x41d   :  { %v2593_v10 = vadd.f32 %v6317_v12, %v2592_v33  ;;  %v2691_v0 = vadd.f32 %v2689_v1, %v2600_v28 }
 0x41f   :  { %v2596_v19 = vmul.f32 %v2593_v10, %v5736_v39  ;;  %v2868_v39 = vmul.f32 %v2863_v49, %v5797_v58  ;;  %v3045_v58 = vadd.f32 %v6317_v12, %v3044_v54 }
 0x421   :  { %v2599_v40 = vmul.f32 %v2597_v20, %v2596_v19  ;;  %v2871_v37 = vmul.f32 %v2870_v29, %v2868_v39 }
 0x423   :  { %v2601_v61 = vadd.f32 %v2599_v40, %v2510_v5  ;;  %v3229_v30 = vpop.f32.mrf.mxu1 }
 0x424   :  { %v2771_v41 = vpop.f32.mrf.mxu0 }
 0x425   :  { %v2772_v60 = vadd.f32 %v6317_v12, %v2771_v41  ;;  %v2692_v47 = vadd.f32 %v2690_v6, %v2601_v61 }
 0x427   :  { %v2777_v34 = vmul.f32 %v2772_v60, %v5724_v9  ;;  %v2869_v9 = vmul.f32 %v2866_v4, %v5760_v48  ;;  %v3143_v60 = vperm.slane %v6365_v36, 1 }
 0x429   :  { %v2780_v50 = vmul.f32 %v2779_v18, %v2777_v34  ;;  %v2872_v62 = vmul.f32 %v2870_v29, %v2869_v9 }
 0x42b   :  { %v2782_v32 = vadd.f32 %v2780_v50, %v2691_v0  ;;  %v3408_v29 = vpop.f32.mrf.mxu1  ;;  %v3230_v50 = vadd.f32 %v6317_v12, %v3229_v30 }
 0x42c   :  { %v2774_v31 = vpop.f32.mrf.mxu0  ;;  %v3409_v9 = vadd.f32 %v6317_v12, %v3408_v29 }
 0x42d   :  { %v2775_v59 = vadd.f32 %v6317_v12, %v2774_v31  ;;  %v2873_v13 = vadd.f32 %v2871_v37, %v2782_v32 }
 0x42f   :  { %v2778_v25 = vmul.f32 %v2775_v59, %v5836_v21  ;;  %v3050_v21 = vmul.f32 %v3045_v58, %v5748_v53  ;;  %v3227_v53 = vadd.f32 %v6317_v12, %v3226_v46  ;;  %v3414_v58 = vmul.f32 %v3409_v9, %v5821_v3  ;;  %v2203_v9 = vld [vmem:[%s6520_s3 + $0x110] sm:$0xff] }
 0x431   :  { %v2781_v14 = vmul.f32 %v2779_v18, %v2778_v25  ;;  %v3053_v1 = vmul.f32 %v3052_v7, %v3050_v21 }
 0x433   :  { %v2783_v2 = vadd.f32 %v2781_v14, %v2692_v47  ;;  %v3234_v47 = vperm.slane %v6365_v36, 2 }
 0x434   :  { %v2953_v5 = vpop.f32.mrf.mxu0 }
 0x435   :  { %v2954_v22 = vadd.f32 %v6317_v12, %v2953_v5  ;;  %v2874_v20 = vadd.f32 %v2872_v62, %v2783_v2  ;;  %v3411_v2 = vpop.f32.mrf.mxu1  ;;  %v3325_v62 = vperm.slane %v6365_v36, 3  ;;  %v3416_v5 = vperm.slane %v6365_v36, 4 }
 0x437   :  { %v2959_v35 = vmul.f32 %v2954_v22, %v5734_v42  ;;  %v3051_v42 = vmul.f32 %v3048_v55, %v5827_v63 }
 0x439   :  { %v2962_v28 = vmul.f32 %v2961_v43, %v2959_v35  ;;  %v3054_v61 = vmul.f32 %v3052_v7, %v3051_v42  ;;  %v3417_v35 = vmul.f32 %v3416_v5, %v3414_v58  ;;  %v2197_v7 = vld [vmem:[%s6520_s3 + $0xe8] sm:$0xff] }
 0x43b   :  { %v2964_v48 = vadd.f32 %v2962_v28, %v2873_v13 }
 0x43c   :  { %v2956_v33 = vpop.f32.mrf.mxu0 }
 0x43d   :  { %v2957_v10 = vadd.f32 %v6317_v12, %v2956_v33  ;;  %v3055_v0 = vadd.f32 %v3053_v1, %v2964_v48  ;;  %v3590_v48 = vpop.f32.mrf.mxu1 }
 0x43f   :  { %v2960_v19 = vmul.f32 %v2957_v10, %v5786_v51  ;;  %v3232_v51 = vmul.f32 %v3227_v53, %v5784_v15  ;;  %v2200_v15 = vld [vmem:[%s6520_s3 + $0x100] sm:$0xff] }
 0x440   :  { %3713 = vmatpush.msra.mxu2 %v2200_v15  ;;  %v4211_v15 = vld [vmem:[%s6521_s4 + $0x7] ss:$0 sm:$0xff] }
 0x441   :  { %v2963_v17 = vmul.f32 %v2961_v43, %v2960_v19  ;;  %v3235_v18 = vmul.f32 %v3234_v47, %v3232_v51  ;;  %v2198_v43 = vld [vmem:[%s6520_s3 + $0xf0] sm:$0xff]  ;;  %v3591_v19 = vadd.f32 %v6317_v12, %v3590_v48 }
 0x442   :  { %3714 = vmatpush.msra.mxu2 %v2199_v57 }
 0x443   :  { %v2965_v40 = vadd.f32 %v2963_v17, %v2874_v20 }
 0x444   :  { %v3135_v6 = vpop.f32.mrf.mxu0  ;;  %3715 = vmatpush.msra.mxu2 %v2198_v43 }
 0x445   :  { %v3136_v54 = vadd.f32 %v6317_v12, %v3135_v6  ;;  %v3056_v41 = vadd.f32 %v3054_v61, %v2965_v40  ;;  %v3507_v40 = vperm.slane %v6365_v36, 5  ;;  %v3598_v61 = vperm.slane %v6365_v36, 6  ;;  %v3593_v53 = vpop.f32.mrf.mxu1 }
 0x446   :  { %3716 = vmatpush.msra.mxu2 %v2197_v7 }
 0x447   :  { %v3141_v49 = vmul.f32 %v3136_v54, %v5758_v24  ;;  %v3233_v24 = vmul.f32 %v3230_v50, %v5901_v45 }
 0x449   :  { %v3144_v34 = vmul.f32 %v3143_v60, %v3141_v49  ;;  %v3236_v13 = vmul.f32 %v3234_v47, %v3233_v24  ;;  %v3594_v49 = vadd.f32 %v6317_v12, %v3593_v53 }
 0x44b   :  { %v3146_v63 = vadd.f32 %v3144_v34, %v3055_v0 }
 0x44c   :  { %v3138_v39 = vpop.f32.mrf.mxu0 }
 0x44d   :  { %v3139_v32 = vadd.f32 %v6317_v12, %v3138_v39  ;;  %v3237_v37 = vadd.f32 %v3235_v18, %v3146_v63 }
 0x44f   :  { %v3142_v31 = vmul.f32 %v3139_v32, %v5863_v26  ;;  %v3689_v32 = vperm.slane %v6365_v36, 7  ;;  %v2205_v36 = vld [vmem:[%s6520_s3 + $0x120] sm:$0xff] }
 0x450   :  { %3775 = vmatpush.msrb.mxu1 %v2205_v36 }
 0x451   :  { %v3145_v4 = vmul.f32 %v3143_v60, %v3142_v31 }
 0x453   :  { %v3147_v59 = vadd.f32 %v3145_v4, %v3056_v41 }
 0x454   :  { %v3317_v25 = vpop.f32.mrf.mxu0 }
 0x455   :  { %v3318_v14 = vadd.f32 %v6317_v12, %v3317_v25  ;;  %v3238_v26 = vadd.f32 %v3236_v13, %v3147_v59 }
 0x457   :  { %v3323_v45 = vmul.f32 %v3318_v14, %v5873_v52  ;;  %v3412_v52 = vadd.f32 %v6317_v12, %v3411_v2 }
 0x459   :  { %v3326_v22 = vmul.f32 %v3325_v62, %v3323_v45  ;;  %v3415_v1 = vmul.f32 %v3412_v52, %v5916_v16 }
 0x45b   :  { %v3328_v20 = vadd.f32 %v3326_v22, %v3237_v37  ;;  %v3418_v10 = vmul.f32 %v3416_v5, %v3415_v1  ;;  %v3790_v5 = vld [vmem:[%s6520_s3 + $0x138] sm:$0xff]  ;;  %v3789_v22 = vld [vmem:[%s6520_s3 + $0x130] sm:$0xff] }
 0x45c   :  { %v3320_v46 = vpop.f32.mrf.mxu0 }
 0x45d   :  { %v3321_v21 = vadd.f32 %v6317_v12, %v3320_v46  ;;  %v3419_v28 = vadd.f32 %v3417_v35, %v3328_v20 }
 0x45f   :  { %v3324_v3 = vmul.f32 %v3321_v21, %v5898_v11  ;;  %v3596_v11 = vmul.f32 %v3591_v19, %v5892_v27 }
 0x461   :  { %v3327_v33 = vmul.f32 %v3325_v62, %v3324_v3  ;;  %v3599_v54 = vmul.f32 %v3598_v61, %v3596_v11  ;;  %v3791_v62 = vld [vmem:[%s6520_s3 + $0x140] sm:$0xff] }
 0x462   :  { %3812 = vmatpush.msrb.mxu3 %v3791_v62 }
 0x463   :  { %v3329_v55 = vadd.f32 %v3327_v33, %v3238_v26  ;;  %v2202_v26 = vld [vmem:[%s6520_s3 + $0x108] sm:$0xff] }
 0x464   :  { %v3499_v0 = vpop.f32.mrf.mxu0  ;;  %3813 = vmatpush.msrb.mxu3 %v3790_v5 }
 0x465   :  { %v3500_v42 = vadd.f32 %v6317_v12, %v3499_v0  ;;  %v3420_v17 = vadd.f32 %v3418_v10, %v3329_v55 }
 0x466   :  { %3814 = vmatpush.msrb.mxu3 %v3789_v22 }
 0x467   :  { %v3505_v30 = vmul.f32 %v3500_v42, %v5859_v44  ;;  %v3597_v44 = vmul.f32 %v3594_v49, %v5943_v56  ;;  %v3788_v49 = vld [vmem:[%s6520_s3 + $0x128] sm:$0xff] }
 0x468   :  { %3815 = vmatpush.msrb.mxu3 %v3788_v49 }
 0x469   :  { %v3508_v6 = vmul.f32 %v3507_v40, %v3505_v30  ;;  %v3600_v18 = vmul.f32 %v3598_v61, %v3597_v44 }
 0x46b   :  { %v3510_v16 = vadd.f32 %v3508_v6, %v3419_v28 }
 0x46c   :  { %v3502_v41 = vpop.f32.mrf.mxu0 }
 0x46d   :  { %v3503_v60 = vadd.f32 %v6317_v12, %v3502_v41  ;;  %v3601_v47 = vadd.f32 %v3599_v54, %v3510_v16 }
 0x46f   :  { %v3506_v51 = vmul.f32 %v3503_v60, %v5931_v8  ;;  %v6691_v8 = vld [vmem:[#allocation18_spill] sm:$0xff]  ;;  %v4212_v60 = vld [vmem:[%s6521_s4 + $0x8] ss:$0 sm:$0xff] }
 0x471   :  { %v3509_v34 = vmul.f32 %v3507_v40, %v3506_v51 }
 0x473   :  { %v3511_v63 = vadd.f32 %v3509_v34, %v3420_v17 }
 0x474   :  { %v3681_v29 = vpop.f32.mrf.mxu0 }
 0x475   :  { %v3682_v27 = vadd.f32 %v6317_v12, %v3681_v29  ;;  %v3602_v39 = vadd.f32 %v3600_v18, %v3511_v63  ;;  %v6692_v18 = vld [vmem:[#allocation20_spill] sm:$0xff] }
 0x477   :  { %v3687_v50 = vmul.f32 %v3682_v27, %v5920_v38  ;;  %v4213_v27 = vld [vmem:[%s6521_s4 + $0x9] ss:$0 sm:$0xff] }
 0x479   :  { %v3690_v37 = vmul.f32 %v3689_v32, %v3687_v50  ;;  %v3858_v50 = vld [vmem:[%s6520_s3 + $0x160] sm:$0xff] }
 0x47a   :  { %3879 = vmatpush.msra.mxu0 %v3858_v50 }
 0x47b   :  { %v3692_v31 = vadd.f32 %v3690_v37, %v3601_v47 }
 0x47c   :  { %v3684_v24 = vpop.f32.mrf.mxu0 }
 0x47d   :  { %v3685_v4 = vadd.f32 %v6317_v12, %v3684_v24  ;;  %4114 = vmatmul.msk.f32.vlgmr.msra.gmra.mxu2 %vm86_vm1, %v3692_v31  ;;  %v2204_v12 = vld [vmem:[%s6520_s3 + $0x118] sm:$0xff]  ;;  %v3856_v31 = vld [vmem:[%s6520_s3 + $0x150] sm:$0xff] }
 0x47e   :  { %3776 = vmatpush.msrb.mxu1 %v2204_v12 }
 0x47f   :  { %v3688_v56 = vmul.f32 %v3685_v4, %v6691_v8  ;;  %v3855_v4 = vld [vmem:[%s6520_s3 + $0x148] sm:$0xff] }
 0x480   :  { %3777 = vmatpush.msrb.mxu1 %v2203_v9 }
 0x481   :  { %v3691_v59 = vmul.f32 %v3689_v32, %v3688_v56 }
 0x482   :  { %3778 = vmatpush.msrb.mxu1 %v2202_v26 }
 0x483   :  { %v3693_v13 = vadd.f32 %v3691_v59, %v3602_v39 }
 0x485   :  { %4115 = vmatmul.msk.f32.gmra.mxu2 %vm86_vm1, %v3693_v13 }
 0x500   :  { %v3718_v38 = vpop.f32.mrf.mxu2 }
 0x501   :  { %v3719_v57 = vadd.f32 %v4211_v15, %v3718_v38 }
 0x503   :  { %v3726_v25 = vand.u32 2147483647, %v3719_v57  ;;  %v3724_v0 = vmax.f32 %v3719_v57, 0.0 }
 0x505   :  { %v3728_v14 = vsub.f32 0.0, %v3726_v25 }
 0x507   :  { %v3730_v2 = vmul.f32 1.442695, %v3728_v14 }
 0x508   :  { %v3721_v45 = vpop.f32.mrf.mxu2 }
 0x509   :  { %4543 = vpow2.f32 %v3730_v2  ;;  %v3722_v58 = vadd.f32 %v4211_v15, %v3721_v45 }
 0x50b   :  { %v3727_v20 = vand.u32 2147483647, %v3722_v58  ;;  %v3725_v53 = vmax.f32 %v3722_v58, 0.0 }
 0x50d   :  { %v3729_v35 = vsub.f32 0.0, %v3727_v20 }
 0x50f   :  { %v4544_v43 = vpop.eup %4543  ;;  %v3732_v7 = vmul.f32 1.442695, %v3729_v35 }
 0x510   :  { %v3734_v46 = vadd.f32 1.0, %v4544_v43  ;;  %v3737_v52 = vmul.f32 -0.5, %v4544_v43  ;;  %v3740_v28 = vand.u32 2147483647, %v4544_v43 }
 0x511   :  { %4545 = vpow2.f32 %v3732_v7 }
 0x512   :  { %4547 = vlog2.f32 %v3734_v46  ;;  %v3738_v21 = vadd.f32 1.0, %v3737_v52  ;;  %vm3741_vm11 = vcmp.lt.f32.partialorder %v3740_v28, 0.0004427343 }
 0x514   :  { %v3739_v55 = vmul.f32 %v4544_v43, %v3738_v21 }
 0x517   :  { %v4546_v3 = vpop.eup %4545 }
 0x518   :  { %v4548_v48 = vpop.eup %4547  ;;  %v3743_v1 = vadd.f32 1.0, %v4546_v3  ;;  %v3746_v10 = vmul.f32 -0.5, %v4546_v3  ;;  %v3749_v40 = vand.u32 2147483647, %v4546_v3 }
 0x519   :  { %v3736_v33 = vmul.f32 0.6931472, %v4548_v48 }
 0x51a   :  { %4549 = vlog2.f32 %v3743_v1  ;;  %v3747_v17 = vadd.f32 1.0, %v3746_v10  ;;  %vm3750_vm12 = vcmp.lt.f32.partialorder %v3749_v40, 0.0004427343 }
 0x51b   :  { %v3742_v19 = vsel %vm3741_vm11, %v3739_v55, %v3736_v33  ;;  %v4214_v33 = vld [vmem:[%s6521_s4 + $0xa] ss:$0 sm:$0xff] }
 0x51c   :  { %v3752_v42 = vadd.f32 %v3742_v19, %v3724_v0  ;;  %v3748_v6 = vmul.f32 %v4546_v3, %v3747_v17 }
 0x51e   :  { %v4116_v30 = vadd.f32 -0.6931472, %v3752_v42 }
 0x520   :  { %v4550_v61 = vpop.eup %4549  ;;  %4118 = vmatmul.msk.f32.vlgmr.msrb.gmra.mxu1 %vm86_vm1, %v4116_v30 }
 0x521   :  { %v3745_v11 = vmul.f32 0.6931472, %v4550_v61 }
 0x523   :  { %v3751_v16 = vsel %vm3750_vm12, %v3748_v6, %v3745_v11 }
 0x524   :  { %v3753_v54 = vadd.f32 %v3751_v16, %v3725_v53 }
 0x526   :  { %v4117_v41 = vadd.f32 -0.6931472, %v3753_v54 }
 0x528   :  { %4119 = vmatmul.msk.f32.gmra.mxu1 %vm86_vm1, %v4117_v41 }
 0x59d   :  { %v3780_v47 = vpop.f32.mrf.mxu1 }
 0x59e   :  { %v3781_v51 = vadd.f32 %v4212_v60, %v3780_v47 }
 0x5a0   :  { %v3786_v44 = vadd.f32 %v3781_v51, %v6187_v23  ;;  %v3857_v23 = vld [vmem:[%s6520_s3 + $0x158] sm:$0xff] }
 0x5a1   :  { %3880 = vmatpush.msra.mxu0 %v3857_v23 }
 0x5a2   :  { %4120 = vmatmul.msk.f32.vlgmr.msrb.gmra.mxu3 %vm86_vm1, %v3786_v44 }
 0x5a3   :  { %3881 = vmatpush.msra.mxu0 %v3856_v31 }
 0x5a5   :  { %v3783_v34 = vpop.f32.mrf.mxu1  ;;  %3882 = vmatpush.msra.mxu0 %v3855_v4 }
 0x5a6   :  { %v3784_v63 = vadd.f32 %v4212_v60, %v3783_v34 }
 0x5a8   :  { %v3787_v29 = vadd.f32 %v3784_v63, %v6692_v18 }
 0x5aa   :  { %4121 = vmatmul.msk.f32.gmra.mxu3 %vm86_vm1, %v3787_v29 }
 0x625   :  { %v3817_v39 = vpop.f32.mrf.mxu3 }
 0x626   :  { %v3818_v32 = vadd.f32 %v4213_v27, %v3817_v39 }
 0x628   :  { %v3825_v37 = vand.u32 2147483647, %v3818_v32  ;;  %v3823_v58 = vmax.f32 %v3818_v32, 0.0 }
 0x62a   :  { %v3827_v24 = vsub.f32 0.0, %v3825_v37 }
 0x62c   :  { %v3829_v8 = vmul.f32 1.442695, %v3827_v24 }
 0x62d   :  { %v3820_v56 = vpop.f32.mrf.mxu3 }
 0x62e   :  { %4551 = vpow2.f32 %v3829_v8  ;;  %v3821_v59 = vadd.f32 %v4213_v27, %v3820_v56 }
 0x630   :  { %v3826_v13 = vand.u32 2147483647, %v3821_v59  ;;  %v3824_v28 = vmax.f32 %v3821_v59, 0.0 }
 0x632   :  { %v3828_v15 = vsub.f32 0.0, %v3826_v13 }
 0x634   :  { %v4552_v38 = vpop.eup %4551  ;;  %v3831_v36 = vmul.f32 1.442695, %v3828_v15 }
 0x635   :  { %v3833_v57 = vadd.f32 1.0, %v4552_v38  ;;  %v3836_v12 = vmul.f32 -0.5, %v4552_v38  ;;  %v3839_v9 = vand.u32 2147483647, %v4552_v38 }
 0x636   :  { %4553 = vpow2.f32 %v3831_v36 }
 0x637   :  { %4555 = vlog2.f32 %v3833_v57  ;;  %v3837_v25 = vadd.f32 1.0, %v3836_v12  ;;  %vm3840_vm13 = vcmp.lt.f32.partialorder %v3839_v9, 0.0004427343 }
 0x639   :  { %v3838_v62 = vmul.f32 %v4552_v38, %v3837_v25 }
 0x63c   :  { %v4554_v14 = vpop.eup %4553 }
 0x63d   :  { %v4556_v26 = vpop.eup %4555  ;;  %v3842_v2 = vadd.f32 1.0, %v4554_v14  ;;  %v3845_v5 = vmul.f32 -0.5, %v4554_v14  ;;  %v3848_v7 = vand.u32 2147483647, %v4554_v14 }
 0x63e   :  { %v3835_v45 = vmul.f32 0.6931472, %v4556_v26 }
 0x63f   :  { %4557 = vlog2.f32 %v3842_v2  ;;  %v3846_v35 = vadd.f32 1.0, %v3845_v5  ;;  %vm3849_vm14 = vcmp.lt.f32.partialorder %v3848_v7, 0.0004427343 }
 0x640   :  { %v3841_v22 = vsel %vm3840_vm13, %v3838_v62, %v3835_v45 }
 0x641   :  { %v3851_v20 = vadd.f32 %v3841_v22, %v3823_v58  ;;  %v3847_v21 = vmul.f32 %v4554_v14, %v3846_v35 }
 0x643   :  { %v4122_v43 = vadd.f32 -0.6931472, %v3851_v20 }
 0x645   :  { %v4558_v46 = vpop.eup %4557  ;;  %4124 = vmatmul.msk.f32.vlgmr.msra.gmra.mxu0 %vm86_vm1, %v4122_v43 }
 0x646   :  { %v3844_v52 = vmul.f32 0.6931472, %v4558_v46 }
 0x648   :  { %v3850_v3 = vsel %vm3849_vm14, %v3847_v21, %v3844_v52 }
 0x649   :  { %v3852_v48 = vadd.f32 %v3850_v3, %v3824_v28 }
 0x64b   :  { %v4123_v1 = vadd.f32 -0.6931472, %v3852_v48 }
 0x64d   :  { %4125 = vmatmul.msk.f32.gmra.mxu0 %vm86_vm1, %v4123_v1 }
 0x6c2   :  { %v3884_v55 = vpop.f32.mrf.mxu0 }
 0x6c3   :  { %v3885_v10 = vadd.f32 %v4214_v33, %v3884_v55 }
 0x6c5   :  { %3890 = vst.msk [vmem:[#allocation2] sm:$0xff] %vm86_vm1, %v3885_v10 }
 0x6ca   :  { %v3887_v0 = vpop.f32.mrf.mxu0 }
 0x6cb   :  { %v3888_v19 = vadd.f32 %v4214_v33, %v3887_v0 }
 0x6cd   :  { %3891 = vst.msk [vmem:[#allocation2 + $0x8] sm:$0xff] %vm86_vm1, %v3888_v19 }
 0x6ce   :  { %3904 = dma.vmem_to_hbm [thread:$0]  %s3897_s29, 256, %s3899_s7, [#allocation3], %s4616_s8, %s4616_s8, %s4617_s9  }
 0x6cf   :  { %4597 = dma.done.wait [#allocation3], 256  }
 0x6d0   :  { %4598 = vsyncadd [#allocation3], 4294967040 }
 0x6d1   :  { %3909 = vsyncpa [#allocation3], 1 }

</bundles_post_ra>
